<compile_context>
chip_gen: v7x
topology: tpu7x:2x2x1
jax: 0.10.0
libtpu: 0.0.40
codegen_flags: <defaults>
</compile_context>

<pallas_src>
import jax
import jax.numpy as jnp
from jax.experimental import pallas as pl
from jax.experimental.pallas import tpu as pltpu


# ----------------------------- in-kernel helpers -----------------------------

def _elu(t):
    # F.elu with alpha=1 (overflow-safe form).
    return jnp.where(t > 0, t, jnp.exp(jnp.minimum(t, 0.0)) - 1.0)


def _concat_elu(x):
    # torch: F.elu(cat([x, -x], dim=channel)); channel is the last axis here.
    return _elu(jnp.concatenate([x, -x], axis=-1))


def _sigmoid(t):
    # exp + approximate reciprocal both land on the EUP slot.
    return pl.reciprocal(1.0 + jnp.exp(-t), approx=True)


def _im2col_causal(xe, kh, kw, pad_left, pad_right):
    """Causal zero-pad (top=kh-1, bottom=0, left/right as given) + im2col.

    xe: (H, W, C2).  Returns (H*W, kh*kw*C2) where column
    (ky*kw + kx)*C2 + c  ==  xe_padded[h + ky, w + kx, c].
    """
    H, W, C2 = xe.shape
    pad_top = kh - 1
    x = jnp.concatenate([jnp.zeros((pad_top, W, C2), xe.dtype), xe], axis=0)
    if pad_left or pad_right:
        parts = []
        if pad_left:
            parts.append(jnp.zeros((H + pad_top, pad_left, C2), xe.dtype))
        parts.append(x)
        if pad_right:
            parts.append(jnp.zeros((H + pad_top, pad_right, C2), xe.dtype))
        x = jnp.concatenate(parts, axis=1)
    cols = []
    for ky in range(kh):
        for kx in range(kw):
            cols.append(x[ky:ky + H, kx:kx + W, :].reshape(H * W, C2))
    return jnp.concatenate(cols, axis=-1)


# --------------------------------- kernel ------------------------------------

def _pixelcnn_up_kernel(
        # inputs
        u0_ref, ul0_ref,
        u_w1_ref, u_b1_ref, u_w2a_ref, u_w2b_ref, u_b2a_ref, u_b2b_ref,
        ul_w1_ref, ul_b1_ref, ul_wn_ref, ul_bn_ref,
        ul_w2a_ref, ul_w2b_ref, ul_b2a_ref, ul_b2b_ref,
        # outputs (per-step list entries, stacked)
        u_out_ref, ul_out_ref,
        # scratch: running activations, resident across the resnet-step axis
        u_cur, ul_cur):
    r = pl.program_id(1)

    @pl.when(r == 0)
    def _():
        u_cur[...] = u0_ref[...].astype(jnp.float32)
        ul_cur[...] = ul0_ref[...].astype(jnp.float32)

    H, W, C = u_cur.shape
    HW = H * W
    f32 = jnp.float32
    bf16 = jnp.bfloat16

    def mm(cols, w_ref, b_ref):
        return jnp.dot(cols, w_ref[...], preferred_element_type=f32) + b_ref[...]

    # ---- u stream: gated_resnet(down_shifted_conv2d, filter (2,3)), no skip ----
    x = u_cur[...]                                                    # (H, W, C) f32
    cols1 = _im2col_causal(_concat_elu(x), 2, 3, 1, 1).astype(bf16)   # (HW, 384)
    h = mm(cols1, u_w1_ref, u_b1_ref)                                 # (HW, C)
    # TODO(synk): dropout treated as identity (eval-mode forward).
    cols2 = _im2col_causal(_concat_elu(h.reshape(H, W, C)), 2, 3, 1, 1).astype(bf16)
    ga = mm(cols2, u_w2a_ref, u_b2a_ref)                              # (HW, C)
    gb = mm(cols2, u_w2b_ref, u_b2b_ref)                              # (HW, C)
    u_new = x + (ga * _sigmoid(gb)).reshape(H, W, C)

    # ---- ul stream: gated_resnet(down_right_shifted_conv2d, filter (2,2)),
    # ----            skip = nin(concat_elu(u_new)) ------------------------------
    xl = ul_cur[...]                                                  # (H, W, C) f32
    colsl1 = _im2col_causal(_concat_elu(xl), 2, 2, 1, 0).astype(bf16)  # (HW, 256)
    hl = mm(colsl1, ul_w1_ref, ul_b1_ref)                             # (HW, C)
    ae = _concat_elu(u_new).reshape(HW, 2 * C).astype(bf16)
    hl = hl + mm(ae, ul_wn_ref, ul_bn_ref)                            # nin skip
    colsl2 = _im2col_causal(_concat_elu(hl.reshape(H, W, C)), 2, 2, 1, 0).astype(bf16)
    gla = mm(colsl2, ul_w2a_ref, ul_b2a_ref)
    glb = mm(colsl2, ul_w2b_ref, ul_b2b_ref)
    ul_new = xl + (gla * _sigmoid(glb)).reshape(H, W, C)

    u_cur[...] = u_new
    ul_cur[...] = ul_new
    u_out_ref[...] = u_new.astype(u_out_ref.dtype)
    ul_out_ref[...] = ul_new.astype(ul_out_ref.dtype)


# --------------------------------- wrapper -----------------------------------

_WEIGHT_ORDER = ("u_w1", "u_b1", "u_w2a", "u_w2b", "u_b2a", "u_b2b",
                 "ul_w1", "ul_b1", "ul_wn", "ul_bn",
                 "ul_w2a", "ul_w2b", "ul_b2a", "ul_b2b")


def pixelcnn_layer_up(u, ul, packed):
    """Forward of PixelCNNLayer_up.  u, ul: (N, H, W, C) NHWC."""
    N, H, W, C = u.shape
    R = packed["u_w1"].shape[0]

    act_spec = pl.BlockSpec((None, H, W, C), lambda n, r: (n, 0, 0, 0))
    out_spec = pl.BlockSpec((None, None, H, W, C), lambda n, r: (r, n, 0, 0, 0))

    def step_spec(arr):
        nd = len(arr.shape) - 1
        return pl.BlockSpec((None,) + arr.shape[1:],
                            lambda n, r, _nd=nd: (r,) + (0,) * _nd)

    weights = [packed[k] for k in _WEIGHT_ORDER]

    u_out, ul_out = pl.pallas_call(
        _pixelcnn_up_kernel,
        grid=(N, R),
        in_specs=[act_spec, act_spec] + [step_spec(w) for w in weights],
        out_specs=(out_spec, out_spec),
        out_shape=(jax.ShapeDtypeStruct((R, N, H, W, C), u.dtype),
                   jax.ShapeDtypeStruct((R, N, H, W, C), ul.dtype)),
        scratch_shapes=[pltpu.VMEM((H, W, C), jnp.float32),
                        pltpu.VMEM((H, W, C), jnp.float32)],
        compiler_params=pltpu.CompilerParams(
            dimension_semantics=("parallel", "arbitrary"),
            vmem_limit_bytes=32 * 1024 * 1024),
    )(u, ul, *weights)

    return [u_out[i] for i in range(R)], [ul_out[i] for i in range(R)]


# ----------------------------- parameter handling -----------------------------

def init_params(key, nr_resnet, nr_filters, scale=0.05):
    """Per-step effective weights; conv weights in [KH, KW, Cin, Cout] layout
    (= torch weight [Cout, Cin, KH, KW].transpose(2, 3, 1, 0)); nin weight is
    [Cin, Cout] (= torch Linear W.T)."""
    C = nr_filters
    params = []
    for _ in range(nr_resnet):
        keys = jax.random.split(key, 11)
        key = keys[0]
        p = {
            # u stream: down_shifted_conv2d, filter (2,3)
            "u_w1": scale * jax.random.normal(keys[1], (2, 3, 2 * C, C), jnp.float32),
            "u_b1": scale * jax.random.normal(keys[2], (1, C), jnp.float32),
            "u_w2": scale * jax.random.normal(keys[3], (2, 3, 2 * C, 2 * C), jnp.float32),
            "u_b2": scale * jax.random.normal(keys[4], (1, 2 * C), jnp.float32),
            # ul stream: down_right_shifted_conv2d, filter (2,2), + nin skip
            "ul_w1": scale * jax.random.normal(keys[5], (2, 2, 2 * C, C), jnp.float32),
            "ul_b1": scale * jax.random.normal(keys[6], (1, C), jnp.float32),
            "ul_wn": scale * jax.random.normal(keys[7], (2 * C, C), jnp.float32),
            "ul_bn": scale * jax.random.normal(keys[8], (1, C), jnp.float32),
            "ul_w2": scale * jax.random.normal(keys[9], (2, 2, 2 * C, 2 * C), jnp.float32),
            "ul_b2": scale * jax.random.normal(keys[10], (1, 2 * C), jnp.float32),
        }
        params.append(p)
    return params


def pack_params(params, matmul_dtype=jnp.bfloat16):
    """Stack per-step params, reshape conv weights to the im2col layout, split
    the gating conv/bias along Cout, cast matmul operands to bf16."""
    C = params[0]["u_b1"].shape[-1]

    def stack(name):
        return jnp.stack([p[name] for p in params])

    def conv_w(w):  # (R, KH, KW, Cin, Cout) -> (R, KH*KW*Cin, Cout)
        R, KH, KW, Cin, Cout = w.shape
        return w.reshape(R, KH * KW * Cin, Cout).astype(matmul_dtype)

    def bias(b):    # (R, 1, Cb), keep f32
        return b.astype(jnp.float32)

    u_w2, ul_w2 = stack("u_w2"), stack("ul_w2")
    u_b2, ul_b2 = stack("u_b2"), stack("ul_b2")
    return {
        "u_w1": conv_w(stack("u_w1")),
        "u_b1": bias(stack("u_b1")),
        "u_w2a": conv_w(u_w2[..., :C]),
        "u_w2b": conv_w(u_w2[..., C:]),
        "u_b2a": bias(u_b2[..., :C]),
        "u_b2b": bias(u_b2[..., C:]),
        "ul_w1": conv_w(stack("ul_w1")),
        "ul_b1": bias(stack("ul_b1")),
        "ul_wn": stack("ul_wn").astype(matmul_dtype),
        "ul_bn": bias(stack("ul_bn")),
        "ul_w2a": conv_w(ul_w2[..., :C]),
        "ul_w2b": conv_w(ul_w2[..., C:]),
        "ul_b2a": bias(ul_b2[..., :C]),
        "ul_b2b": bias(ul_b2[..., C:]),
    }


# --------------------------- pure-JAX f32 reference ---------------------------

def _ref_pixelcnn_layer_up(u, ul, params):
    C = u.shape[-1]

    def celu(x):
        return jax.nn.elu(jnp.concatenate([x, -x], axis=-1))

    def conv(x, w, b, pad_w):
        xp = jnp.pad(x, ((0, 0), (1, 0), pad_w, (0, 0)))
        y = jax.lax.conv_general_dilated(
            xp, w, (1, 1), "VALID",
            dimension_numbers=("NHWC", "HWIO", "NHWC"))
        return y + b.reshape(1, 1, 1, -1)

    def gated_u(x, p):
        h = conv(celu(x), p["u_w1"], p["u_b1"], (1, 1))
        h = conv(celu(h), p["u_w2"], p["u_b2"], (1, 1))
        a, b = h[..., :C], h[..., C:]
        return x + a * jax.nn.sigmoid(b)

    def gated_ul(x, aa, p):
        h = conv(celu(x), p["ul_w1"], p["ul_b1"], (1, 0))
        h = h + celu(aa) @ p["ul_wn"] + p["ul_bn"].reshape(1, 1, 1, -1)
        h = conv(celu(h), p["ul_w2"], p["ul_b2"], (1, 0))
        a, b = h[..., :C], h[..., C:]
        return x + a * jax.nn.sigmoid(b)

    u_list, ul_list = [], []
    for p in params:
        u = gated_u(u, p)
        ul = gated_ul(ul, u, p)
        u_list.append(u)
        ul_list.append(ul)
    return u_list, ul_list


# ------------------------------------ main ------------------------------------

if __name__ == "__main__":
    nr_resnet = 2
    nr_filters = 32
    N, H, W = 2, 8, 8

    key = jax.random.PRNGKey(0)
    k_u, k_ul, k_p = jax.random.split(key, 3)

    u = jax.random.normal(k_u, (N, H, W, nr_filters), jnp.float32)
    ul = jax.random.normal(k_ul, (N, H, W, nr_filters), jnp.float32)
    params = init_params(k_p, nr_resnet, nr_filters)
    packed = pack_params(params)

    u_list, ul_list = pixelcnn_layer_up(u, ul, packed)
    jax.block_until_ready((u_list, ul_list))

    assert len(u_list) == nr_resnet and len(ul_list) == nr_resnet
    for t in u_list + ul_list:
        assert t.shape == (N, H, W, nr_filters)
        assert bool(jnp.all(jnp.isfinite(t)))

    # Correctness vs. pure-JAX f32 reference (bf16 matmul operands and the
    # approximate reciprocal in the kernel => allow a small tolerance).
    u_ref, ul_ref = _ref_pixelcnn_layer_up(u, ul, params)
    for got, ref in zip(u_list + ul_list, u_ref + ul_ref):
        err = float(jnp.max(jnp.abs(got - ref)))
        assert err < 1e-1, f"max abs error vs reference: {err}"

    print("KERNEL_OK")
</pallas_src>

<mosaic_0001>
module attributes {stable_mosaic.version = 11 : i64} {
  func.func @_pixelcnn_up_kernel(%arg0: i32, %arg1: i32, %arg2: memref<1x8x8x32xf32, #tpu.memory_space<vmem>>, %arg3: memref<1x8x8x32xf32, #tpu.memory_space<vmem>>, %arg4: memref<1x384x32xbf16, #tpu.memory_space<vmem>>, %arg5: memref<1x1x32xf32, #tpu.memory_space<vmem>>, %arg6: memref<1x384x32xbf16, #tpu.memory_space<vmem>>, %arg7: memref<1x384x32xbf16, #tpu.memory_space<vmem>>, %arg8: memref<1x1x32xf32, #tpu.memory_space<vmem>>, %arg9: memref<1x1x32xf32, #tpu.memory_space<vmem>>, %arg10: memref<1x256x32xbf16, #tpu.memory_space<vmem>>, %arg11: memref<1x1x32xf32, #tpu.memory_space<vmem>>, %arg12: memref<1x64x32xbf16, #tpu.memory_space<vmem>>, %arg13: memref<1x1x32xf32, #tpu.memory_space<vmem>>, %arg14: memref<1x256x32xbf16, #tpu.memory_space<vmem>>, %arg15: memref<1x256x32xbf16, #tpu.memory_space<vmem>>, %arg16: memref<1x1x32xf32, #tpu.memory_space<vmem>>, %arg17: memref<1x1x32xf32, #tpu.memory_space<vmem>>, %arg18: memref<1x1x8x8x32xf32, #tpu.memory_space<vmem>>, %arg19: memref<1x1x8x8x32xf32, #tpu.memory_space<vmem>>, %arg20: memref<8x8x32xf32, #tpu.memory_space<vmem>>, %arg21: memref<8x8x32xf32, #tpu.memory_space<vmem>>) attributes {dimension_semantics = [#tpu.dimension_semantics<parallel>, #tpu.dimension_semantics<arbitrary>], iteration_bounds = array<i64: 2, 2>, scalar_prefetch = 0 : i64, scratch_operands = 2 : i64, tpu.core_type = #tpu.core_type<tc>, window_params = [{transform_indices = @transform_0, window_bounds = array<i64: 1, 8, 8, 32>}, {transform_indices = @transform_1, window_bounds = array<i64: 1, 8, 8, 32>}, {transform_indices = @transform_2, window_bounds = array<i64: 1, 384, 32>}, {transform_indices = @transform_3, window_bounds = array<i64: 1, 1, 32>}, {transform_indices = @transform_4, window_bounds = array<i64: 1, 384, 32>}, {transform_indices = @transform_5, window_bounds = array<i64: 1, 384, 32>}, {transform_indices = @transform_6, window_bounds = array<i64: 1, 1, 32>}, {transform_indices = @transform_7, window_bounds = array<i64: 1, 1, 32>}, {transform_indices = @transform_8, window_bounds = array<i64: 1, 256, 32>}, {transform_indices = @transform_9, window_bounds = array<i64: 1, 1, 32>}, {transform_indices = @transform_10, window_bounds = array<i64: 1, 64, 32>}, {transform_indices = @transform_11, window_bounds = array<i64: 1, 1, 32>}, {transform_indices = @transform_12, window_bounds = array<i64: 1, 256, 32>}, {transform_indices = @transform_13, window_bounds = array<i64: 1, 256, 32>}, {transform_indices = @transform_14, window_bounds = array<i64: 1, 1, 32>}, {transform_indices = @transform_15, window_bounds = array<i64: 1, 1, 32>}, {transform_indices = @transform_16, window_bounds = array<i64: 1, 1, 8, 8, 32>}, {transform_indices = @transform_17, window_bounds = array<i64: 1, 1, 8, 8, 32>}]} {
    %c0_i32 = arith.constant 0 : i32
    %0 = arith.cmpi eq, %arg1, %c0_i32 : i32
    %1 = arith.extui %0 : i1 to i32
    %c0_i32_0 = arith.constant 0 : i32
    %2 = arith.cmpi ne, %1, %c0_i32_0 : i32
    scf.if %2 {
      %c0_104 = arith.constant 0 : index
      %c0_105 = arith.constant 0 : index
      %c0_106 = arith.constant 0 : index
      %c0_107 = arith.constant 0 : index
      %206 = vector.load %arg2[%c0_104, %c0_105, %c0_106, %c0_107] : memref<1x8x8x32xf32, #tpu.memory_space<vmem>>, vector<1x8x8x32xf32>
      %207 = vector.shape_cast %206 : vector<1x8x8x32xf32> to vector<8x8x32xf32>
      %c0_108 = arith.constant 0 : index
      %c0_109 = arith.constant 0 : index
      %c0_110 = arith.constant 0 : index
      %208 = vector.load %arg20[%c0_108, %c0_109, %c0_110] : memref<8x8x32xf32, #tpu.memory_space<vmem>>, vector<8x8x32xf32>
      tpu.vector_store %arg20[%c0_108, %c0_109, %c0_110], %207 {strides = array<i32>} : memref<8x8x32xf32, #tpu.memory_space<vmem>>, vector<8x8x32xf32>,
      %c0_111 = arith.constant 0 : index
      %c0_112 = arith.constant 0 : index
      %c0_113 = arith.constant 0 : index
      %c0_114 = arith.constant 0 : index
      %209 = vector.load %arg3[%c0_111, %c0_112, %c0_113, %c0_114] : memref<1x8x8x32xf32, #tpu.memory_space<vmem>>, vector<1x8x8x32xf32>
      %210 = vector.shape_cast %209 : vector<1x8x8x32xf32> to vector<8x8x32xf32>
      %c0_115 = arith.constant 0 : index
      %c0_116 = arith.constant 0 : index
      %c0_117 = arith.constant 0 : index
      %211 = vector.load %arg21[%c0_115, %c0_116, %c0_117] : memref<8x8x32xf32, #tpu.memory_space<vmem>>, vector<8x8x32xf32>
      tpu.vector_store %arg21[%c0_115, %c0_116, %c0_117], %210 {strides = array<i32>} : memref<8x8x32xf32, #tpu.memory_space<vmem>>, vector<8x8x32xf32>,
    } else {
    }
    %c0 = arith.constant 0 : index
    %c0_1 = arith.constant 0 : index
    %c0_2 = arith.constant 0 : index
    %3 = vector.load %arg20[%c0, %c0_1, %c0_2] : memref<8x8x32xf32, #tpu.memory_space<vmem>>, vector<8x8x32xf32>
    %cst = arith.constant 0.000000e+00 : f32
    %4 = vector.broadcast %cst : f32 to vector<8x8x32xf32>
    %5 = arith.subf %4, %3 : vector<8x8x32xf32>
    %6 = tpu.concatenate %3, %5 in 2 : vector<8x8x32xf32>, vector<8x8x32xf32> -> vector<8x8x64xf32>
    %cst_3 = arith.constant 0.000000e+00 : f32
    %7 = vector.broadcast %cst_3 : f32 to vector<8x8x64xf32>
    %8 = arith.cmpf ogt, %6, %7 : vector<8x8x64xf32>
    %cst_4 = arith.constant 0.000000e+00 : f32
    %9 = vector.broadcast %cst_4 : f32 to vector<8x8x64xf32>
    %10 = arith.minimumf %6, %9 : vector<8x8x64xf32>
    %11 = math.exp %10 : vector<8x8x64xf32>
    %cst_5 = arith.constant 1.000000e+00 : f32
    %12 = vector.broadcast %cst_5 : f32 to vector<8x8x64xf32>
    %13 = arith.subf %11, %12 : vector<8x8x64xf32>
    %14 = arith.select %8, %6, %13 : vector<8x8x64xi1>, vector<8x8x64xf32>
    %cst_6 = arith.constant 0.000000e+00 : f32
    %15 = vector.broadcast %cst_6 : f32 to vector<1x8x64xf32>
    %16 = tpu.concatenate %15, %14 in 0 : vector<1x8x64xf32>, vector<8x8x64xf32> -> vector<9x8x64xf32>
    %cst_7 = arith.constant 0.000000e+00 : f32
    %17 = vector.broadcast %cst_7 : f32 to vector<9x1x64xf32>
    %cst_8 = arith.constant 0.000000e+00 : f32
    %18 = vector.broadcast %cst_8 : f32 to vector<9x1x64xf32>
    %19 = tpu.concatenate %17, %16, %18 in 1 : vector<9x1x64xf32>, vector<9x8x64xf32>, vector<9x1x64xf32> -> vector<9x10x64xf32>
    %20 = vector.extract_strided_slice %19 {offsets = [0, 0, 0], sizes = [8, 8, 64], strides = [1, 1, 1]} : vector<9x10x64xf32> to vector<8x8x64xf32>
    %21 = vector.shape_cast %20 : vector<8x8x64xf32> to vector<64x64xf32>
    %22 = vector.extract_strided_slice %19 {offsets = [0, 1, 0], sizes = [8, 8, 64], strides = [1, 1, 1]} : vector<9x10x64xf32> to vector<8x8x64xf32>
    %23 = vector.shape_cast %22 : vector<8x8x64xf32> to vector<64x64xf32>
    %24 = vector.extract_strided_slice %19 {offsets = [0, 2, 0], sizes = [8, 8, 64], strides = [1, 1, 1]} : vector<9x10x64xf32> to vector<8x8x64xf32>
    %25 = vector.shape_cast %24 : vector<8x8x64xf32> to vector<64x64xf32>
    %26 = vector.extract_strided_slice %19 {offsets = [1, 0, 0], sizes = [8, 8, 64], strides = [1, 1, 1]} : vector<9x10x64xf32> to vector<8x8x64xf32>
    %27 = vector.shape_cast %26 : vector<8x8x64xf32> to vector<64x64xf32>
    %28 = vector.extract_strided_slice %19 {offsets = [1, 1, 0], sizes = [8, 8, 64], strides = [1, 1, 1]} : vector<9x10x64xf32> to vector<8x8x64xf32>
    %29 = vector.shape_cast %28 : vector<8x8x64xf32> to vector<64x64xf32>
    %30 = vector.extract_strided_slice %19 {offsets = [1, 2, 0], sizes = [8, 8, 64], strides = [1, 1, 1]} : vector<9x10x64xf32> to vector<8x8x64xf32>
    %31 = vector.shape_cast %30 : vector<8x8x64xf32> to vector<64x64xf32>
    %32 = tpu.concatenate %21, %23, %25, %27, %29, %31 in 1 : vector<64x64xf32>, vector<64x64xf32>, vector<64x64xf32>, vector<64x64xf32>, vector<64x64xf32>, vector<64x64xf32> -> vector<64x384xf32>
    %33 = arith.truncf %32 : vector<64x384xf32> to vector<64x384xbf16>
    %c0_9 = arith.constant 0 : index
    %c0_10 = arith.constant 0 : index
    %c0_11 = arith.constant 0 : index
    %34 = vector.load %arg4[%c0_9, %c0_10, %c0_11] : memref<1x384x32xbf16, #tpu.memory_space<vmem>>, vector<1x384x32xbf16>
    %35 = vector.shape_cast %34 : vector<1x384x32xbf16> to vector<384x32xbf16>
    %cst_12 = arith.constant dense<0.000000e+00> : vector<64x32xf32>
    %36 = tpu.matmul %33, %35, %cst_12 {dimension_numbers = #tpu.dot_dimension_numbers<[1], [0], [0], [1], [0, 0, 1, 1], [], []>} : vector<64x384xbf16>, vector<384x32xbf16>, vector<64x32xf32> -> vector<64x32xf32>
    %c0_13 = arith.constant 0 : index
    %c0_14 = arith.constant 0 : index
    %c0_15 = arith.constant 0 : index
    %37 = vector.load %arg5[%c0_13, %c0_14, %c0_15] : memref<1x1x32xf32, #tpu.memory_space<vmem>>, vector<1x1x32xf32>
    %38 = vector.shape_cast %37 : vector<1x1x32xf32> to vector<1x32xf32>
    %39 = vector.broadcast %38 : vector<1x32xf32> to vector<64x32xf32>
    %40 = arith.addf %36, %39 : vector<64x32xf32>
    %41 = vector.shape_cast %40 : vector<64x32xf32> to vector<8x8x32xf32>
    %cst_16 = arith.constant 0.000000e+00 : f32
    %42 = vector.broadcast %cst_16 : f32 to vector<8x8x32xf32>
    %43 = arith.subf %42, %41 : vector<8x8x32xf32>
    %44 = tpu.concatenate %41, %43 in 2 : vector<8x8x32xf32>, vector<8x8x32xf32> -> vector<8x8x64xf32>
    %cst_17 = arith.constant 0.000000e+00 : f32
    %45 = vector.broadcast %cst_17 : f32 to vector<8x8x64xf32>
    %46 = arith.cmpf ogt, %44, %45 : vector<8x8x64xf32>
    %cst_18 = arith.constant 0.000000e+00 : f32
    %47 = vector.broadcast %cst_18 : f32 to vector<8x8x64xf32>
    %48 = arith.minimumf %44, %47 : vector<8x8x64xf32>
    %49 = math.exp %48 : vector<8x8x64xf32>
    %cst_19 = arith.constant 1.000000e+00 : f32
    %50 = vector.broadcast %cst_19 : f32 to vector<8x8x64xf32>
    %51 = arith.subf %49, %50 : vector<8x8x64xf32>
    %52 = arith.select %46, %44, %51 : vector<8x8x64xi1>, vector<8x8x64xf32>
    %cst_20 = arith.constant 0.000000e+00 : f32
    %53 = vector.broadcast %cst_20 : f32 to vector<1x8x64xf32>
    %54 = tpu.concatenate %53, %52 in 0 : vector<1x8x64xf32>, vector<8x8x64xf32> -> vector<9x8x64xf32>
    %cst_21 = arith.constant 0.000000e+00 : f32
    %55 = vector.broadcast %cst_21 : f32 to vector<9x1x64xf32>
    %cst_22 = arith.constant 0.000000e+00 : f32
    %56 = vector.broadcast %cst_22 : f32 to vector<9x1x64xf32>
    %57 = tpu.concatenate %55, %54, %56 in 1 : vector<9x1x64xf32>, vector<9x8x64xf32>, vector<9x1x64xf32> -> vector<9x10x64xf32>
    %58 = vector.extract_strided_slice %57 {offsets = [0, 0, 0], sizes = [8, 8, 64], strides = [1, 1, 1]} : vector<9x10x64xf32> to vector<8x8x64xf32>
    %59 = vector.shape_cast %58 : vector<8x8x64xf32> to vector<64x64xf32>
    %60 = vector.extract_strided_slice %57 {offsets = [0, 1, 0], sizes = [8, 8, 64], strides = [1, 1, 1]} : vector<9x10x64xf32> to vector<8x8x64xf32>
    %61 = vector.shape_cast %60 : vector<8x8x64xf32> to vector<64x64xf32>
    %62 = vector.extract_strided_slice %57 {offsets = [0, 2, 0], sizes = [8, 8, 64], strides = [1, 1, 1]} : vector<9x10x64xf32> to vector<8x8x64xf32>
    %63 = vector.shape_cast %62 : vector<8x8x64xf32> to vector<64x64xf32>
    %64 = vector.extract_strided_slice %57 {offsets = [1, 0, 0], sizes = [8, 8, 64], strides = [1, 1, 1]} : vector<9x10x64xf32> to vector<8x8x64xf32>
    %65 = vector.shape_cast %64 : vector<8x8x64xf32> to vector<64x64xf32>
    %66 = vector.extract_strided_slice %57 {offsets = [1, 1, 0], sizes = [8, 8, 64], strides = [1, 1, 1]} : vector<9x10x64xf32> to vector<8x8x64xf32>
    %67 = vector.shape_cast %66 : vector<8x8x64xf32> to vector<64x64xf32>
    %68 = vector.extract_strided_slice %57 {offsets = [1, 2, 0], sizes = [8, 8, 64], strides = [1, 1, 1]} : vector<9x10x64xf32> to vector<8x8x64xf32>
    %69 = vector.shape_cast %68 : vector<8x8x64xf32> to vector<64x64xf32>
    %70 = tpu.concatenate %59, %61, %63, %65, %67, %69 in 1 : vector<64x64xf32>, vector<64x64xf32>, vector<64x64xf32>, vector<64x64xf32>, vector<64x64xf32>, vector<64x64xf32> -> vector<64x384xf32>
    %71 = arith.truncf %70 : vector<64x384xf32> to vector<64x384xbf16>
    %c0_23 = arith.constant 0 : index
    %c0_24 = arith.constant 0 : index
    %c0_25 = arith.constant 0 : index
    %72 = vector.load %arg6[%c0_23, %c0_24, %c0_25] : memref<1x384x32xbf16, #tpu.memory_space<vmem>>, vector<1x384x32xbf16>
    %73 = vector.shape_cast %72 : vector<1x384x32xbf16> to vector<384x32xbf16>
    %cst_26 = arith.constant dense<0.000000e+00> : vector<64x32xf32>
    %74 = tpu.matmul %71, %73, %cst_26 {dimension_numbers = #tpu.dot_dimension_numbers<[1], [0], [0], [1], [0, 0, 1, 1], [], []>} : vector<64x384xbf16>, vector<384x32xbf16>, vector<64x32xf32> -> vector<64x32xf32>
    %c0_27 = arith.constant 0 : index
    %c0_28 = arith.constant 0 : index
    %c0_29 = arith.constant 0 : index
    %75 = vector.load %arg8[%c0_27, %c0_28, %c0_29] : memref<1x1x32xf32, #tpu.memory_space<vmem>>, vector<1x1x32xf32>
    %76 = vector.shape_cast %75 : vector<1x1x32xf32> to vector<1x32xf32>
    %77 = vector.broadcast %76 : vector<1x32xf32> to vector<64x32xf32>
    %78 = arith.addf %74, %77 : vector<64x32xf32>
    %c0_30 = arith.constant 0 : index
    %c0_31 = arith.constant 0 : index
    %c0_32 = arith.constant 0 : index
    %79 = vector.load %arg7[%c0_30, %c0_31, %c0_32] : memref<1x384x32xbf16, #tpu.memory_space<vmem>>, vector<1x384x32xbf16>
    %80 = vector.shape_cast %79 : vector<1x384x32xbf16> to vector<384x32xbf16>
    %cst_33 = arith.constant dense<0.000000e+00> : vector<64x32xf32>
    %81 = tpu.matmul %71, %80, %cst_33 {dimension_numbers = #tpu.dot_dimension_numbers<[1], [0], [0], [1], [0, 0, 1, 1], [], []>} : vector<64x384xbf16>, vector<384x32xbf16>, vector<64x32xf32> -> vector<64x32xf32>
    %c0_34 = arith.constant 0 : index
    %c0_35 = arith.constant 0 : index
    %c0_36 = arith.constant 0 : index
    %82 = vector.load %arg9[%c0_34, %c0_35, %c0_36] : memref<1x1x32xf32, #tpu.memory_space<vmem>>, vector<1x1x32xf32>
    %83 = vector.shape_cast %82 : vector<1x1x32xf32> to vector<1x32xf32>
    %84 = vector.broadcast %83 : vector<1x32xf32> to vector<64x32xf32>
    %85 = arith.addf %81, %84 : vector<64x32xf32>
    %cst_37 = arith.constant 0.000000e+00 : f32
    %86 = vector.broadcast %cst_37 : f32 to vector<64x32xf32>
    %87 = arith.subf %86, %85 : vector<64x32xf32>
    %88 = math.exp %87 : vector<64x32xf32>
    %cst_38 = arith.constant 1.000000e+00 : f32
    %89 = vector.broadcast %cst_38 : f32 to vector<64x32xf32>
    %90 = arith.addf %89, %88 : vector<64x32xf32>
    %91 = tpu.reciprocal %90 {approx = true} : vector<64x32xf32> -> vector<64x32xf32>
    %92 = arith.mulf %78, %91 : vector<64x32xf32>
    %93 = vector.shape_cast %92 : vector<64x32xf32> to vector<8x8x32xf32>
    %94 = arith.addf %3, %93 : vector<8x8x32xf32>
    %c0_39 = arith.constant 0 : index
    %c0_40 = arith.constant 0 : index
    %c0_41 = arith.constant 0 : index
    %95 = vector.load %arg21[%c0_39, %c0_40, %c0_41] : memref<8x8x32xf32, #tpu.memory_space<vmem>>, vector<8x8x32xf32>
    %cst_42 = arith.constant 0.000000e+00 : f32
    %96 = vector.broadcast %cst_42 : f32 to vector<8x8x32xf32>
    %97 = arith.subf %96, %95 : vector<8x8x32xf32>
    %98 = tpu.concatenate %95, %97 in 2 : vector<8x8x32xf32>, vector<8x8x32xf32> -> vector<8x8x64xf32>
    %cst_43 = arith.constant 0.000000e+00 : f32
    %99 = vector.broadcast %cst_43 : f32 to vector<8x8x64xf32>
    %100 = arith.cmpf ogt, %98, %99 : vector<8x8x64xf32>
    %cst_44 = arith.constant 0.000000e+00 : f32
    %101 = vector.broadcast %cst_44 : f32 to vector<8x8x64xf32>
    %102 = arith.minimumf %98, %101 : vector<8x8x64xf32>
    %103 = math.exp %102 : vector<8x8x64xf32>
    %cst_45 = arith.constant 1.000000e+00 : f32
    %104 = vector.broadcast %cst_45 : f32 to vector<8x8x64xf32>
    %105 = arith.subf %103, %104 : vector<8x8x64xf32>
    %106 = arith.select %100, %98, %105 : vector<8x8x64xi1>, vector<8x8x64xf32>
    %cst_46 = arith.constant 0.000000e+00 : f32
    %107 = vector.broadcast %cst_46 : f32 to vector<1x8x64xf32>
    %108 = tpu.concatenate %107, %106 in 0 : vector<1x8x64xf32>, vector<8x8x64xf32> -> vector<9x8x64xf32>
    %cst_47 = arith.constant 0.000000e+00 : f32
    %109 = vector.broadcast %cst_47 : f32 to vector<9x1x64xf32>
    %110 = tpu.concatenate %109, %108 in 1 : vector<9x1x64xf32>, vector<9x8x64xf32> -> vector<9x9x64xf32>
    %111 = vector.extract_strided_slice %110 {offsets = [0, 0, 0], sizes = [8, 8, 64], strides = [1, 1, 1]} : vector<9x9x64xf32> to vector<8x8x64xf32>
    %112 = vector.shape_cast %111 : vector<8x8x64xf32> to vector<64x64xf32>
    %113 = vector.extract_strided_slice %110 {offsets = [0, 1, 0], sizes = [8, 8, 64], strides = [1, 1, 1]} : vector<9x9x64xf32> to vector<8x8x64xf32>
    %114 = vector.shape_cast %113 : vector<8x8x64xf32> to vector<64x64xf32>
    %115 = vector.extract_strided_slice %110 {offsets = [1, 0, 0], sizes = [8, 8, 64], strides = [1, 1, 1]} : vector<9x9x64xf32> to vector<8x8x64xf32>
    %116 = vector.shape_cast %115 : vector<8x8x64xf32> to vector<64x64xf32>
    %117 = vector.extract_strided_slice %110 {offsets = [1, 1, 0], sizes = [8, 8, 64], strides = [1, 1, 1]} : vector<9x9x64xf32> to vector<8x8x64xf32>
    %118 = vector.shape_cast %117 : vector<8x8x64xf32> to vector<64x64xf32>
    %119 = tpu.concatenate %112, %114, %116, %118 in 1 : vector<64x64xf32>, vector<64x64xf32>, vector<64x64xf32>, vector<64x64xf32> -> vector<64x256xf32>
    %120 = arith.truncf %119 : vector<64x256xf32> to vector<64x256xbf16>
    %c0_48 = arith.constant 0 : index
    %c0_49 = arith.constant 0 : index
    %c0_50 = arith.constant 0 : index
    %121 = vector.load %arg10[%c0_48, %c0_49, %c0_50] : memref<1x256x32xbf16, #tpu.memory_space<vmem>>, vector<1x256x32xbf16>
    %122 = vector.shape_cast %121 : vector<1x256x32xbf16> to vector<256x32xbf16>
    %cst_51 = arith.constant dense<0.000000e+00> : vector<64x32xf32>
    %123 = tpu.matmul %120, %122, %cst_51 {dimension_numbers = #tpu.dot_dimension_numbers<[1], [0], [0], [1], [0, 0, 1, 1], [], []>} : vector<64x256xbf16>, vector<256x32xbf16>, vector<64x32xf32> -> vector<64x32xf32>
    %c0_52 = arith.constant 0 : index
    %c0_53 = arith.constant 0 : index
    %c0_54 = arith.constant 0 : index
    %124 = vector.load %arg11[%c0_52, %c0_53, %c0_54] : memref<1x1x32xf32, #tpu.memory_space<vmem>>, vector<1x1x32xf32>
    %125 = vector.shape_cast %124 : vector<1x1x32xf32> to vector<1x32xf32>
    %126 = vector.broadcast %125 : vector<1x32xf32> to vector<64x32xf32>
    %127 = arith.addf %123, %126 : vector<64x32xf32>
    %cst_55 = arith.constant 0.000000e+00 : f32
    %128 = vector.broadcast %cst_55 : f32 to vector<8x8x32xf32>
    %129 = arith.subf %128, %94 : vector<8x8x32xf32>
    %130 = tpu.concatenate %94, %129 in 2 : vector<8x8x32xf32>, vector<8x8x32xf32> -> vector<8x8x64xf32>
    %cst_56 = arith.constant 0.000000e+00 : f32
    %131 = vector.broadcast %cst_56 : f32 to vector<8x8x64xf32>
    %132 = arith.cmpf ogt, %130, %131 : vector<8x8x64xf32>
    %cst_57 = arith.constant 0.000000e+00 : f32
    %133 = vector.broadcast %cst_57 : f32 to vector<8x8x64xf32>
    %134 = arith.minimumf %130, %133 : vector<8x8x64xf32>
    %135 = math.exp %134 : vector<8x8x64xf32>
    %cst_58 = arith.constant 1.000000e+00 : f32
    %136 = vector.broadcast %cst_58 : f32 to vector<8x8x64xf32>
    %137 = arith.subf %135, %136 : vector<8x8x64xf32>
    %138 = arith.select %132, %130, %137 : vector<8x8x64xi1>, vector<8x8x64xf32>
    %139 = vector.shape_cast %138 : vector<8x8x64xf32> to vector<64x64xf32>
    %140 = arith.truncf %139 : vector<64x64xf32> to vector<64x64xbf16>
    %c0_59 = arith.constant 0 : index
    %c0_60 = arith.constant 0 : index
    %c0_61 = arith.constant 0 : index
    %141 = vector.load %arg12[%c0_59, %c0_60, %c0_61] : memref<1x64x32xbf16, #tpu.memory_space<vmem>>, vector<1x64x32xbf16>
    %142 = vector.shape_cast %141 : vector<1x64x32xbf16> to vector<64x32xbf16>
    %cst_62 = arith.constant dense<0.000000e+00> : vector<64x32xf32>
    %143 = tpu.matmul %140, %142, %cst_62 {dimension_numbers = #tpu.dot_dimension_numbers<[1], [0], [0], [1], [0, 0, 1, 1], [], []>} : vector<64x64xbf16>, vector<64x32xbf16>, vector<64x32xf32> -> vector<64x32xf32>
    %c0_63 = arith.constant 0 : index
    %c0_64 = arith.constant 0 : index
    %c0_65 = arith.constant 0 : index
    %144 = vector.load %arg13[%c0_63, %c0_64, %c0_65] : memref<1x1x32xf32, #tpu.memory_space<vmem>>, vector<1x1x32xf32>
    %145 = vector.shape_cast %144 : vector<1x1x32xf32> to vector<1x32xf32>
    %146 = vector.broadcast %145 : vector<1x32xf32> to vector<64x32xf32>
    %147 = arith.addf %143, %146 : vector<64x32xf32>
    %148 = arith.addf %127, %147 : vector<64x32xf32>
    %149 = vector.shape_cast %148 : vector<64x32xf32> to vector<8x8x32xf32>
    %cst_66 = arith.constant 0.000000e+00 : f32
    %150 = vector.broadcast %cst_66 : f32 to vector<8x8x32xf32>
    %151 = arith.subf %150, %149 : vector<8x8x32xf32>
    %152 = tpu.concatenate %149, %151 in 2 : vector<8x8x32xf32>, vector<8x8x32xf32> -> vector<8x8x64xf32>
    %cst_67 = arith.constant 0.000000e+00 : f32
    %153 = vector.broadcast %cst_67 : f32 to vector<8x8x64xf32>
    %154 = arith.cmpf ogt, %152, %153 : vector<8x8x64xf32>
    %cst_68 = arith.constant 0.000000e+00 : f32
    %155 = vector.broadcast %cst_68 : f32 to vector<8x8x64xf32>
    %156 = arith.minimumf %152, %155 : vector<8x8x64xf32>
    %157 = math.exp %156 : vector<8x8x64xf32>
    %cst_69 = arith.constant 1.000000e+00 : f32
    %158 = vector.broadcast %cst_69 : f32 to vector<8x8x64xf32>
    %159 = arith.subf %157, %158 : vector<8x8x64xf32>
    %160 = arith.select %154, %152, %159 : vector<8x8x64xi1>, vector<8x8x64xf32>
    %cst_70 = arith.constant 0.000000e+00 : f32
    %161 = vector.broadcast %cst_70 : f32 to vector<1x8x64xf32>
    %162 = tpu.concatenate %161, %160 in 0 : vector<1x8x64xf32>, vector<8x8x64xf32> -> vector<9x8x64xf32>
    %cst_71 = arith.constant 0.000000e+00 : f32
    %163 = vector.broadcast %cst_71 : f32 to vector<9x1x64xf32>
    %164 = tpu.concatenate %163, %162 in 1 : vector<9x1x64xf32>, vector<9x8x64xf32> -> vector<9x9x64xf32>
    %165 = vector.extract_strided_slice %164 {offsets = [0, 0, 0], sizes = [8, 8, 64], strides = [1, 1, 1]} : vector<9x9x64xf32> to vector<8x8x64xf32>
    %166 = vector.shape_cast %165 : vector<8x8x64xf32> to vector<64x64xf32>
    %167 = vector.extract_strided_slice %164 {offsets = [0, 1, 0], sizes = [8, 8, 64], strides = [1, 1, 1]} : vector<9x9x64xf32> to vector<8x8x64xf32>
    %168 = vector.shape_cast %167 : vector<8x8x64xf32> to vector<64x64xf32>
    %169 = vector.extract_strided_slice %164 {offsets = [1, 0, 0], sizes = [8, 8, 64], strides = [1, 1, 1]} : vector<9x9x64xf32> to vector<8x8x64xf32>
    %170 = vector.shape_cast %169 : vector<8x8x64xf32> to vector<64x64xf32>
    %171 = vector.extract_strided_slice %164 {offsets = [1, 1, 0], sizes = [8, 8, 64], strides = [1, 1, 1]} : vector<9x9x64xf32> to vector<8x8x64xf32>
    %172 = vector.shape_cast %171 : vector<8x8x64xf32> to vector<64x64xf32>
    %173 = tpu.concatenate %166, %168, %170, %172 in 1 : vector<64x64xf32>, vector<64x64xf32>, vector<64x64xf32>, vector<64x64xf32> -> vector<64x256xf32>
    %174 = arith.truncf %173 : vector<64x256xf32> to vector<64x256xbf16>
    %c0_72 = arith.constant 0 : index
    %c0_73 = arith.constant 0 : index
    %c0_74 = arith.constant 0 : index
    %175 = vector.load %arg14[%c0_72, %c0_73, %c0_74] : memref<1x256x32xbf16, #tpu.memory_space<vmem>>, vector<1x256x32xbf16>
    %176 = vector.shape_cast %175 : vector<1x256x32xbf16> to vector<256x32xbf16>
    %cst_75 = arith.constant dense<0.000000e+00> : vector<64x32xf32>
    %177 = tpu.matmul %174, %176, %cst_75 {dimension_numbers = #tpu.dot_dimension_numbers<[1], [0], [0], [1], [0, 0, 1, 1], [], []>} : vector<64x256xbf16>, vector<256x32xbf16>, vector<64x32xf32> -> vector<64x32xf32>
    %c0_76 = arith.constant 0 : index
    %c0_77 = arith.constant 0 : index
    %c0_78 = arith.constant 0 : index
    %178 = vector.load %arg16[%c0_76, %c0_77, %c0_78] : memref<1x1x32xf32, #tpu.memory_space<vmem>>, vector<1x1x32xf32>
    %179 = vector.shape_cast %178 : vector<1x1x32xf32> to vector<1x32xf32>
    %180 = vector.broadcast %179 : vector<1x32xf32> to vector<64x32xf32>
    %181 = arith.addf %177, %180 : vector<64x32xf32>
    %c0_79 = arith.constant 0 : index
    %c0_80 = arith.constant 0 : index
    %c0_81 = arith.constant 0 : index
    %182 = vector.load %arg15[%c0_79, %c0_80, %c0_81] : memref<1x256x32xbf16, #tpu.memory_space<vmem>>, vector<1x256x32xbf16>
    %183 = vector.shape_cast %182 : vector<1x256x32xbf16> to vector<256x32xbf16>
    %cst_82 = arith.constant dense<0.000000e+00> : vector<64x32xf32>
    %184 = tpu.matmul %174, %183, %cst_82 {dimension_numbers = #tpu.dot_dimension_numbers<[1], [0], [0], [1], [0, 0, 1, 1], [], []>} : vector<64x256xbf16>, vector<256x32xbf16>, vector<64x32xf32> -> vector<64x32xf32>
    %c0_83 = arith.constant 0 : index
    %c0_84 = arith.constant 0 : index
    %c0_85 = arith.constant 0 : index
    %185 = vector.load %arg17[%c0_83, %c0_84, %c0_85] : memref<1x1x32xf32, #tpu.memory_space<vmem>>, vector<1x1x32xf32>
    %186 = vector.shape_cast %185 : vector<1x1x32xf32> to vector<1x32xf32>
    %187 = vector.broadcast %186 : vector<1x32xf32> to vector<64x32xf32>
    %188 = arith.addf %184, %187 : vector<64x32xf32>
    %cst_86 = arith.constant 0.000000e+00 : f32
    %189 = vector.broadcast %cst_86 : f32 to vector<64x32xf32>
    %190 = arith.subf %189, %188 : vector<64x32xf32>
    %191 = math.exp %190 : vector<64x32xf32>
    %cst_87 = arith.constant 1.000000e+00 : f32
    %192 = vector.broadcast %cst_87 : f32 to vector<64x32xf32>
    %193 = arith.addf %192, %191 : vector<64x32xf32>
    %194 = tpu.reciprocal %193 {approx = true} : vector<64x32xf32> -> vector<64x32xf32>
    %195 = arith.mulf %181, %194 : vector<64x32xf32>
    %196 = vector.shape_cast %195 : vector<64x32xf32> to vector<8x8x32xf32>
    %197 = arith.addf %95, %196 : vector<8x8x32xf32>
    %c0_88 = arith.constant 0 : index
    %c0_89 = arith.constant 0 : index
    %c0_90 = arith.constant 0 : index
    %198 = vector.load %arg20[%c0_88, %c0_89, %c0_90] : memref<8x8x32xf32, #tpu.memory_space<vmem>>, vector<8x8x32xf32>
    tpu.vector_store %arg20[%c0_88, %c0_89, %c0_90], %94 {strides = array<i32>} : memref<8x8x32xf32, #tpu.memory_space<vmem>>, vector<8x8x32xf32>,
    %c0_91 = arith.constant 0 : index
    %c0_92 = arith.constant 0 : index
    %c0_93 = arith.constant 0 : index
    %199 = vector.load %arg21[%c0_91, %c0_92, %c0_93] : memref<8x8x32xf32, #tpu.memory_space<vmem>>, vector<8x8x32xf32>
    tpu.vector_store %arg21[%c0_91, %c0_92, %c0_93], %197 {strides = array<i32>} : memref<8x8x32xf32, #tpu.memory_space<vmem>>, vector<8x8x32xf32>,
    %c0_94 = arith.constant 0 : index
    %c0_95 = arith.constant 0 : index
    %c0_96 = arith.constant 0 : index
    %c0_97 = arith.constant 0 : index
    %c0_98 = arith.constant 0 : index
    %200 = vector.load %arg18[%c0_94, %c0_95, %c0_96, %c0_97, %c0_98] : memref<1x1x8x8x32xf32, #tpu.memory_space<vmem>>, vector<1x1x8x8x32xf32>
    %201 = vector.shape_cast %200 : vector<1x1x8x8x32xf32> to vector<8x8x32xf32>
    %202 = vector.shape_cast %94 : vector<8x8x32xf32> to vector<1x1x8x8x32xf32>
    tpu.vector_store %arg18[%c0_94, %c0_95, %c0_96, %c0_97, %c0_98], %202 {strides = array<i32>} : memref<1x1x8x8x32xf32, #tpu.memory_space<vmem>>, vector<1x1x8x8x32xf32>,
    %c0_99 = arith.constant 0 : index
    %c0_100 = arith.constant 0 : index
    %c0_101 = arith.constant 0 : index
    %c0_102 = arith.constant 0 : index
    %c0_103 = arith.constant 0 : index
    %203 = vector.load %arg19[%c0_99, %c0_100, %c0_101, %c0_102, %c0_103] : memref<1x1x8x8x32xf32, #tpu.memory_space<vmem>>, vector<1x1x8x8x32xf32>
    %204 = vector.shape_cast %203 : vector<1x1x8x8x32xf32> to vector<8x8x32xf32>
    %205 = vector.shape_cast %197 : vector<8x8x32xf32> to vector<1x1x8x8x32xf32>
    tpu.vector_store %arg19[%c0_99, %c0_100, %c0_101, %c0_102, %c0_103], %205 {strides = array<i32>} : memref<1x1x8x8x32xf32, #tpu.memory_space<vmem>>, vector<1x1x8x8x32xf32>,
    return
  }
  func.func @transform_0(%arg0: i32, %arg1: i32) -> (i32, i32, i32, i32) {
    %c0_i32 = arith.constant 0 : i32
    %c0_i32_0 = arith.constant 0 : i32
    %c0_i32_1 = arith.constant 0 : i32
    %c0_i32_2 = arith.constant 0 : i32
    return %arg0, %c0_i32, %c0_i32_0, %c0_i32_1 : i32, i32, i32, i32
  }
  func.func @transform_1(%arg0: i32, %arg1: i32) -> (i32, i32, i32, i32) {
    %c0_i32 = arith.constant 0 : i32
    %c0_i32_0 = arith.constant 0 : i32
    %c0_i32_1 = arith.constant 0 : i32
    %c0_i32_2 = arith.constant 0 : i32
    return %arg0, %c0_i32, %c0_i32_0, %c0_i32_1 : i32, i32, i32, i32
  }
  func.func @transform_2(%arg0: i32, %arg1: i32) -> (i32, i32, i32) {
    %c0_i32 = arith.constant 0 : i32
    %c0_i32_0 = arith.constant 0 : i32
    %c0_i32_1 = arith.constant 0 : i32
    return %arg1, %c0_i32, %c0_i32_0 : i32, i32, i32
  }
  func.func @transform_3(%arg0: i32, %arg1: i32) -> (i32, i32, i32) {
    %c0_i32 = arith.constant 0 : i32
    %c0_i32_0 = arith.constant 0 : i32
    %c0_i32_1 = arith.constant 0 : i32
    return %arg1, %c0_i32, %c0_i32_0 : i32, i32, i32
  }
  func.func @transform_4(%arg0: i32, %arg1: i32) -> (i32, i32, i32) {
    %c0_i32 = arith.constant 0 : i32
    %c0_i32_0 = arith.constant 0 : i32
    %c0_i32_1 = arith.constant 0 : i32
    return %arg1, %c0_i32, %c0_i32_0 : i32, i32, i32
  }
  func.func @transform_5(%arg0: i32, %arg1: i32) -> (i32, i32, i32) {
    %c0_i32 = arith.constant 0 : i32
    %c0_i32_0 = arith.constant 0 : i32
    %c0_i32_1 = arith.constant 0 : i32
    return %arg1, %c0_i32, %c0_i32_0 : i32, i32, i32
  }
  func.func @transform_6(%arg0: i32, %arg1: i32) -> (i32, i32, i32) {
    %c0_i32 = arith.constant 0 : i32
    %c0_i32_0 = arith.constant 0 : i32
    %c0_i32_1 = arith.constant 0 : i32
    return %arg1, %c0_i32, %c0_i32_0 : i32, i32, i32
  }
  func.func @transform_7(%arg0: i32, %arg1: i32) -> (i32, i32, i32) {
    %c0_i32 = arith.constant 0 : i32
    %c0_i32_0 = arith.constant 0 : i32
    %c0_i32_1 = arith.constant 0 : i32
    return %arg1, %c0_i32, %c0_i32_0 : i32, i32, i32
  }
  func.func @transform_8(%arg0: i32, %arg1: i32) -> (i32, i32, i32) {
    %c0_i32 = arith.constant 0 : i32
    %c0_i32_0 = arith.constant 0 : i32
    %c0_i32_1 = arith.constant 0 : i32
    return %arg1, %c0_i32, %c0_i32_0 : i32, i32, i32
  }
  func.func @transform_9(%arg0: i32, %arg1: i32) -> (i32, i32, i32) {
    %c0_i32 = arith.constant 0 : i32
    %c0_i32_0 = arith.constant 0 : i32
    %c0_i32_1 = arith.constant 0 : i32
    return %arg1, %c0_i32, %c0_i32_0 : i32, i32, i32
  }
  func.func @transform_10(%arg0: i32, %arg1: i32) -> (i32, i32, i32) {
    %c0_i32 = arith.constant 0 : i32
    %c0_i32_0 = arith.constant 0 : i32
    %c0_i32_1 = arith.constant 0 : i32
    return %arg1, %c0_i32, %c0_i32_0 : i32, i32, i32
  }
  func.func @transform_11(%arg0: i32, %arg1: i32) -> (i32, i32, i32) {
    %c0_i32 = arith.constant 0 : i32
    %c0_i32_0 = arith.constant 0 : i32
    %c0_i32_1 = arith.constant 0 : i32
    return %arg1, %c0_i32, %c0_i32_0 : i32, i32, i32
  }
  func.func @transform_12(%arg0: i32, %arg1: i32) -> (i32, i32, i32) {
    %c0_i32 = arith.constant 0 : i32
    %c0_i32_0 = arith.constant 0 : i32
    %c0_i32_1 = arith.constant 0 : i32
    return %arg1, %c0_i32, %c0_i32_0 : i32, i32, i32
  }
  func.func @transform_13(%arg0: i32, %arg1: i32) -> (i32, i32, i32) {
    %c0_i32 = arith.constant 0 : i32
    %c0_i32_0 = arith.constant 0 : i32
    %c0_i32_1 = arith.constant 0 : i32
    return %arg1, %c0_i32, %c0_i32_0 : i32, i32, i32
  }
  func.func @transform_14(%arg0: i32, %arg1: i32) -> (i32, i32, i32) {
    %c0_i32 = arith.constant 0 : i32
    %c0_i32_0 = arith.constant 0 : i32
    %c0_i32_1 = arith.constant 0 : i32
    return %arg1, %c0_i32, %c0_i32_0 : i32, i32, i32
  }
  func.func @transform_15(%arg0: i32, %arg1: i32) -> (i32, i32, i32) {
    %c0_i32 = arith.constant 0 : i32
    %c0_i32_0 = arith.constant 0 : i32
    %c0_i32_1 = arith.constant 0 : i32
    return %arg1, %c0_i32, %c0_i32_0 : i32, i32, i32
  }
  func.func @transform_16(%arg0: i32, %arg1: i32) -> (i32, i32, i32, i32, i32) {
    %c0_i32 = arith.constant 0 : i32
    %c0_i32_0 = arith.constant 0 : i32
    %c0_i32_1 = arith.constant 0 : i32
    %c0_i32_2 = arith.constant 0 : i32
    return %arg1, %arg0, %c0_i32, %c0_i32_0, %c0_i32_1 : i32, i32, i32, i32, i32
  }
  func.func @transform_17(%arg0: i32, %arg1: i32) -> (i32, i32, i32, i32, i32) {
    %c0_i32 = arith.constant 0 : i32
    %c0_i32_0 = arith.constant 0 : i32
    %c0_i32_1 = arith.constant 0 : i32
    %c0_i32_2 = arith.constant 0 : i32
    return %arg1, %arg0, %c0_i32, %c0_i32_0, %c0_i32_1 : i32, i32, i32, i32, i32
  }
}

</mosaic_0001>

<bundles_post_ra>
// kernel: tpu_custom_call.1
= control target key start
LH: loop header
LB: loop body
LE: loop exit
PB: predicated region body
PF: predicated region fallthrough
CT: control target
= control target key end

     0   :  { %s7165_s0 = inlined_call_operand.vmem [shape: f32[2,8,8,32], index: 0, kind: input, shape index: {}]   ;;  %s7166_s1 = inlined_call_operand.vmem [shape: f32[2,8,8,32], index: 1, kind: input, shape index: {}]   ;;  %s7167_s2 = inlined_call_operand.vmem [shape: bf16[2,384,32], index: 2, kind: input, shape index: {}]   ;;  %s7168_s3 = inlined_call_operand.vmem [shape: f32[2,1,32], index: 3, kind: input, shape index: {}]   ;;  %s7169_s4 = inlined_call_operand.vmem [shape: bf16[2,384,32], index: 4, kind: input, shape index: {}]   ;;  %s7170_s5 = inlined_call_operand.vmem [shape: bf16[2,384,32], index: 5, kind: input, shape index: {}]   ;;  %s7171_s6 = inlined_call_operand.vmem [shape: f32[2,1,32], index: 6, kind: input, shape index: {}]   ;;  %s7172_s7 = inlined_call_operand.vmem [shape: f32[2,1,32], index: 7, kind: input, shape index: {}]   ;;  %s7173_s8 = inlined_call_operand.vmem [shape: bf16[2,256,32], index: 8, kind: input, shape index: {}]   ;;  %s7174_s9 = inlined_call_operand.vmem [shape: f32[2,1,32], index: 9, kind: input, shape index: {}]   ;;  %s7175_s10 = inlined_call_operand.vmem [shape: bf16[2,64,32], index: 10, kind: input, shape index: {}]   ;;  %s7176_s11 = inlined_call_operand.vmem [shape: f32[2,1,32], index: 11, kind: input, shape index: {}]   ;;  %s7177_s12 = inlined_call_operand.vmem [shape: bf16[2,256,32], index: 12, kind: input, shape index: {}]   ;;  %s7178_s13 = inlined_call_operand.vmem [shape: bf16[2,256,32], index: 13, kind: input, shape index: {}]   ;;  %s7179_s14 = inlined_call_operand.vmem [shape: f32[2,1,32], index: 14, kind: input, shape index: {}]   ;;  %s7180_s15 = inlined_call_operand.vmem [shape: f32[2,1,32], index: 15, kind: input, shape index: {}]   ;;  %s7181_s16 = inlined_call_operand.hbm [shape: f32[2,2,8,8,32], index: 16, kind: output, shape index: {0}]   ;;  %s7182_s17 = inlined_call_operand.hbm [shape: f32[2,2,8,8,32], index: 17, kind: output, shape index: {1}]  }
   0x1   :  { %7202 = sst [smem:[#allocation25_spill]] %s7165_s0 }
   0x2   :  { %7203 = sst [smem:[#allocation26_spill]] %s7166_s1 }
   0x3   :  { %7204 = sst [smem:[#allocation27_spill]] %s7167_s2 }
   0x4   :  { %7205 = sst [smem:[#allocation28_spill]] %s7169_s4 }
   0x5   :  { %7206 = sst [smem:[#allocation29_spill]] %s7170_s5 }
   0x6   :  { %7207 = sst [smem:[#allocation30_spill]] %s7172_s7 }
   0x7   :  { %7208 = sst [smem:[#allocation31_spill]] %s7173_s8 }
   0x8   :  { %7209 = sst [smem:[#allocation32_spill]] %s7176_s11 }
   0x9   :  { %7210 = sst [smem:[#allocation33_spill]] %s7179_s14 }
   0xa   :  { %7211 = sst [smem:[#allocation34_spill]] %s7180_s15 }
   0xb   :  { %7212 = sst [smem:[#allocation35_spill]] %s7181_s16 }
   0xc   :  { %7213 = sst [smem:[#allocation36_spill]] %s7182_s17 }
   0xd   :  { %23 = vsyncpa [#allocation5], 0 }
   0xe   :  { %25 = vsyncpa [#allocation5 + $0x1], 0 }
   0xf   :  { %26 = vsyncpa [#allocation7], 0 }
  0x10   :  { %28 = vsyncpa [#allocation7 + $0x1], 0  ;;  %s5565_s24 = smov 0   ;;  %s5567_s25 = smov 0  }
  0x11   :  { %s5569_s26 = smov 0   ;;  %s5571_s27 = smov 0  }
  0x12   :  { %s5573_s28 = smov 0   ;;  %s5575_s29 = smov 0  }
  0x13   :  { %s5577_s0 = smov 0   ;;  %s5579_s30 = smov 0  }
  0x14 LB: > { %7214 = sst [smem:[#allocation10_spill]] %s5438_s24  ;;  %s4217_s18 = sadd.s32 4294967295, %s5466_s30   ;;  %s5466_s30 = sphi %s5579_s30, %s34_s30   ;;  %s5462_s0 = sphi %s5577_s0, %s7268_s0   ;;  %s5458_s29 = sphi %s5575_s29, %s7267_s29   ;;  %s5454_s28 = sphi %s5573_s28, %s7266_s28   ;;  %s5450_s27 = sphi %s5571_s27, %s7265_s27   ;;  %s5446_s26 = sphi %s5569_s26, %s7264_s26   ;;  %s5442_s25 = sphi %s5567_s25, %s7263_s25   ;;  %s5438_s24 = sphi %s5565_s24, %s7262_s24  }
  0x15   : > { %7215 = sst [smem:[#allocation11_spill]] %s5442_s25  ;;  %s4218_s19 = sadd.s32 4294967294, %s5466_s30  }
  0x16   : > { %7216 = sst [smem:[#allocation12_spill]] %s5446_s26  ;;  %s43_s1 = sadd.s32 1, %s5458_s29 }
  0x17   : > { %7217 = sst [smem:[#allocation13_spill]] %s5450_s27  ;;  %p44_p0 = scmp.ge.s32.totalorder %s43_s1, 2 }
  0x18   : > { %7218 = sst [smem:[#allocation14_spill]] %s5454_s28  ;;  %s46_s20 = sadd.s32 1, %s5462_s0 }
  0x19   : > { %7219 = sst [smem:[#allocation15_spill]] %s5458_s29  ;;  %p481_p1 = scmp.ne.s32.totalorder %s5446_s26, %s5442_s25 }
  0x1a   : > { %7220 = sst [smem:[#allocation16_spill]] %s5462_s0  ;;  %p482_p2 = scmp.eq.s32.totalorder %s4217_s18, 3 }
  0x1b   : > { %7221 = sst [smem:[#allocation17_spill]] %s5466_s30  ;;  %s7270_s1 = smov (%p44_p0, %s43_s1), 0 }
  0x1c   : > { %7222 = sst [smem:[#allocation18_spill]] %s7270_s1  ;;  %s7272_s20 = smov (!%p44_p0, %s46_s20), %s5462_s0 }
  0x1d   : > { %s466_s21 = ssub.s32 %s5458_s29, %s7270_s1  ;;  %p5616_p3 = por %p482_p2, %p481_p1 }
  0x1e   : > { %p48_p4 = scmp.ge.s32.totalorder %s7272_s20, 2  ;;  %p487_p5 = scmp.ne.s32.totalorder %s5442_s25, %s5438_s24 }
  0x1f   : > { %s7223_s22 = scalar_select %p5616_p3, 1, 0 }
  0x20   : > { %p488_p6 = scmp.eq.s32.totalorder %s4218_s19, 3  ;;  %p4221_p7 = scmp.ge.s32.totalorder %s5466_s30, 1 }
  0x21   : > { %7224 = sst [smem:[#allocation19_spill]] %s7223_s22  ;;  %s7274_s20 = smov (%p48_p4, %s7272_s20), 0 }
  0x22   : > { %7225 = sst [smem:[#allocation20_spill]] %s7274_s20  ;;  %p5625_p8 = por %p488_p6, %p487_p5 }
  0x23   : > { %p648_p9 = scmp.lt.s32.totalorder %s5466_s30, 5  ;;  %s467_s18 = ssub.s32 %s5462_s0, %s7274_s20 }
  0x24   : > { %s7226_s23 = scalar_select %p5625_p8, 1, 0 }
  0x25   : > { %s471_s17 = sadd.s32 1, %s5446_s26  ;;  %s468_s16 = sor.u32 %s467_s18, %s466_s21 }
  0x26   : > { %7227 = sst [smem:[#allocation21_spill]] %s7226_s23  ;;  %p649_p10 = pnand %p4221_p7, %p648_p9 }
  0x27   : > { %p469_p11 = scmp.eq.s32.totalorder %s468_s16, 0 }
  0x28   : > { %652 = sbr.rel (%p649_p10) target bundleno = 2063 (0x80f), region = 84 }
  0x29   : > { %s5634_s1 = scalar_select %p469_p11, %s5446_s26, %s471_s17  }
  0x2b   : > { %7228 = sst [smem:[#allocation22_spill]] %s5634_s1 }
  0x2f   : > { %s5637_s19 = sand.u32 1, %s5442_s25   ;;  %p766_p12 = scmp.lt.s32.totalorder %s5454_s28, 1 }
  0x30   : > { %7229 = sst [smem:[#allocation23_spill]] %s5637_s19  ;;  %s4222_s29 = sshll.u32 %s5637_s19, 6 }
  0x31   : > { %p776_p13 = scmp.lt.s32.totalorder %s5450_s27, 1  ;;  %s7230_s18 = sld [smem:[#allocation25_spill]] }
  0x32   : > { %s767_s23 = scalar_select %p766_p12, %s5454_s28, 1 }
  0x33   : > { %s5644_s20 = scalar_select %p776_p13, %s5450_s27, 1 }
  0x34   : > { %s4425_s16 = sshll.u32 %s767_s23, 6  ;;  %s7232_s25 = sld [smem:[#allocation26_spill]] }
  0x35   : > { %s4819_s30 = smul.u32 192, %s5644_s20  ;;  %s7234_s2 = sld [smem:[#allocation27_spill]] }
  0x36   : > { %s7235_s4 = sld [smem:[#allocation28_spill]]  ;;  %s7236_s5 = sld [smem:[#allocation29_spill]] }
  0x37   : > { %s5649_s0 = scalar_lea.vmem %s7230_s18, %s4425_s16  ;;  %s4427_s15 = sshll.u32 %s5644_s20, 7 }
  0x38   : > { %7231 = sst [smem:[#allocation24_spill]] %s5649_s0  ;;  %s7237_s8 = sld [smem:[#allocation31_spill]] }
  0x39   : > { %s4428_s21 = sshll.u32 %s5644_s20, 5  ;;  %s5707_s23 = scalar_lea.vmem %s7177_s12, %s4427_s15 }
  0x3a   : > { %s5654_s24 = scalar_lea.vmem %s7232_s25, %s4425_s16  ;;  %s5712_s17 = scalar_lea.vmem %s7178_s13, %s4427_s15 }
  0x3b   : > { %s5672_s25 = scalar_lea.vmem %s7234_s2, %s4819_s30  ;;  %s7240_s11 = sld [smem:[#allocation34_spill]] }
  0x3c   : > { %s5677_s16 = scalar_lea.vmem %s7235_s4, %s4819_s30  ;;  %s5682_s28 = scalar_lea.vmem %s7236_s5, %s4819_s30 }
  0x3d   : > { %s5702_s30 = scalar_lea.vmem %s7175_s10, %s4428_s21  ;;  %s5722_s7 = scalar_lea.vmem [#allocation4], %s4222_s29 }
  0x3e   : > { %s5688_s14 = scalar_lea.vmem %s7237_s8, %s4427_s15  ;;  %s7239_s8 = sld [smem:[#allocation33_spill]] }
  0x3f   : > { %s5724_s21 = scalar_lea.vmem [#allocation6], %s4222_s29  ;;  %s7241_s22 = sld [smem:[#allocation13_spill]] }
  0x41   : > { %s831_s4 = scalar_lea.vmem %s7240_s11, %s5644_s20 }
  0x44   : > { %s828_s2 = scalar_lea.vmem %s7239_s8, %s5644_s20 }
  0x45   : > { %p4239_p0 = scmp.ne.s32.totalorder %s7241_s22, 0 }
  0x46   : > { %s7242_s19 = sld [smem:[#allocation24_spill]] (!%p4239_p0)  ;;  %vm845_vm0 = vcmask (!%p4239_p0), 261120   ;;  %v854_v8 = vld [vmem:[%s5654_s24] sm:$0xff] (!%p4239_p0)  ;;  %v855_v9 = vld [vmem:[%s5654_s24 + $0x8] sm:$0xff] (!%p4239_p0)  ;;  %v856_v10 = vld [vmem:[%s5654_s24 + $0x10] sm:$0xff] (!%p4239_p0) }
  0x47   : > { %836 = sbr.rel (%p4239_p0) target bundleno = 81 (0x51), region = 88  ;;  %862 = vst.msk [vmem:[#allocation3] sm:$0xff] (!%p4239_p0), %vm845_vm0, %v854_v8  ;;  %v857_v11 = vld [vmem:[%s5654_s24 + $0x18] sm:$0xff] (!%p4239_p0)  ;;  %863 = vst.msk [vmem:[#allocation3 + $0x8] sm:$0xff] (!%p4239_p0), %vm845_vm0, %v855_v9  ;;  %v858_v12 = vld [vmem:[%s5654_s24 + $0x20] sm:$0xff] (!%p4239_p0) }
  0x48   : > { %864 = vst.msk [vmem:[#allocation3 + $0x10] sm:$0xff] (!%p4239_p0), %vm845_vm0, %v856_v10  ;;  %865 = vst.msk [vmem:[#allocation3 + $0x18] sm:$0xff] (!%p4239_p0), %vm845_vm0, %v857_v11  ;;  %v859_v13 = vld [vmem:[%s5654_s24 + $0x28] sm:$0xff] (!%p4239_p0)  ;;  %v860_v14 = vld [vmem:[%s5654_s24 + $0x30] sm:$0xff] (!%p4239_p0) }
  0x49   : > { %866 = vst.msk [vmem:[#allocation3 + $0x20] sm:$0xff] (!%p4239_p0), %vm845_vm0, %v858_v12  ;;  %867 = vst.msk [vmem:[#allocation3 + $0x28] sm:$0xff] (!%p4239_p0), %vm845_vm0, %v859_v13  ;;  %v861_v15 = vld [vmem:[%s5654_s24 + $0x38] sm:$0xff] (!%p4239_p0) }
  0x4a   : > { %868 = vst.msk [vmem:[#allocation3 + $0x30] sm:$0xff] (!%p4239_p0), %vm845_vm0, %v860_v14  ;;  %869 = vst.msk [vmem:[#allocation3 + $0x38] sm:$0xff] (!%p4239_p0), %vm845_vm0, %v861_v15 }
  0x4c   : > { %v837_v0 = vld [vmem:[%s7242_s19] sm:$0xff] (!%p4239_p0)  ;;  %v838_v1 = vld [vmem:[%s7242_s19 + $0x8] sm:$0xff] (!%p4239_p0)  ;;  %v839_v2 = vld [vmem:[%s7242_s19 + $0x10] sm:$0xff] (!%p4239_p0) }
  0x4d   : > { %846 = vst.msk [vmem:[#allocation2] sm:$0xff] (!%p4239_p0), %vm845_vm0, %v837_v0  ;;  %847 = vst.msk [vmem:[#allocation2 + $0x8] sm:$0xff] (!%p4239_p0), %vm845_vm0, %v838_v1  ;;  %v840_v3 = vld [vmem:[%s7242_s19 + $0x18] sm:$0xff] (!%p4239_p0)  ;;  %v841_v4 = vld [vmem:[%s7242_s19 + $0x20] sm:$0xff] (!%p4239_p0) }
  0x4e   : > { %848 = vst.msk [vmem:[#allocation2 + $0x10] sm:$0xff] %vm845_vm0, %v839_v2  ;;  %v842_v5 = vld [vmem:[%s7242_s19 + $0x28] sm:$0xff]  ;;  %849 = vst.msk [vmem:[#allocation2 + $0x18] sm:$0xff] %vm845_vm0, %v840_v3  ;;  %v843_v6 = vld [vmem:[%s7242_s19 + $0x30] sm:$0xff] }
  0x4f   : > { %850 = vst.msk [vmem:[#allocation2 + $0x20] sm:$0xff] %vm845_vm0, %v841_v4  ;;  %851 = vst.msk [vmem:[#allocation2 + $0x28] sm:$0xff] %vm845_vm0, %v842_v5  ;;  %v844_v7 = vld [vmem:[%s7242_s19 + $0x38] sm:$0xff] }
  0x50   : > { %852 = vst.msk [vmem:[#allocation2 + $0x30] sm:$0xff] %vm845_vm0, %v843_v6  ;;  %853 = vst.msk [vmem:[#allocation2 + $0x38] sm:$0xff] %vm845_vm0, %v844_v7 }
  0x51 PF: > { %s5468_s5 = smov 32   ;;  %v5056_v32 = vld [vmem:[%s5672_s25 + $0x40] sm:$0xff]   ;;  %v5058_v34 = vld [vmem:[%s5672_s25 + $0x48] sm:$0xff]   ;;  %v5061_v38 = vld [vmem:[%s5672_s25 + $0x50] sm:$0xff]   ;;  %vm918_vm1 = vcmask 261120   ;;  %vm1002_vm2 = vcmask 1040384   ;;  %s7243_s29 = scalar_lea.vmem %s7168_s3, %s5644_s20 }
  0x52   : > { %v5057_v33 = vld [vmem:[%s5672_s25] sm:$0xff]   ;;  %4431 = vmatprep.subr.bf16.mxu0 %v5056_v32  ;;  %v5062_v36 = vld [vmem:[%s5672_s25 + $0x88] sm:$0xff]   ;;  %v5063_v39 = vld [vmem:[%s5672_s25 + $0x10] sm:$0xff]   ;;  %vm1037_vm6 = vcmask 1046528   ;;  %vm1062_vm9 = vcmask 1045504   ;;  %s5470_s8 = smov 64   ;;  %s7247_s0 = scalar_lea.vmem %s7174_s9, %s5644_s20 }
  0x53   : > { %v5059_v35 = vld [vmem:[%s5672_s25 + $0x80] sm:$0xff]   ;;  %4432 = vmatpush3.bf16.msra.mxu0 %v5057_v33  ;;  %v5060_v37 = vld [vmem:[%s5672_s25 + $0x8] sm:$0xff]   ;;  %v5065_v40 = vld [vmem:[%s5672_s25 + $0x90] sm:$0xff]   ;;  %vm1183_vm13 = vcmask 523264   ;;  %s7245_s1 = sld [smem:[#allocation30_spill]]  ;;  %s7248_s19 = sld [smem:[#allocation32_spill]] }
  0x54   : > { %4715 = vmatprep.subr.bf16.mxu1 %v5059_v35  ;;  %4433 = vmatprep.subr.bf16.mxu0 %v5058_v34  ;;  %v5064_v41 = vld [vmem:[%s5672_s25 + $0x58] sm:$0xff]   ;;  %v5067_v44 = vld [vmem:[%s5672_s25 + $0x60] sm:$0xff]   ;;  %v5070_v47 = vld [vmem:[%s5672_s25 + $0x68] sm:$0xff]  }
  0x55   : > { %4716 = vmatpush3.bf16.msra.mxu1 %v5059_v35  ;;  %v5068_v42 = vld [vmem:[%s5672_s25 + $0x98] sm:$0xff]   ;;  %v5071_v45 = vld [vmem:[%s5672_s25 + $0xa0] sm:$0xff]   ;;  %v5074_v48 = vld [vmem:[%s5672_s25 + $0xa8] sm:$0xff]  }
  0x56   : > { %v5769_v22 = vld [vmem:[#allocation2 + $0x28] sm:$0xff]  ;;  %v5772_v24 = vld [vmem:[#allocation2 + $0x20] sm:$0xff]  ;;  %4717 = vmatprep.subr.bf16.mxu1 %v5062_v36  ;;  %v5066_v43 = vld [vmem:[%s5672_s25 + $0x18] sm:$0xff]  }
  0x57   : > { %v5761_v17 = vld [vmem:[#allocation2] sm:$0xff]  ;;  %v5767_v21 = vld [vmem:[#allocation2 + $0x8] sm:$0xff]  ;;  %v883_v26 = vsub.f32 0.0, %v5769_v22  ;;  %v5778_v27 = vld [vmem:[#allocation2 + $0x38] sm:$0xff]  ;;  %v882_v28 = vsub.f32 0.0, %v5772_v24  ;;  %4434 = vmatpush3.bf16.msra.mxu0 %v5060_v37 }
  0x58   : > { %v5759_v16 = vld [vmem:[#allocation2 + $0x10] sm:$0xff]  ;;  %v5763_v18 = vld [vmem:[#allocation2 + $0x18] sm:$0xff]  ;;  %v878_v20 = vsub.f32 0.0, %v5761_v17  ;;  %v879_v25 = vsub.f32 0.0, %v5767_v21  ;;  %v885_v30 = vsub.f32 0.0, %v5778_v27  ;;  %4435 = vmatprep.subr.bf16.mxu0 %v5061_v38  ;;  %v5069_v46 = vld [vmem:[%s5672_s25 + $0x20] sm:$0xff]  }
  0x59   : > { %v880_v19 = vsub.f32 0.0, %v5759_v16  ;;  %v881_v23 = vsub.f32 0.0, %v5763_v18  ;;  %v5783_v29 = vld [vmem:[#allocation2 + $0x30] sm:$0xff]  ;;  %4718 = vmatpush3.bf16.msra.mxu1 %v5062_v36  ;;  %v5072_v49 = vld [vmem:[%s5672_s25 + $0x28] sm:$0xff]   ;;  %v5076_v32 = vld [vmem:[%s5672_s25 + $0x78] sm:$0xff]   ;;  %s7246_s27 = scalar_lea.vmem %s7245_s1, %s5644_s20  ;;  %s7249_s11 = scalar_lea.vmem %s7248_s19, %s5644_s20 }
  0x5a   : > { %894 = vrot.lane.b32.xlu0 %v878_v20, %s5468_s5  ;;  %v884_v31 = vsub.f32 0.0, %v5783_v29  ;;  %4719 = vmatprep.subr.bf16.mxu1 %v5065_v40  ;;  %v5073_v50 = vld [vmem:[%s5672_s25 + $0x70] sm:$0xff]   ;;  %s7254_s1 = sld [smem:[#allocation35_spill]] }
  0x5b   : > { %898 = vrot.lane.b32.xlu1 %v880_v19, %s5468_s5  ;;  %4436 = vmatpush3.bf16.msra.mxu0 %v5063_v39  ;;  %v5077_v33 = vld [vmem:[%s5672_s25 + $0xb0] sm:$0xff]  }
  0x5c   : > { %4437 = vmatprep.subr.bf16.mxu0 %v5064_v41 }
  0x5d   : > { %4720 = vmatpush3.bf16.msra.mxu1 %v5065_v40 }
  0x5e   : > { %896 = vrot.lane.b32.xlu0 %v879_v25, %s5468_s5  ;;  %4721 = vmatprep.subr.bf16.mxu1 %v5068_v42 }
  0x5f   : > { %900 = vrot.lane.b32.xlu1 %v881_v23, %s5468_s5  ;;  %4438 = vmatpush3.bf16.msra.mxu0 %v5066_v43 }
  0x60   : > { %4439 = vmatprep.subr.bf16.mxu0 %v5067_v44 }
  0x61   : > { %4722 = vmatpush3.bf16.msra.mxu1 %v5068_v42 }
  0x62   : > { %902 = vrot.lane.b32.xlu0 %v882_v28, %s5468_s5  ;;  %4723 = vmatprep.subr.bf16.mxu1 %v5071_v45  ;;  %v5075_v28 = vld [vmem:[%s5672_s25 + $0x30] sm:$0xff]  }
  0x63   : > { %904 = vrot.lane.b32.xlu1 %v883_v26, %s5468_s5  ;;  %4440 = vmatpush3.bf16.msra.mxu0 %v5069_v46 }
  0x64   : > { %4441 = vmatprep.subr.bf16.mxu0 %v5070_v47 }
  0x65   : > { %4724 = vmatpush3.bf16.msra.mxu1 %v5071_v45 }
  0x66   : > { %906 = vrot.lane.b32.xlu0 %v884_v31, %s5468_s5  ;;  %4725 = vmatprep.subr.bf16.mxu1 %v5074_v48 }
  0x67   : > { %908 = vrot.lane.b32.xlu1 %v885_v30, %s5468_s5  ;;  %4442 = vmatpush3.bf16.msra.mxu0 %v5072_v49 }
  0x68   : > { %4443 = vmatprep.subr.bf16.mxu0 %v5073_v50 }
  0x69   : > { %4726 = vmatpush3.bf16.msra.mxu1 %v5074_v48  ;;  %v5078_v48 = vld [vmem:[%s5672_s25 + $0x38] sm:$0xff]  }
  0x6a   : > { %4727 = vmatprep.subr.bf16.mxu1 %v5077_v33 }
  0x6b   : > { %4444 = vmatpush3.bf16.msra.mxu0 %v5075_v28 }
  0x6c   : > { %4445 = vmatprep.subr.bf16.mxu0 %v5076_v32 }
  0x6d   : > { %4728 = vmatpush3.bf16.msra.mxu1 %v5077_v33 }
  0x6f   : > { %4446 = vmatpush3.bf16.msra.mxu0 %v5078_v48 }
  0xcc   : > { %v895_v52 = vpop.permute.xlu0 %894 }
  0xcd   : > { %v899_v51 = vpop.permute.xlu1 %898  ;;  %v919_v54 = vsel %vm918_vm1, %v5761_v17, %v895_v52 }
  0xce   : > { %v921_v53 = vsel %vm918_vm1, %v5759_v16, %v899_v51  ;;  %v935_v56 = vmin.f32 %v919_v54, 0.0  ;;  %v5469_v16 = vmov 0.0   ;;  %vm927_vm4 = vcmp.gt.f32.partialorder %v919_v54, 0.0 }
  0xcf   : > { %v937_v55 = vmin.f32 %v921_v53, 0.0  ;;  %v5843_v17 = vrot.slane %v5469_v16, 7  ;;  %vm929_vm3 = vcmp.gt.f32.partialorder %v921_v53, 0.0 }
  0xd0   : > { %v943_v58 = vmul.f32 1.442695, %v935_v56  ;;  %v897_v60 = vpop.permute.xlu0 %896 }
  0xd1   : > { %v947_v57 = vmul.f32 1.442695, %v937_v55  ;;  %v901_v59 = vpop.permute.xlu1 %900  ;;  %v5820_v62 = vsel %vm918_vm1, %v5767_v21, %v897_v60  ;;  %v5848_v25 = vsel %vm1002_vm2, 0.0, %v5843_v17 }
  0xd2   : > { %v5816_v61 = vsel %vm918_vm1, %v5763_v18, %v901_v59  ;;  %v936_v0 = vmin.f32 %v5820_v62, 0.0  ;;  %v1038_v37 = vrot.slane %v5848_v25, 1  ;;  %vm928_vm7 = vcmp.gt.f32.partialorder %v5820_v62, 0.0 }
  0xd3   : > { %5180 = vpow2.f32 %v947_v57  ;;  %v938_v63 = vmin.f32 %v5816_v61, 0.0  ;;  %vm930_vm5 = vcmp.gt.f32.partialorder %v5816_v61, 0.0 }
  0xd4   : > { %5182 = vpow2.f32 %v943_v58  ;;  %v903_v3 = vpop.permute.xlu0 %902  ;;  %v945_v4 = vmul.f32 1.442695, %v936_v0 }
  0xd5   : > { %v949_v1 = vmul.f32 1.442695, %v938_v63  ;;  %v905_v2 = vpop.permute.xlu1 %904  ;;  %v5830_v6 = vsel %vm918_vm1, %v5772_v24, %v903_v3  ;;  %v5079_v63 = vld [vmem:[%s5672_s25 + $0xb8] sm:$0xff]  }
  0xd6   : > { %v5826_v5 = vsel %vm918_vm1, %v5769_v22, %v905_v2  ;;  %v939_v8 = vmin.f32 %v5830_v6, 0.0  ;;  %vm931_vm10 = vcmp.gt.f32.partialorder %v5830_v6, 0.0  ;;  %4729 = vmatprep.subr.bf16.mxu1 %v5079_v63 }
  0xd7   : > { %5184 = vpow2.f32 %v949_v1  ;;  %v940_v7 = vmin.f32 %v5826_v5, 0.0  ;;  %vm932_vm8 = vcmp.gt.f32.partialorder %v5826_v5, 0.0  ;;  %4730 = vmatpush3.bf16.msra.mxu1 %v5079_v63 }
  0xd8   : > { %5186 = vpow2.f32 %v945_v4  ;;  %v907_v11 = vpop.permute.xlu0 %906  ;;  %v951_v12 = vmul.f32 1.442695, %v939_v8 }
  0xd9   : > { %v953_v9 = vmul.f32 1.442695, %v940_v7  ;;  %v909_v10 = vpop.permute.xlu1 %908  ;;  %v5840_v14 = vsel %vm918_vm1, %v5783_v29, %v907_v11 }
  0xda   : > { %v5836_v13 = vsel %vm918_vm1, %v5778_v27, %v909_v10  ;;  %v941_v18 = vmin.f32 %v5840_v14, 0.0  ;;  %v5852_v27 = vsel %vm1002_vm2, %v5843_v17, 0.0  ;;  %vm933_vm12 = vcmp.gt.f32.partialorder %v5840_v14, 0.0 }
  0xdb   : > { %5188 = vpow2.f32 %v953_v9  ;;  %v942_v15 = vmin.f32 %v5836_v13, 0.0  ;;  %v1039_v39 = vrot.slane %v5852_v27, 1  ;;  %vm934_vm11 = vcmp.gt.f32.partialorder %v5836_v13, 0.0 }
  0xdc   : > { %5190 = vpow2.f32 %v951_v12  ;;  %v955_v23 = vmul.f32 1.442695, %v941_v18 }
  0xdd   : > { %v5181_v19 = vpop.eup %5180  ;;  %v957_v20 = vmul.f32 1.442695, %v942_v15  ;;  %v1040_v55 = vsel %vm1037_vm6, %v1038_v37, %v1039_v39 }
  0xde   : > { %v5183_v21 = vpop.eup %5182  ;;  %v4242_v22 = vadd.f32 -1.0, %v5181_v19 }
  0xdf   : > { %v4240_v24 = vadd.f32 -1.0, %v5183_v21  ;;  %5192 = vpow2.f32 %v957_v20 }
  0xe0   : > { %v969_v26 = vsel %vm929_vm3, %v921_v53, %v4242_v22  ;;  %5194 = vpow2.f32 %v955_v23 }
  0xe1   : > { %v5185_v29 = vpop.eup %5184  ;;  %v987_v30 = vrot.slane %v969_v26, 7  ;;  %v967_v31 = vsel %vm927_vm4, %v919_v54, %v4240_v24 }
  0xe2   : > { %v5187_v34 = vpop.eup %5186  ;;  %v985_v35 = vrot.slane %v967_v31, 7  ;;  %v4243_v36 = vadd.f32 -1.0, %v5185_v29 }
  0xe3   : > { %v4241_v38 = vadd.f32 -1.0, %v5187_v34  ;;  %v5861_v40 = vsel %vm1002_vm2, 0.0, %v987_v30  ;;  %v5871_v44 = vsel %vm1002_vm2, %v987_v30, 0.0 }
  0xe4   : > { %v5864_v41 = vsel %vm1002_vm2, 0.0, %v985_v35  ;;  %v5867_v42 = vsel %vm1002_vm2, %v985_v35, 0.0  ;;  %v970_v46 = vsel %vm930_vm5, %v5816_v61, %v4243_v36  ;;  %v1073_v56 = vrot.slane %v5871_v44, 2 }
  0xe5   : > { %v5189_v43 = vpop.eup %5188  ;;  %v1042_v45 = vrot.slane %v5867_v42, 1  ;;  %v968_v47 = vsel %vm928_vm7, %v5820_v62, %v4241_v38  ;;  %v988_v50 = vrot.slane %v970_v46, 7  ;;  %v1041_v53 = vrot.slane %v5864_v41, 1 }
  0xe6   : > { %v5191_v49 = vpop.eup %5190  ;;  %v986_v51 = vrot.slane %v968_v47, 7  ;;  %v4245_v52 = vadd.f32 -1.0, %v5189_v43  ;;  %v1072_v62 = vrot.slane %v5861_v40, 2  ;;  %v1048_v12 = vrot.slane %v5871_v44, 1 }
  0xe7   : > { %v4244_v54 = vadd.f32 -1.0, %v5191_v49  ;;  %v5884_v57 = vsel %vm1002_vm2, %v988_v50, 0.0  ;;  %v5889_v59 = vsel %vm1002_vm2, 0.0, %v988_v50  ;;  %v5902_v4 = vsel %vm1037_vm6, %v1041_v53, %v1042_v45 }
  0xe8   : > { %v5892_v60 = vsel %vm1002_vm2, 0.0, %v986_v51  ;;  %v1014_v61 = vsel %vm1002_vm2, %v986_v51, 0.0  ;;  %v972_v1 = vsel %vm932_vm8, %v5826_v5, %v4245_v52  ;;  %v1076_v7 = vrot.slane %v5884_v57, 2 }
  0xe9   : > { %v5193_v58 = vpop.eup %5192  ;;  %v971_v2 = vsel %vm931_vm10, %v5830_v6, %v4244_v54  ;;  %v4906_v10 = vpack.i.bf16 %v5902_v4, %v1040_v55  ;;  %v4901_v5 = vpack.i.bf16 %v5892_v60, %v5864_v41  ;;  %v1075_v6 = vrot.slane %v5889_v59, 2 }
  0xea   : > { %v5195_v0 = vpop.eup %5194  ;;  %v4247_v3 = vadd.f32 -1.0, %v5193_v58  ;;  %v989_v8 = vrot.slane %v971_v2, 7  ;;  %v1067_v15 = vrot.slane %v5867_v42, 2  ;;  %v990_v16 = vrot.slane %v972_v1, 7 }
  0xeb   : > { %v4246_v9 = vadd.f32 -1.0, %v5195_v0  ;;  %4907 = vrot.lane.b32.xlu1 %v4906_v10, %s5470_s8  ;;  %v1066_v18 = vrot.slane %v5864_v41, 2  ;;  %v1045_v19 = vrot.slane %v1014_v61, 1  ;;  %4902 = vrot.lane.b32.xlu0 %v4901_v5, %s5470_s8  ;;  %v5919_v20 = vsel %vm1062_vm9, %v1072_v62, %v1073_v56 }
  0xec   : > { %v974_v11 = vsel %vm934_vm11, %v5836_v13, %v4247_v3  ;;  %v1070_v13 = vrot.slane %v1014_v61, 2  ;;  %v1047_v21 = vrot.slane %v5861_v40, 1  ;;  %v1017_v22 = vsel %vm1002_vm2, %v989_v8, 0.0 }
  0xed   : > { %v992_v23 = vrot.slane %v974_v11, 7  ;;  %v973_v24 = vsel %vm933_vm12, %v5840_v14, %v4246_v9  ;;  %v5927_v26 = vsel %vm1062_vm9, %v1075_v6, %v1076_v7  ;;  %v1069_v30 = vrot.slane %v5892_v60, 2 }
  0xee   : > { %v991_v28 = vrot.slane %v973_v24, 7  ;;  %v4921_v29 = vpack.i.bf16 %v5927_v26, %v5919_v20  ;;  %v1044_v31 = vrot.slane %v5892_v60, 1  ;;  %v1051_v32 = vrot.slane %v5884_v57, 1 }
  0xef   : > { %v1018_v33 = vsel %vm1002_vm2, %v990_v16, 0.0  ;;  %v1011_v34 = vsel %vm1002_vm2, 0.0, %v992_v23  ;;  %v1020_v35 = vsel %vm1002_vm2, %v992_v23, 0.0  ;;  %v5938_v14 = vsel %vm1002_vm2, 0.0, %v989_v8 }
  0xf0   : > { %v1054_v36 = vrot.slane %v1017_v22, 1  ;;  %4922 = vrot.lane.b32.xlu1 %v4921_v29, %s5470_s8  ;;  %v5942_v38 = vsel %vm1062_vm9, %v1066_v18, %v1067_v15  ;;  %v5945_v39 = vsel %vm1037_vm6, %v1047_v21, %v1048_v12  ;;  %v5948_v42 = vsel %vm1002_vm2, 0.0, %v991_v28 }
  0xf1   : > { %v1019_v43 = vsel %vm1002_vm2, %v991_v28, 0.0  ;;  %v5952_v44 = vsel %vm1062_vm9, %v1069_v30, %v1070_v13  ;;  %v5955_v45 = vsel %vm1037_vm6, %v1044_v31, %v1045_v19  ;;  %v1108_v46 = vrot.slane %v1011_v34, 2 }
  0xf2   : > { %v1109_v47 = vrot.slane %v1020_v35, 2  ;;  %v4911_v48 = vpack.i.bf16 %v5952_v44, %v5942_v38  ;;  %v4926_v49 = vpack.i.bf16 %v5945_v39, %v5955_v45  ;;  %v1085_v50 = vrot.slane %v1019_v43, 2 }
  0xf3   : > { %v1050_v51 = vrot.slane %v5889_v59, 1  ;;  %v1053_v52 = vrot.slane %v5938_v14, 1  ;;  %v1084_v53 = vrot.slane %v5948_v42, 2  ;;  %v5965_v54 = vsel %vm1002_vm2, 0.0, %v990_v16 }
  0xf4   : > { %v1082_v55 = vrot.slane %v1018_v33, 2  ;;  %v1079_v56 = vrot.slane %v1017_v22, 2  ;;  %4912 = vrot.lane.b32.xlu0 %v4911_v48, %s5470_s8  ;;  %4927 = vrot.lane.b32.xlu1 %v4926_v49, %s5470_s8  ;;  %v1097_v57 = vrot.slane %v1011_v34, 1  ;;  %v1098_v58 = vrot.slane %v1020_v35, 1 }
  0xf5   : > { %v1052_v61 = vsel %vm1037_vm6, %v1050_v51, %v1051_v32  ;;  %v5971_v62 = vsel %vm1037_vm6, %v1053_v52, %v1054_v36  ;;  %v1060_v63 = vrot.slane %v1019_v43, 1  ;;  %v4916_v0 = vpack.i.bf16 %v5889_v59, %v5861_v40 }
  0xf6   : > { %v4936_v1 = vpack.i.bf16 %v5971_v62, %v1052_v61  ;;  %v1110_v2 = vsel %vm1062_vm9, %v1108_v46, %v1109_v47  ;;  %v5978_v3 = vsel %vm1062_vm9, %v1084_v53, %v1085_v50  ;;  %v1078_v7 = vrot.slane %v5938_v14, 2 }
  0xf7   : > { %v1081_v8 = vrot.slane %v5965_v54, 2  ;;  %v1059_v9 = vrot.slane %v5948_v42, 1  ;;  %v1057_v10 = vrot.slane %v1018_v33, 1  ;;  %v1056_v11 = vrot.slane %v5965_v54, 1 }
  0xf8   : > { %4917 = vrot.lane.b32.xlu0 %v4916_v0, %s5470_s8  ;;  %4937 = vrot.lane.b32.xlu1 %v4936_v1, %s5470_s8  ;;  %v5987_v5 = vsel %vm1037_vm6, %v1097_v57, %v1098_v58  ;;  %v4931_v6 = vpack.i.bf16 %v5965_v54, %v5938_v14  ;;  %v4951_v12 = vpack.i.bf16 %v1110_v2, %v5978_v3  ;;  %v1063_v23 = vrot.slane %v5848_v25, 2 }
  0xf9   : > { %v5993_v15 = vsel %vm1062_vm9, %v1078_v7, %v1079_v56  ;;  %v5996_v16 = vsel %vm1062_vm9, %v1081_v8, %v1082_v55  ;;  %v5999_v18 = vsel %vm1037_vm6, %v1059_v9, %v1060_v63  ;;  %v6004_v19 = vsel %vm1037_vm6, %v1056_v11, %v1057_v10 }
  0xfa   : > { %v4941_v13 = vpack.i.bf16 %v5996_v16, %v5993_v15  ;;  %v4956_v21 = vpack.i.bf16 %v5999_v18, %v6004_v19  ;;  %v4946_v22 = vpack.i.bf16 %v1011_v34, %v5948_v42  ;;  %v1064_v24 = vrot.slane %v5852_v27, 2 }
  0xfc   : > { %4932 = vrot.lane.b32.xlu0 %v4931_v6, %s5470_s8  ;;  %4952 = vrot.lane.b32.xlu1 %v4951_v12, %s5470_s8  ;;  %v6017_v32 = vsel %vm1062_vm9, %v1063_v23, %v1064_v24 }
 0x100   : > { %4942 = vrot.lane.b32.xlu0 %v4941_v13, %s5470_s8  ;;  %4957 = vrot.lane.b32.xlu1 %v4956_v21, %s5470_s8 }
 0x104   : > { %4947 = vrot.lane.b32.xlu0 %v4946_v22, %s5470_s8 }
 0x15d   : > { %v4908_v28 = vpop.permute.xlu1 %4907  ;;  %v4903_v31 = vpop.permute.xlu0 %4902 }
 0x15e   : > { %v4910_v29 = vunpack.i.h.bf16 %v4908_v28  ;;  %v4909_v30 = vunpack.i.l.bf16 %v4908_v28  ;;  %v4905_v33 = vunpack.i.h.bf16 %v4903_v31  ;;  %v4904_v35 = vunpack.i.l.bf16 %v4903_v31 }
 0x160   : > { %v6021_v36 = vsel %vm1183_vm13, %v5848_v25, %v4909_v30  ;;  %v1185_v34 = vsel %vm1183_vm13, %v5864_v41, %v4910_v29  ;;  %v1192_v27 = vsel %vm1183_vm13, %v6017_v32, %v4904_v35  ;;  %v1193_v43 = vsel %vm1183_vm13, %v5942_v38, %v4905_v33 }
 0x161   : > { %v1209_v47 = vpack.c.bf16 %v1193_v43, %v1192_v27  ;;  %v1208_v48 = vpack.c.bf16 %v1185_v34, %v6021_v36 }
 0x162   : > { %v4923_v46 = vpop.permute.xlu1 %4922 }
 0x163   : > { %v4925_v49 = vunpack.i.h.bf16 %v4923_v46  ;;  %v4924_v50 = vunpack.i.l.bf16 %v4923_v46  ;;  %1451 = vmatprep.mubr.bf16.mxu0 %v1209_v47 }
 0x164   : > { %1452 = vmatmul.mubr.bf16.vlgmr.msra.gmra.mrb[0].mxu0 %v1208_v48 }
 0x165   : > { %v1202_v57 = vsel %vm1183_vm13, %v5945_v39, %v4924_v50  ;;  %v1203_v58 = vsel %vm1183_vm13, %v1052_v61, %v4925_v49 }
 0x166   : > { %v4913_v51 = vpop.permute.xlu0 %4912  ;;  %v4928_v52 = vpop.permute.xlu1 %4927  ;;  %v1213_v9 = vpack.c.bf16 %v1203_v58, %v1202_v57 }
 0x167   : > { %v4915_v53 = vunpack.i.h.bf16 %v4913_v51  ;;  %v4914_v55 = vunpack.i.l.bf16 %v4913_v51  ;;  %v4930_v56 = vunpack.i.h.bf16 %v4928_v52  ;;  %v4929_v41 = vunpack.i.l.bf16 %v4928_v52 }
 0x169   : > { %v1200_v38 = vsel %vm1183_vm13, %v5902_v4, %v4914_v55  ;;  %v1201_v63 = vsel %vm1183_vm13, %v5955_v45, %v4915_v53  ;;  %v1186_v10 = vsel %vm1183_vm13, %v5892_v60, %v4929_v41  ;;  %v1187_v39 = vsel %vm1183_vm13, %v5861_v40, %v4930_v56 }
 0x16a   : > { %v4918_v0 = vpop.permute.xlu0 %4917  ;;  %v1210_v1 = vpack.c.bf16 %v1201_v63, %v1200_v38  ;;  %v4938_v2 = vpop.permute.xlu1 %4937  ;;  %v1211_v21 = vpack.c.bf16 %v1187_v39, %v1186_v10 }
 0x16b   : > { %v4920_v7 = vunpack.i.h.bf16 %v4918_v0  ;;  %v4919_v8 = vunpack.i.l.bf16 %v4918_v0  ;;  %v4940_v22 = vunpack.i.h.bf16 %v4938_v2  ;;  %v4939_v23 = vunpack.i.l.bf16 %v4938_v2 }
 0x16c   : > { %4731 = vmatprep.mubr.bf16.mxu1 %v1210_v1 }
 0x16d   : > { %4732 = vmatmul.mubr.bf16.vlgmr.msra.gmra.mrb[0].mxu1 %v1213_v9  ;;  %v1194_v4 = vsel %vm1183_vm13, %v5952_v44, %v4919_v8  ;;  %v1195_v45 = vsel %vm1183_vm13, %v5919_v20, %v4920_v7  ;;  %v1188_v31 = vsel %vm1183_vm13, %v5889_v59, %v4939_v23  ;;  %v1189_v33 = vsel %vm1183_vm13, %v5938_v14, %v4940_v22 }
 0x16e   : > { %v4933_v61 = vpop.permute.xlu0 %4932  ;;  %v1212_v11 = vpack.c.bf16 %v1195_v45, %v1194_v4  ;;  %v4953_v6 = vpop.permute.xlu1 %4952  ;;  %v1214_v48 = vpack.c.bf16 %v1189_v33, %v1188_v31 }
 0x16f   : > { %v4935_v12 = vunpack.i.h.bf16 %v4933_v61  ;;  %v4934_v13 = vunpack.i.l.bf16 %v4933_v61  ;;  %v4955_v60 = vunpack.i.h.bf16 %v4953_v6  ;;  %v4954_v24 = vunpack.i.l.bf16 %v4953_v6 }
 0x170   : > { %1459 = vmatprep.mubr.bf16.mxu0 %v1212_v11 }
 0x171   : > { %1460 = vmatmul.mubr.bf16.gmra.mrb[4].mxu0 %v1211_v21  ;;  %v1196_v40 = vsel %vm1183_vm13, %v5927_v26, %v4934_v13  ;;  %v1197_v44 = vsel %vm1183_vm13, %v5993_v15, %v4935_v12  ;;  %v1206_v35 = vsel %vm1183_vm13, %v5999_v18, %v4954_v24  ;;  %v1207_v26 = vsel %vm1183_vm13, %v5987_v5, %v4955_v60 }
 0x172   : > { %v4943_v28 = vpop.permute.xlu0 %4942  ;;  %v1215_v20 = vpack.c.bf16 %v1197_v44, %v1196_v40  ;;  %v4958_v34 = vpop.permute.xlu1 %4957  ;;  %v1219_v49 = vpack.c.bf16 %v1207_v26, %v1206_v35 }
 0x173   : > { %v4945_v29 = vunpack.i.h.bf16 %v4943_v28  ;;  %v4944_v30 = vunpack.i.l.bf16 %v4943_v28  ;;  %v4960_v14 = vunpack.i.h.bf16 %v4958_v34  ;;  %v4959_v50 = vunpack.i.l.bf16 %v4958_v34 }
 0x174   : > { %1467 = vmatprep.mubr.bf16.mxu0 %v1215_v20 }
 0x175   : > { %v1204_v15 = vsel %vm1183_vm13, %v5971_v62, %v4944_v30  ;;  %v1205_v27 = vsel %vm1183_vm13, %v6004_v19, %v4945_v29  ;;  %v1190_v19 = vsel %vm1183_vm13, %v5965_v54, %v4959_v50  ;;  %v1191_v51 = vsel %vm1183_vm13, %v5948_v42, %v4960_v14 }
 0x176   : > { %v4948_v43 = vpop.permute.xlu0 %4947  ;;  %v1216_v46 = vpack.c.bf16 %v1205_v27, %v1204_v15  ;;  %v1217_v52 = vpack.c.bf16 %v1191_v51, %v1190_v19  ;;  %v5080_v51 = vld [vmem:[%s5677_s16 + $0x40] sm:$0xff]  }
 0x177   : > { %v4950_v47 = vunpack.i.h.bf16 %v4948_v43  ;;  %v4949_v59 = vunpack.i.l.bf16 %v4948_v43  ;;  %4483 = vmatprep.subr.bf16.mxu0 %v5080_v51 }
 0x178   : > { %4735 = vmatprep.mubr.bf16.mxu1 %v1216_v46 }
 0x179   : > { %1468 = vmatmul.mubr.bf16.gmra.mrb[8].mxu0 %v1214_v48  ;;  %4736 = vmatmul.mubr.bf16.gmra.mrb[4].mxu1 %v1219_v49  ;;  %v1198_v5 = vsel %vm1183_vm13, %v5996_v16, %v4949_v59  ;;  %v1199_v62 = vsel %vm1183_vm13, %v5978_v3, %v4950_v47  ;;  %v4248_v3 = vld [vmem:[%s7243_s29] ss:$0 sm:$0xff] }
 0x17a   : > { %v1218_v18 = vpack.c.bf16 %v1199_v62, %v1198_v5 }
 0x17c   : > { %1475 = vmatprep.mubr.bf16.mxu0 %v1218_v18 }
 0x181   : > { %1476 = vmatmul.mubr.bf16.gmra.mrb[12].mxu0 %v1217_v52  ;;  %v5081_v52 = vld [vmem:[%s5677_s16] sm:$0xff]  }
 0x182   : > { %4484 = vmatpush3.bf16.msra.mxu0 %v5081_v52 }
 0x237   : > { %v4447_v53 = vpop.f32.mrb[0].mxu0 }
 0x238   : > { %v4448_v55 = vpop.f32.mrb[1].mxu0 }
 0x239   : > { %v4449_v56 = vadd.f32 %v4448_v55, %v4447_v53  ;;  %v4450_v41 = vpop.f32.mrb[2].mxu0  ;;  %v5082_v53 = vld [vmem:[%s5677_s16 + $0x48] sm:$0xff]   ;;  %v5085_v55 = vld [vmem:[%s5677_s16 + $0x80] sm:$0xff]  }
 0x23a   : > { %v4451_v57 = vpop.f32.mrb[3].mxu0  ;;  %4739 = vmatprep.subr.bf16.mxu1 %v5085_v55  ;;  %4485 = vmatprep.subr.bf16.mxu0 %v5082_v53  ;;  %v5099_v53 = vld [vmem:[%s5677_s16 + $0x78] sm:$0xff]  }
 0x23b   : > { %v4452_v16 = vadd.f32 %v4451_v57, %v4450_v41  ;;  %v1454_v58 = vadd.f32 %v4449_v56, %v4248_v3  ;;  %v5088_v56 = vld [vmem:[%s5677_s16 + $0x88] sm:$0xff]   ;;  %v5084_v57 = vld [vmem:[%s5677_s16 + $0x50] sm:$0xff]   ;;  %4740 = vmatpush3.bf16.msra.mxu1 %v5085_v55 }
 0x23c   : > { %v5083_v41 = vld [vmem:[%s5677_s16 + $0x8] sm:$0xff]   ;;  %4741 = vmatprep.subr.bf16.mxu1 %v5088_v56 }
 0x23d   : > { %v1457_v63 = vadd.f32 %v4452_v16, %v4248_v3  ;;  %4486 = vmatpush3.bf16.msra.mxu0 %v5083_v41  ;;  %v5086_v16 = vld [vmem:[%s5677_s16 + $0x10] sm:$0xff]   ;;  %v5100_v55 = vld [vmem:[%s5677_s16 + $0xa8] sm:$0xff]  }
 0x23e   : > { %4487 = vmatprep.subr.bf16.mxu0 %v5084_v57  ;;  %v5102_v57 = vld [vmem:[%s5677_s16 + $0xb0] sm:$0xff]  }
 0x23f   : > { %4742 = vmatpush3.bf16.msra.mxu1 %v5088_v56  ;;  %v5101_v56 = vld [vmem:[%s5677_s16 + $0x38] sm:$0xff]  }
 0x240   : > { %v4733_v38 = vpop.f32.mrb[0].mxu1 }
 0x241   : > { %v1518_v54 = vpop.f32.mrb[1].mxu1  ;;  %4488 = vmatpush3.bf16.msra.mxu0 %v5086_v16 }
 0x242   : > { %v6074_v0 = vadd.f32 %v1518_v54, %v1454_v58  ;;  %v4734_v42 = vpop.f32.mrb[2].mxu1  ;;  %v5087_v58 = vld [vmem:[%s5677_s16 + $0x58] sm:$0xff]   ;;  %v5090_v54 = vld [vmem:[%s5677_s16 + $0x60] sm:$0xff]  }
 0x243   : > { %v1521_v1 = vpop.f32.mrb[3].mxu1  ;;  %4489 = vmatprep.subr.bf16.mxu0 %v5087_v58 }
 0x244   : > { %v1549_v2 = vsub.f32 0.0, %v6074_v0  ;;  %v6077_v7 = vadd.f32 %v1521_v1, %v1457_v63  ;;  %v4453_v8 = vpop.f32.mrb[4].mxu0  ;;  %v5089_v63 = vld [vmem:[%s5677_s16 + $0x18] sm:$0xff]   ;;  %v5093_v1 = vld [vmem:[%s5677_s16 + $0x68] sm:$0xff]  }
 0x245   : > { %v4454_v9 = vpop.f32.mrb[5].mxu0  ;;  %4490 = vmatpush3.bf16.msra.mxu0 %v5089_v63 }
 0x246   : > { %v1550_v10 = vsub.f32 0.0, %v6077_v7  ;;  %v4455_v39 = vadd.f32 %v4454_v9, %v4453_v8  ;;  %v4456_v4 = vpop.f32.mrb[6].mxu0  ;;  %1565 = vrot.lane.b32.xlu0 %v1549_v2, %s5468_s5  ;;  %4491 = vmatprep.subr.bf16.mxu0 %v5090_v54  ;;  %v5095_v2 = vld [vmem:[%s5677_s16 + $0x28] sm:$0xff]  }
 0x247   : > { %v4457_v45 = vpop.f32.mrb[7].mxu0 }
 0x248   : > { %v1462_v61 = vadd.f32 %v4455_v39, %v4248_v3  ;;  %v4458_v11 = vadd.f32 %v4457_v45, %v4456_v4  ;;  %1567 = vrot.lane.b32.xlu1 %v1550_v10, %s5468_s5 }
 0x24a   : > { %v6082_v6 = vadd.f32 %v4733_v38, %v1462_v61  ;;  %v1465_v12 = vadd.f32 %v4458_v11, %v4248_v3  ;;  %v5094_v38 = vld [vmem:[%s5677_s16 + $0x98] sm:$0xff]  }
 0x24c   : > { %v6084_v13 = vadd.f32 %v4734_v42, %v1465_v12  ;;  %v4459_v21 = vpop.f32.mrb[8].mxu0  ;;  %v4737_v22 = vpop.f32.mrb[4].mxu1  ;;  %v1551_v23 = vsub.f32 0.0, %v6082_v6  ;;  %v5092_v42 = vld [vmem:[%s5677_s16 + $0x20] sm:$0xff]  }
 0x24d   : > { %v4460_v60 = vpop.f32.mrb[9].mxu0  ;;  %v1534_v24 = vpop.f32.mrb[5].mxu1  ;;  %4492 = vmatpush3.bf16.msra.mxu0 %v5092_v42 }
 0x24e   : > { %v4461_v40 = vadd.f32 %v4460_v60, %v4459_v21  ;;  %v4462_v44 = vpop.f32.mrb[10].mxu0  ;;  %v4738_v28 = vpop.f32.mrb[6].mxu1  ;;  %1569 = vrot.lane.b32.xlu0 %v1551_v23, %s5468_s5  ;;  %v1552_v20 = vsub.f32 0.0, %v6084_v13  ;;  %4493 = vmatprep.subr.bf16.mxu0 %v5093_v1 }
 0x24f   : > { %v4463_v29 = vpop.f32.mrb[11].mxu0  ;;  %v1537_v30 = vpop.f32.mrb[7].mxu1 }
 0x250   : > { %v1470_v31 = vadd.f32 %v4461_v40, %v4248_v3  ;;  %v4464_v33 = vadd.f32 %v4463_v29, %v4462_v44  ;;  %1571 = vrot.lane.b32.xlu1 %v1552_v20, %s5468_s5  ;;  %v5096_v40 = vld [vmem:[%s5677_s16 + $0x70] sm:$0xff]   ;;  %v5097_v44 = vld [vmem:[%s5677_s16 + $0xa0] sm:$0xff]  }
 0x251   : > { %4494 = vmatpush3.bf16.msra.mxu0 %v5095_v2 }
 0x252   : > { %v6090_v35 = vadd.f32 %v1534_v24, %v1470_v31  ;;  %v1473_v26 = vadd.f32 %v4464_v33, %v4248_v3  ;;  %4495 = vmatprep.subr.bf16.mxu0 %v5096_v40 }
 0x254   : > { %v1553_v34 = vsub.f32 0.0, %v6090_v35  ;;  %v6093_v15 = vadd.f32 %v1537_v30, %v1473_v26  ;;  %v4465_v27 = vpop.f32.mrb[12].mxu0 }
 0x255   : > { %v4466_v43 = vpop.f32.mrb[13].mxu0 }
 0x256   : > { %v1554_v46 = vsub.f32 0.0, %v6093_v15  ;;  %v4467_v47 = vadd.f32 %v4466_v43, %v4465_v27  ;;  %v4468_v59 = vpop.f32.mrb[14].mxu0  ;;  %1573 = vrot.lane.b32.xlu0 %v1553_v34, %s5468_s5 }
 0x257   : > { %v4469_v48 = vpop.f32.mrb[15].mxu0 }
 0x258   : > { %v1478_v49 = vadd.f32 %v4467_v47, %v4248_v3  ;;  %v4470_v14 = vadd.f32 %v4469_v48, %v4468_v59  ;;  %1575 = vrot.lane.b32.xlu1 %v1554_v46, %s5468_s5 }
 0x25a   : > { %v6098_v50 = vadd.f32 %v4737_v22, %v1478_v49  ;;  %v1481_v5 = vadd.f32 %v4470_v14, %v4248_v3  ;;  %v5091_v3 = vld [vmem:[%s5677_s16 + $0x90] sm:$0xff]  }
 0x25b   : > { %4743 = vmatprep.subr.bf16.mxu1 %v5091_v3 }
 0x25c   : > { %v6100_v62 = vadd.f32 %v4738_v28, %v1481_v5  ;;  %v1555_v18 = vsub.f32 0.0, %v6098_v50  ;;  %4744 = vmatpush3.bf16.msra.mxu1 %v5091_v3  ;;  %v5098_v28 = vld [vmem:[%s5677_s16 + $0x30] sm:$0xff]   ;;  %v5103_v3 = vld [vmem:[%s5682_s28 + $0x40] sm:$0xff]  }
 0x25d   : > { %4745 = vmatprep.subr.bf16.mxu1 %v5094_v38  ;;  %4496 = vmatpush3.bf16.msra.mxu0 %v5098_v28 }
 0x25e   : > { %1577 = vrot.lane.b32.xlu0 %v1555_v18, %s5468_s5  ;;  %v1556_v19 = vsub.f32 0.0, %v6100_v62  ;;  %4497 = vmatprep.subr.bf16.mxu0 %v5099_v53 }
 0x260   : > { %1579 = vrot.lane.b32.xlu1 %v1556_v19, %s5468_s5  ;;  %4746 = vmatpush3.bf16.msra.mxu1 %v5094_v38 }
 0x261   : > { %4747 = vmatprep.subr.bf16.mxu1 %v5097_v44  ;;  %4498 = vmatpush3.bf16.msra.mxu0 %v5101_v56 }
 0x262   : > { %4535 = vmatprep.subr.bf16.mxu0 %v5103_v3 }
 0x264   : > { %4748 = vmatpush3.bf16.msra.mxu1 %v5097_v44 }
 0x265   : > { %4749 = vmatprep.subr.bf16.mxu1 %v5100_v55 }
 0x268   : > { %4750 = vmatpush3.bf16.msra.mxu1 %v5100_v55 }
 0x269   : > { %4751 = vmatprep.subr.bf16.mxu1 %v5102_v57 }
 0x26c   : > { %4752 = vmatpush3.bf16.msra.mxu1 %v5102_v57 }
 0x2b8   : > { %v1566_v8 = vpop.permute.xlu0 %1565 }
 0x2b9   : > { %v1589_v9 = vsel %vm918_vm1, %v6074_v0, %v1566_v8 }
 0x2ba   : > { %v1605_v10 = vmin.f32 %v1589_v9, 0.0  ;;  %v1568_v39 = vpop.permute.xlu1 %1567  ;;  %vm1597_vm14 = vcmp.gt.f32.partialorder %v1589_v9, 0.0 }
 0x2bb   : > { %v1590_v4 = vsel %vm918_vm1, %v6077_v7, %v1568_v39 }
 0x2bc   : > { %v1613_v45 = vmul.f32 1.442695, %v1605_v10  ;;  %v1606_v61 = vmin.f32 %v1590_v4, 0.0  ;;  %vm1598_vm15 = vcmp.gt.f32.partialorder %v1590_v4, 0.0 }
 0x2be   : > { %5196 = vpow2.f32 %v1613_v45  ;;  %v1615_v11 = vmul.f32 1.442695, %v1606_v61 }
 0x2c0   : > { %5198 = vpow2.f32 %v1615_v11  ;;  %v1570_v12 = vpop.permute.xlu0 %1569 }
 0x2c1   : > { %v6128_v21 = vsel %vm918_vm1, %v6082_v6, %v1570_v12 }
 0x2c2   : > { %v1607_v0 = vmin.f32 %v6128_v21, 0.0  ;;  %v1572_v22 = vpop.permute.xlu1 %1571  ;;  %vm1599_vm0 = vcmp.gt.f32.partialorder %v6128_v21, 0.0 }
 0x2c3   : > { %v6133_v23 = vsel %vm918_vm1, %v6084_v13, %v1572_v22 }
 0x2c4   : > { %v1617_v7 = vmul.f32 1.442695, %v1607_v0  ;;  %v1608_v60 = vmin.f32 %v6133_v23, 0.0  ;;  %vm1600_vm3 = vcmp.gt.f32.partialorder %v6133_v23, 0.0 }
 0x2c6   : > { %5200 = vpow2.f32 %v1617_v7  ;;  %v1619_v24 = vmul.f32 1.442695, %v1608_v60 }
 0x2c8   : > { %v5197_v20 = vpop.eup %5196  ;;  %5202 = vpow2.f32 %v1619_v24  ;;  %v1574_v29 = vpop.permute.xlu0 %1573 }
 0x2c9   : > { %v4273_v6 = vadd.f32 -1.0, %v5197_v20  ;;  %v6141_v30 = vsel %vm918_vm1, %v6090_v35, %v1574_v29  ;;  %v5105_v29 = vld [vmem:[%s5677_s16 + $0xb8] sm:$0xff]   ;;  %s7244_s16 = scalar_lea.vmem %s7171_s6, %s5644_s20 }
 0x2ca   : > { %v5199_v13 = vpop.eup %5198  ;;  %v1609_v31 = vmin.f32 %v6141_v30, 0.0  ;;  %v1576_v33 = vpop.permute.xlu1 %1575  ;;  %vm1601_vm4 = vcmp.gt.f32.partialorder %v6141_v30, 0.0  ;;  %4753 = vmatprep.subr.bf16.mxu1 %v5105_v29 }
 0x2cb   : > { %v1637_v26 = vsel %vm1597_vm14, %v1589_v9, %v4273_v6  ;;  %v4274_v34 = vadd.f32 -1.0, %v5199_v13  ;;  %v6146_v27 = vsel %vm918_vm1, %v6093_v15, %v1576_v33  ;;  %4754 = vmatpush3.bf16.msra.mxu1 %v5105_v29 }
 0x2cc   : > { %v1653_v43 = vrot.slane %v1637_v26, 7  ;;  %v1621_v35 = vmul.f32 1.442695, %v1609_v31  ;;  %v1610_v46 = vmin.f32 %v6146_v27, 0.0  ;;  %vm1602_vm5 = vcmp.gt.f32.partialorder %v6146_v27, 0.0 }
 0x2cd   : > { %v1638_v47 = vsel %vm1598_vm15, %v1590_v4, %v4274_v34 }
 0x2ce   : > { %v6150_v59 = vsel %vm1002_vm2, 0.0, %v1653_v43  ;;  %v6153_v48 = vsel %vm1002_vm2, %v1653_v43, 0.0  ;;  %v1654_v49 = vrot.slane %v1638_v47, 7  ;;  %5204 = vpow2.f32 %v1621_v35  ;;  %v6225_v35 = vld [vmem:[%s5682_s28 + $0x80] sm:$0xff]  }
 0x2cf   : > { %v1700_v15 = vrot.slane %v6153_v48, 1  ;;  %v1623_v14 = vmul.f32 1.442695, %v1610_v46  ;;  %v1699_v52 = vrot.slane %v6150_v59, 1  ;;  %v1721_v58 = vrot.slane %v6153_v48, 2  ;;  %4763 = vmatprep.subr.bf16.mxu1 %v6225_v35 }
 0x2d0   : > { %v5201_v5 = vpop.eup %5200  ;;  %v6157_v18 = vsel %vm1002_vm2, 0.0, %v1654_v49  ;;  %v6160_v19 = vsel %vm1002_vm2, %v1654_v49, 0.0  ;;  %v1578_v51 = vpop.permute.xlu0 %1577  ;;  %v1720_v42 = vrot.slane %v6150_v59, 2 }
 0x2d1   : > { %v4275_v41 = vadd.f32 -1.0, %v5201_v5  ;;  %5206 = vpow2.f32 %v1623_v14  ;;  %v6174_v38 = vsel %vm918_vm1, %v6098_v50, %v1578_v51  ;;  %v4961_v54 = vpack.i.bf16 %v6157_v18, %v6150_v59 }
 0x2d2   : > { %v5203_v16 = vpop.eup %5202  ;;  %v1580_v63 = vpop.permute.xlu1 %1579  ;;  %v1703_v1 = vrot.slane %v6160_v19, 1  ;;  %v1611_v9 = vmin.f32 %v6174_v38, 0.0  ;;  %v1724_v50 = vrot.slane %v6160_v19, 2  ;;  %v6191_v4 = vsel %vm1037_vm6, %v1699_v52, %v1700_v15 }
 0x2d3   : > { %v1639_v2 = vsel %vm1599_vm0, %v6128_v21, %v4275_v41  ;;  %v4276_v8 = vadd.f32 -1.0, %v5203_v16  ;;  %v6187_v39 = vsel %vm918_vm1, %v6100_v62, %v1580_v63  ;;  %4962 = vrot.lane.b32.xlu0 %v4961_v54, %s5470_s8  ;;  %v1702_v12 = vrot.slane %v6157_v18, 1 }
 0x2d4   : > { %v1655_v10 = vrot.slane %v1639_v2, 7  ;;  %v1625_v61 = vmul.f32 1.442695, %v1611_v9  ;;  %v1612_v11 = vmin.f32 %v6187_v39, 0.0  ;;  %v1723_v22 = vrot.slane %v6157_v18, 2 }
 0x2d5   : > { %v1640_v45 = vsel %vm1600_vm3, %v6133_v23, %v4276_v8  ;;  %v6212_v13 = vsel %vm1037_vm6, %v1702_v12, %v1703_v1  ;;  %v6215_v31 = vsel %vm1062_vm9, %v1720_v42, %v1721_v58  ;;  %vm1603_vm7 = vcmp.gt.f32.partialorder %v6174_v38, 0.0 }
 0x2d6   : > { %v6199_v62 = vsel %vm1002_vm2, 0.0, %v1655_v10  ;;  %v1679_v21 = vsel %vm1002_vm2, %v1655_v10, 0.0  ;;  %v1656_v0 = vrot.slane %v1640_v45, 7  ;;  %5208 = vpow2.f32 %v1625_v61 }
 0x2d7   : > { %v1706_v7 = vrot.slane %v1679_v21, 1  ;;  %v1727_v60 = vrot.slane %v1679_v21, 2  ;;  %v1627_v24 = vmul.f32 1.442695, %v1612_v11  ;;  %v4966_v28 = vpack.i.bf16 %v6199_v62, %v6191_v4 }
 0x2d8   : > { %v5205_v23 = vpop.eup %5204  ;;  %v6204_v40 = vsel %vm1002_vm2, 0.0, %v1656_v0  ;;  %v1680_v44 = vsel %vm1002_vm2, %v1656_v0, 0.0  ;;  %v1705_v20 = vrot.slane %v6199_v62, 1  ;;  %v1726_v43 = vrot.slane %v6199_v62, 2 }
 0x2d9   : > { %v4277_v6 = vadd.f32 -1.0, %v5205_v23  ;;  %5210 = vpow2.f32 %v1627_v24  ;;  %v1730_v33 = vrot.slane %v1680_v44, 2  ;;  %4967 = vrot.lane.b32.xlu1 %v4966_v28, %s5470_s8  ;;  %v4971_v26 = vpack.i.bf16 %v6212_v13, %v6204_v40 }
 0x2da   : > { %v6221_v34 = vsel %vm1037_vm6, %v1705_v20, %v1706_v7  ;;  %v1729_v49 = vrot.slane %v6204_v40, 2  ;;  %v6235_v5 = vsel %vm1062_vm9, %v1723_v22, %v1724_v50  ;;  %v6238_v19 = vsel %vm1062_vm9, %v1726_v43, %v1727_v60 }
 0x2db   : > { %v5207_v46 = vpop.eup %5206  ;;  %v1641_v47 = vsel %vm1601_vm4, %v6141_v30, %v4277_v6  ;;  %v4976_v48 = vpack.i.bf16 %v6215_v31, %v6221_v34  ;;  %4972 = vrot.lane.b32.xlu0 %v4971_v26, %s5470_s8  ;;  %v1709_v51 = vrot.slane %v1680_v44, 1  ;;  %v4981_v30 = vpack.i.bf16 %v6238_v19, %v6235_v5 }
 0x2dc   : > { %v1657_v15 = vrot.slane %v1641_v47, 7  ;;  %v4278_v14 = vadd.f32 -1.0, %v5207_v46  ;;  %v1708_v52 = vrot.slane %v6204_v40, 1  ;;  %v6252_v41 = vsel %vm1062_vm9, %v1729_v49, %v1730_v33 }
 0x2dd   : > { %4977 = vrot.lane.b32.xlu1 %v4976_v48, %s5470_s8  ;;  %vm1604_vm8 = vcmp.gt.f32.partialorder %v6187_v39, 0.0 }
 0x2de   : > { %v6246_v53 = vsel %vm1002_vm2, 0.0, %v1657_v15  ;;  %v1681_v55 = vsel %vm1002_vm2, %v1657_v15, 0.0  ;;  %v1642_v56 = vsel %vm1602_vm5, %v6146_v27, %v4278_v14  ;;  %v6261_v63 = vsel %vm1037_vm6, %v1708_v52, %v1709_v51 }
 0x2df   : > { %v1658_v57 = vrot.slane %v1642_v56, 7  ;;  %v4986_v3 = vpack.i.bf16 %v6246_v53, %v6252_v41  ;;  %4982 = vrot.lane.b32.xlu0 %v4981_v30, %s5470_s8  ;;  %v1711_v27 = vrot.slane %v6246_v53, 1  ;;  %v1712_v54 = vrot.slane %v1681_v55, 1 }
 0x2e0   : > { %v5209_v16 = vpop.eup %5208  ;;  %v1733_v21 = vrot.slane %v1681_v55, 2  ;;  %v1732_v20 = vrot.slane %v6246_v53, 2 }
 0x2e1   : > { %v6258_v58 = vsel %vm1002_vm2, 0.0, %v1658_v57  ;;  %v1682_v42 = vsel %vm1002_vm2, %v1658_v57, 0.0  ;;  %v4279_v1 = vadd.f32 -1.0, %v5209_v16  ;;  %4987 = vrot.lane.b32.xlu1 %v4986_v3, %s5470_s8  ;;  %v6273_v61 = vsel %vm1037_vm6, %v1711_v27, %v1712_v54  ;;  %v6318_v57 = vld [vmem:[#allocation3] sm:$0xff]  ;;  %v6320_v3 = vld [vmem:[#allocation3 + $0x8] sm:$0xff]  ;;  %v6322_v16 = vld [vmem:[#allocation3 + $0x10] sm:$0xff] }
 0x2e2   : > { %v4991_v2 = vpack.i.bf16 %v6261_v63, %v6258_v58  ;;  %v1715_v10 = vrot.slane %v1682_v42, 1  ;;  %v1714_v11 = vrot.slane %v6258_v58, 1  ;;  %v1736_v7 = vrot.slane %v1682_v42, 2  ;;  %v6326_v42 = vld [vmem:[#allocation3 + $0x18] sm:$0xff] }
 0x2e3   : > { %v5211_v8 = vpop.eup %5210  ;;  %v1643_v9 = vsel %vm1603_vm7, %v6174_v38, %v4279_v1  ;;  %v1735_v23 = vrot.slane %v6258_v58, 2  ;;  %v6308_v30 = vsel %vm1062_vm9, %v1732_v20, %v1733_v21  ;;  %v2590_v27 = vsub.f32 0.0, %v6318_v57 }
 0x2e4   : > { %v4280_v50 = vadd.f32 -1.0, %v5211_v8  ;;  %4992 = vrot.lane.b32.xlu0 %v4991_v2, %s5470_s8  ;;  %v1659_v45 = vrot.slane %v1643_v9, 7  ;;  %v6288_v28 = vsel %vm1037_vm6, %v1714_v11, %v1715_v10  ;;  %v2591_v54 = vsub.f32 0.0, %v6320_v3  ;;  %v6332_v8 = vld [vmem:[#allocation3 + $0x20] sm:$0xff]  ;;  %v6334_v9 = vld [vmem:[#allocation3 + $0x28] sm:$0xff]  ;;  %v6342_v11 = vld [vmem:[#allocation3 + $0x38] sm:$0xff] }
 0x2e5   : > { %1772 = vrot.lane.b32.xlu1 %v6273_v61, %s5470_s8  ;;  %v6299_v15 = vsel %vm1062_vm9, %v1735_v23, %v1736_v7  ;;  %v2592_v1 = vsub.f32 0.0, %v6322_v16  ;;  %v2593_v2 = vsub.f32 0.0, %v6326_v42  ;;  %v2595_v10 = vsub.f32 0.0, %v6334_v9 }
 0x2e6   : > { %v1644_v12 = vsel %vm1604_vm8, %v6187_v39, %v4280_v50  ;;  %v6280_v38 = vsel %vm1002_vm2, 0.0, %v1659_v45  ;;  %v1683_v0 = vsel %vm1002_vm2, %v1659_v45, 0.0  ;;  %v5006_v52 = vpack.i.bf16 %v6299_v15, %v6308_v30  ;;  %v6340_v45 = vld [vmem:[#allocation3 + $0x30] sm:$0xff] }
 0x2e7   : > { %v1660_v22 = vrot.slane %v1644_v12, 7  ;;  %v1718_v60 = vrot.slane %v1683_v0, 1  ;;  %v1717_v24 = vrot.slane %v6280_v38, 1  ;;  %v1739_v43 = vrot.slane %v1683_v0, 2 }
 0x2e8   : > { %v1738_v48 = vrot.slane %v6280_v38, 2  ;;  %v2594_v50 = vsub.f32 0.0, %v6332_v8  ;;  %v2596_v12 = vsub.f32 0.0, %v6340_v45  ;;  %v2597_v21 = vsub.f32 0.0, %v6342_v11 }
 0x2e9   : > { %v1684_v44 = vsel %vm1002_vm2, %v1660_v22, 0.0  ;;  %v1676_v39 = vsel %vm1002_vm2, 0.0, %v1660_v22  ;;  %v6293_v47 = vsel %vm1037_vm6, %v1717_v24, %v1718_v60 }
 0x2ea   : > { %v1751_v29 = vrot.slane %v1684_v44, 1  ;;  %v1762_v6 = vrot.slane %v1684_v44, 2  ;;  %v1750_v33 = vrot.slane %v1676_v39, 1  ;;  %v1761_v26 = vrot.slane %v1676_v39, 2 }
 0x2eb   : > { %v4996_v46 = vpack.i.bf16 %v1676_v39, %v6280_v38  ;;  %v5001_v49 = vpack.i.bf16 %v6293_v47, %v6288_v28  ;;  %v6313_v55 = vsel %vm1062_vm9, %v1738_v48, %v1739_v43 }
 0x2ec   : > { %v6302_v14 = vsel %vm1037_vm6, %v1750_v33, %v1751_v29  ;;  %v1763_v51 = vsel %vm1062_vm9, %v1761_v26, %v1762_v6  ;;  %v5104_v26 = vld [vmem:[%s5682_s28] sm:$0xff]  }
 0x2ed   : > { %4997 = vrot.lane.b32.xlu0 %v4996_v46, %s5470_s8  ;;  %5002 = vrot.lane.b32.xlu1 %v5001_v49, %s5470_s8  ;;  %v5011_v56 = vpack.i.bf16 %v1763_v51, %v6313_v55  ;;  %v5106_v46 = vld [vmem:[%s5682_s28 + $0x48] sm:$0xff]  }
 0x2f1   : > { %5007 = vrot.lane.b32.xlu0 %v5006_v52, %s5470_s8  ;;  %5012 = vrot.lane.b32.xlu1 %v5011_v56, %s5470_s8 }
 0x2f5   : > { %2606 = vrot.lane.b32.xlu0 %v2590_v27, %s5468_s5  ;;  %2608 = vrot.lane.b32.xlu1 %v2591_v54, %s5468_s5  ;;  %v5107_v54 = vld [vmem:[%s5682_s28 + $0x8] sm:$0xff]  }
 0x2f9   : > { %2610 = vrot.lane.b32.xlu0 %v2592_v1, %s5468_s5  ;;  %2612 = vrot.lane.b32.xlu1 %v2593_v2, %s5468_s5  ;;  %v5108_v2 = vld [vmem:[%s5682_s28 + $0x50] sm:$0xff]  }
 0x2fd   : > { %2614 = vrot.lane.b32.xlu0 %v2594_v50, %s5468_s5  ;;  %2616 = vrot.lane.b32.xlu1 %v2595_v10, %s5468_s5 }
 0x301   : > { %2618 = vrot.lane.b32.xlu0 %v2596_v12, %s5468_s5  ;;  %2620 = vrot.lane.b32.xlu1 %v2597_v21, %s5468_s5 }
 0x345   : > { %v4963_v0 = vpop.permute.xlu0 %4962 }
 0x346   : > { %v4965_v22 = vunpack.i.h.bf16 %v4963_v0  ;;  %v4964_v7 = vunpack.i.l.bf16 %v4963_v0 }
 0x348   : > { %v1840_v60 = vsel %vm1183_vm13, %v6017_v32, %v4964_v7  ;;  %v1841_v24 = vsel %vm1183_vm13, %v6215_v31, %v4965_v22 }
 0x349   : > { %v6354_v23 = vpack.c.bf16 %v1841_v24, %v1840_v60  ;;  %v5110_v24 = vld [vmem:[%s5682_s28 + $0x10] sm:$0xff]  }
 0x34b   : > { %v4968_v44 = vpop.permute.xlu1 %4967  ;;  %2099 = vmatprep.mubr.bf16.mxu0 %v6354_v23 }
 0x34c   : > { %v4970_v39 = vunpack.i.h.bf16 %v4968_v44  ;;  %v4969_v20 = vunpack.i.l.bf16 %v4968_v44 }
 0x34d   : > { %v4973_v29 = vpop.permute.xlu0 %4972 }
 0x34e   : > { %v1833_v6 = vsel %vm1183_vm13, %v6150_v59, %v4969_v20  ;;  %v4974_v33 = vunpack.i.l.bf16 %v4973_v29  ;;  %v1842_v49 = vsel %vm1183_vm13, %v6235_v5, %v4970_v39  ;;  %v4975_v56 = vunpack.i.h.bf16 %v4973_v29 }
 0x34f   : > { %v6361_v43 = vpack.c.bf16 %v1833_v6, %v6021_v36  ;;  %v4978_v32 = vpop.permute.xlu1 %4977  ;;  %v5113_v6 = vld [vmem:[%s5682_s28 + $0x18] sm:$0xff]  }
 0x350   : > { %v4980_v31 = vunpack.i.h.bf16 %v4978_v32  ;;  %v4979_v48 = vunpack.i.l.bf16 %v4978_v32  ;;  %v1843_v51 = vsel %vm1183_vm13, %v6238_v19, %v4974_v33  ;;  %v1834_v60 = vsel %vm1183_vm13, %v6157_v18, %v4975_v56  ;;  %v5112_v18 = vld [vmem:[%s5682_s28 + $0x88] sm:$0xff]  }
 0x351   : > { %v4983_v52 = vpop.permute.xlu0 %4982  ;;  %2100 = vmatmul.mubr.bf16.vlgmr.msra.gmra.mrb[16].mxu0 %v6361_v43  ;;  %v6369_v59 = vpack.c.bf16 %v1843_v51, %v1842_v49  ;;  %v5117_v51 = vld [vmem:[%s5682_s28 + $0x68] sm:$0xff]  }
 0x352   : > { %v4985_v27 = vunpack.i.h.bf16 %v4983_v52  ;;  %v4984_v36 = vunpack.i.l.bf16 %v4983_v52  ;;  %4536 = vmatpush3.bf16.msra.mxu0 %v5104_v26  ;;  %v1848_v5 = vsel %vm1183_vm13, %v6191_v4, %v4980_v31  ;;  %v1835_v12 = vsel %vm1183_vm13, %v6199_v62, %v4979_v48  ;;  %v5118_v52 = vld [vmem:[%s5682_s28 + $0x98] sm:$0xff]  }
 0x353   : > { %v4988_v1 = vpop.permute.xlu1 %4987  ;;  %2107 = vmatprep.mubr.bf16.mxu0 %v6369_v59  ;;  %4537 = vmatprep.subr.bf16.mxu0 %v5106_v46  ;;  %v6392_v62 = vpack.c.bf16 %v1835_v12, %v1834_v60  ;;  %v5116_v46 = vld [vmem:[%s5682_s28 + $0x20] sm:$0xff]  }
 0x354   : > { %v4990_v19 = vunpack.i.h.bf16 %v4988_v1  ;;  %v4989_v50 = vunpack.i.l.bf16 %v4988_v1  ;;  %v1849_v10 = vsel %vm1183_vm13, %v6212_v13, %v4984_v36  ;;  %v1850_v22 = vsel %vm1183_vm13, %v6221_v34, %v4985_v27  ;;  %v5111_v34 = vld [vmem:[%s5682_s28 + $0x58] sm:$0xff]   ;;  %v5119_v1 = vld [vmem:[%s5682_s28 + $0x28] sm:$0xff]  }
 0x355   : > { %v6380_v0 = vpack.c.bf16 %v1849_v10, %v1848_v5  ;;  %v5121_v10 = vld [vmem:[%s5682_s28 + $0xa0] sm:$0xff]  }
 0x356   : > { %v4993_v21 = vpop.permute.xlu0 %4992  ;;  %v1851_v4 = vsel %vm1183_vm13, %v6261_v63, %v4989_v50  ;;  %4538 = vmatpush3.bf16.msra.mxu0 %v5107_v54  ;;  %v1844_v63 = vsel %vm1183_vm13, %v6252_v41, %v4990_v19  ;;  %v5114_v41 = vld [vmem:[%s5682_s28 + $0x60] sm:$0xff]   ;;  %v5120_v50 = vld [vmem:[%s5682_s28 + $0x70] sm:$0xff]  }
 0x357   : > { %v4994_v7 = vunpack.i.l.bf16 %v4993_v21  ;;  %v6389_v13 = vpack.c.bf16 %v1851_v4, %v1850_v22  ;;  %4755 = vmatprep.mubr.bf16.mxu1 %v6380_v0  ;;  %4539 = vmatprep.subr.bf16.mxu0 %v5108_v2  ;;  %v4995_v44 = vunpack.i.h.bf16 %v4993_v21  ;;  %v1773_v20 = vpop.permute.xlu1 %1772 }
 0x358   : > { %v1837_v26 = vsel %vm1183_vm13, %v6246_v53, %v1773_v20 }
 0x359   : > { %v1845_v39 = vsel %vm1183_vm13, %v6308_v30, %v4994_v7  ;;  %2108 = vmatmul.mubr.bf16.gmra.mrb[20].mxu0 %v6392_v62  ;;  %4756 = vmatmul.mubr.bf16.vlgmr.msra.gmra.mrb[8].mxu1 %v6389_v13  ;;  %v5115_v30 = vld [vmem:[%s5682_s28 + $0x90] sm:$0xff]   ;;  %v1836_v33 = vsel %vm1183_vm13, %v6204_v40, %v4995_v44  ;;  %v5125_v44 = vld [vmem:[%s5682_s28 + $0x38] sm:$0xff]  }
 0x35a   : > { %v6402_v29 = vpack.c.bf16 %v1845_v39, %v1844_v63  ;;  %4540 = vmatpush3.bf16.msra.mxu0 %v5110_v24  ;;  %4764 = vmatpush3.bf16.msra.mxu1 %v6225_v35  ;;  %v6414_v35 = vpack.c.bf16 %v1837_v26, %v1836_v33  ;;  %v5122_v24 = vld [vmem:[%s5682_s28 + $0x30] sm:$0xff]   ;;  %v5134_v63 = vld [vmem:[%s5688_s14 + $0x58] sm:$0xff]   ;;  %v4281_v26 = vld [vmem:[%s7244_s16] ss:$0 sm:$0xff] }
 0x35b   : > { %4541 = vmatprep.subr.bf16.mxu0 %v5111_v34  ;;  %4765 = vmatprep.subr.bf16.mxu1 %v5112_v18  ;;  %v5135_v39 = vld [vmem:[%s5688_s14 + $0x18] sm:$0xff]  }
 0x35c   : > { %2115 = vmatprep.mubr.bf16.mxu0 %v6402_v29 }
 0x35e   : > { %4542 = vmatpush3.bf16.msra.mxu0 %v5113_v6  ;;  %4766 = vmatpush3.bf16.msra.mxu1 %v5112_v18  ;;  %v5136_v18 = vld [vmem:[%s5688_s14 + $0x60] sm:$0xff]  }
 0x35f   : > { %v4998_v32 = vpop.permute.xlu0 %4997  ;;  %v5003_v49 = vpop.permute.xlu1 %5002  ;;  %4543 = vmatprep.subr.bf16.mxu0 %v5114_v41  ;;  %4767 = vmatprep.subr.bf16.mxu1 %v5115_v30 }
 0x360   : > { %v5000_v31 = vunpack.i.h.bf16 %v4998_v32  ;;  %v4999_v48 = vunpack.i.l.bf16 %v4998_v32  ;;  %v5005_v40 = vunpack.i.h.bf16 %v5003_v49  ;;  %v5004_v56 = vunpack.i.l.bf16 %v5003_v49 }
 0x361   : > { %2116 = vmatmul.mubr.bf16.gmra.mrb[24].mxu0 %v6414_v35 }
 0x362   : > { %v1846_v53 = vsel %vm1183_vm13, %v6299_v15, %v4999_v48  ;;  %v1847_v27 = vsel %vm1183_vm13, %v6313_v55, %v5000_v31  ;;  %4544 = vmatpush3.bf16.msra.mxu0 %v5116_v46  ;;  %4768 = vmatpush3.bf16.msra.mxu1 %v5115_v30  ;;  %v1838_v15 = vsel %vm1183_vm13, %v6258_v58, %v5004_v56 }
 0x363   : > { %v5008_v36 = vpop.permute.xlu0 %5007  ;;  %v1866_v54 = vpack.c.bf16 %v1847_v27, %v1846_v53  ;;  %v5013_v19 = vpop.permute.xlu1 %5012  ;;  %4545 = vmatprep.subr.bf16.mxu0 %v5117_v51  ;;  %4769 = vmatprep.subr.bf16.mxu1 %v5118_v52  ;;  %v1839_v55 = vsel %vm1183_vm13, %v6280_v38, %v5005_v40 }
 0x364   : > { %v5010_v5 = vunpack.i.h.bf16 %v5008_v36  ;;  %v5009_v2 = vunpack.i.l.bf16 %v5008_v36  ;;  %v5015_v12 = vunpack.i.h.bf16 %v5013_v19  ;;  %v5014_v21 = vunpack.i.l.bf16 %v5013_v19 }
 0x365   : > { %2123 = vmatprep.mubr.bf16.mxu0 %v1866_v54  ;;  %v1865_v38 = vpack.c.bf16 %v1839_v55, %v1838_v15 }
 0x366   : > { %v1852_v22 = vsel %vm1183_vm13, %v6273_v61, %v5009_v2  ;;  %v1853_v4 = vsel %vm1183_vm13, %v6288_v28, %v5010_v5  ;;  %4546 = vmatpush3.bf16.msra.mxu0 %v5119_v1  ;;  %4770 = vmatpush3.bf16.msra.mxu1 %v5118_v52  ;;  %v1854_v60 = vsel %vm1183_vm13, %v6293_v47, %v5014_v21  ;;  %v5123_v61 = vld [vmem:[%s5682_s28 + $0x78] sm:$0xff]   ;;  %v5124_v28 = vld [vmem:[%s5682_s28 + $0xa8] sm:$0xff]   ;;  %v5126_v47 = vld [vmem:[%s5682_s28 + $0xb0] sm:$0xff]  }
 0x367   : > { %v1864_v7 = vpack.c.bf16 %v1853_v4, %v1852_v22  ;;  %v1855_v58 = vsel %vm1183_vm13, %v6302_v14, %v5015_v12  ;;  %4547 = vmatprep.subr.bf16.mxu0 %v5120_v50  ;;  %4771 = vmatprep.subr.bf16.mxu1 %v5121_v10  ;;  %v5127_v14 = vld [vmem:[%s5682_s28 + $0xb8] sm:$0xff]   ;;  %s3929_s28 = sshll.u32 %s5722_s7, 4  ;;  %s6985_s28 = int_to_ptr.vmem [resolvable:$true] %s3929_s28 }
 0x368   : > { %v1867_v34 = vpack.c.bf16 %v1855_v58, %v1854_v60 }
 0x369   : > { %4759 = vmatprep.mubr.bf16.mxu1 %v1864_v7  ;;  %2124 = vmatmul.mubr.bf16.gmra.mrb[28].mxu0 %v1865_v38 }
 0x36a   : > { %4760 = vmatmul.mubr.bf16.gmra.mrb[12].mxu1 %v1867_v34  ;;  %4548 = vmatpush3.bf16.msra.mxu0 %v5122_v24 }
 0x36b   : > { %4772 = vmatpush3.bf16.msra.mxu1 %v5121_v10  ;;  %4779 = vmatprep.mubr.bf16.mxu1 %v6380_v0  ;;  %v5131_v0 = vld [vmem:[%s5688_s14 + $0x8] sm:$0xff]  }
 0x36c   : > { %2428 = vmatprep.mubr.bf16.mxu0 %v6354_v23  ;;  %4549 = vmatprep.subr.bf16.mxu0 %v5123_v61  ;;  %v5128_v23 = vld [vmem:[%s5688_s14 + $0x40] sm:$0xff]  }
 0x36d   : > { %4773 = vmatprep.subr.bf16.mxu1 %v5124_v28 }
 0x36e   : > { %4550 = vmatpush3.bf16.msra.mxu0 %v5125_v44 }
 0x36f   : > { %4774 = vmatpush3.bf16.msra.mxu1 %v5124_v28  ;;  %4587 = vmatprep.subr.bf16.mxu0 %v5128_v23 }
 0x370   : > { %4775 = vmatprep.subr.bf16.mxu1 %v5126_v47 }
 0x371   : > { %2429 = vmatmul.mubr.bf16.vlgmr.msra.gmra.mrb[32].mxu0 %v6361_v43  ;;  %v5129_v43 = vld [vmem:[%s5688_s14] sm:$0xff]  }
 0x372   : > { %2436 = vmatprep.mubr.bf16.mxu0 %v6369_v59  ;;  %v5130_v59 = vld [vmem:[%s5688_s14 + $0x48] sm:$0xff]   ;;  %4588 = vmatpush3.bf16.msra.mxu0 %v5129_v43 }
 0x373   : > { %4776 = vmatpush3.bf16.msra.mxu1 %v5126_v47  ;;  %4589 = vmatprep.subr.bf16.mxu0 %v5130_v59 }
 0x374   : > { %4777 = vmatprep.subr.bf16.mxu1 %v5127_v14 }
 0x376   : > { %4590 = vmatpush3.bf16.msra.mxu0 %v5131_v0 }
 0x377   : > { %4778 = vmatpush3.bf16.msra.mxu1 %v5127_v14 }
 0x379   : > { %2437 = vmatmul.mubr.bf16.gmra.mrb[36].mxu0 %v6392_v62  ;;  %v5133_v62 = vld [vmem:[%s5688_s14 + $0x10] sm:$0xff]  }
 0x37a   : > { %4780 = vmatmul.mubr.bf16.vlgmr.msra.gmra.mrb[16].mxu1 %v6389_v13  ;;  %2444 = vmatprep.mubr.bf16.mxu0 %v6402_v29  ;;  %v5132_v13 = vld [vmem:[%s5688_s14 + $0x50] sm:$0xff]  }
 0x37b   : > { %4783 = vmatprep.mubr.bf16.mxu1 %v1864_v7  ;;  %4591 = vmatprep.subr.bf16.mxu0 %v5132_v13  ;;  %v2609_v13 = vpop.permute.xlu1 %2608 }
 0x37c   : > { %4592 = vmatpush3.bf16.msra.mxu0 %v5133_v62 }
 0x37d   : > { %4593 = vmatprep.subr.bf16.mxu0 %v5134_v63 }
 0x380   : > { %4594 = vmatpush3.bf16.msra.mxu0 %v5135_v39 }
 0x381   : > { %2445 = vmatmul.mubr.bf16.gmra.mrb[40].mxu0 %v6414_v35  ;;  %4595 = vmatprep.subr.bf16.mxu0 %v5136_v18  ;;  %v2607_v18 = vpop.permute.xlu0 %2606 }
 0x382   : > { %4784 = vmatmul.mubr.bf16.gmra.mrb[20].mxu1 %v1867_v34  ;;  %2452 = vmatprep.mubr.bf16.mxu0 %v1866_v54 }
 0x389   : > { %2453 = vmatmul.mubr.bf16.gmra.mrb[44].mxu0 %v1865_v38 }
 0x424   : > { %v4499_v20 = vpop.f32.mrb[16].mxu0 }
 0x425   : > { %v4500_v29 = vpop.f32.mrb[17].mxu0 }
 0x426   : > { %v4501_v6 = vadd.f32 %v4500_v29, %v4499_v20  ;;  %v4502_v41 = vpop.f32.mrb[18].mxu0 }
 0x427   : > { %v4503_v30 = vpop.f32.mrb[19].mxu0 }
 0x428   : > { %v4504_v33 = vadd.f32 %v4503_v30, %v4502_v41  ;;  %v2102_v35 = vadd.f32 %v4501_v6, %v4281_v26  ;;  %v6484_v6 = vsel %vm918_vm1, %v6320_v3, %v2609_v13 }
 0x429   : > { %vm2639_vm9 = vcmp.gt.f32.partialorder %v6484_v6, 0.0 }
 0x42a   : > { %v2105_v56 = vadd.f32 %v4504_v33, %v4281_v26  ;;  %v6488_v33 = vsel %vm918_vm1, %v6318_v57, %v2607_v18 }
 0x42b   : > { %vm2638_vm10 = vcmp.gt.f32.partialorder %v6488_v33, 0.0 }
 0x42c   : > { %v4505_v32 = vpop.f32.mrb[20].mxu0  ;;  %v4757_v46 = vpop.f32.mrb[8].mxu1 }
 0x42d   : > { %v4506_v31 = vpop.f32.mrb[21].mxu0  ;;  %v2166_v48 = vpop.f32.mrb[9].mxu1 }
 0x42e   : > { %v4507_v49 = vadd.f32 %v4506_v31, %v4505_v32  ;;  %v6466_v51 = vadd.f32 %v2166_v48, %v2102_v35  ;;  %v4508_v52 = vpop.f32.mrb[22].mxu0  ;;  %v4758_v40 = vpop.f32.mrb[10].mxu1  ;;  %v2647_v32 = vmin.f32 %v6484_v6, 0.0 }
 0x42f   : > { %v4509_v53 = vpop.f32.mrb[23].mxu0  ;;  %v2169_v27 = vpop.f32.mrb[11].mxu1 }
 0x430   : > { %v2110_v36 = vadd.f32 %v4507_v49, %v4281_v26  ;;  %v4510_v54 = vadd.f32 %v4509_v53, %v4508_v52  ;;  %v6468_v1 = vadd.f32 %v2169_v27, %v2105_v56  ;;  %v2613_v35 = vpop.permute.xlu1 %2612  ;;  %v2611_v31 = vpop.permute.xlu0 %2610  ;;  %v2656_v57 = vmul.f32 1.442695, %v2647_v32 }
 0x432   : > { %v6470_v5 = vadd.f32 %v4757_v46, %v2110_v36  ;;  %v2113_v2 = vadd.f32 %v4510_v54, %v4281_v26  ;;  %v2646_v46 = vmin.f32 %v6488_v33, 0.0  ;;  %5212 = vpow2.f32 %v2656_v57 }
 0x434   : > { %v6472_v19 = vadd.f32 %v4758_v40, %v2113_v2  ;;  %v4511_v50 = vpop.f32.mrb[24].mxu0 }
 0x435   : > { %v4512_v10 = vpop.f32.mrb[25].mxu0 }
 0x436   : > { %v4513_v12 = vadd.f32 %v4512_v10, %v4511_v50  ;;  %v4514_v21 = vpop.f32.mrb[26].mxu0  ;;  %v2654_v10 = vmul.f32 1.442695, %v2646_v46 }
 0x437   : > { %v4515_v15 = vpop.f32.mrb[27].mxu0 }
 0x438   : > { %v4516_v55 = vadd.f32 %v4515_v15, %v4514_v21  ;;  %v2118_v7 = vadd.f32 %v4513_v12, %v4281_v26  ;;  %v6503_v12 = vsel %vm918_vm1, %v6326_v42, %v2613_v35  ;;  %5214 = vpow2.f32 %v2654_v10 }
 0x439   : > { %v2649_v42 = vmin.f32 %v6503_v12, 0.0  ;;  %vm2641_vm11 = vcmp.gt.f32.partialorder %v6503_v12, 0.0 }
 0x43a   : > { %v2121_v28 = vadd.f32 %v4516_v55, %v4281_v26 }
 0x43b   : > { %v2660_v32 = vmul.f32 1.442695, %v2649_v42 }
 0x43c   : > { %v4517_v4 = vpop.f32.mrb[28].mxu0 }
 0x43d   : > { %v4761_v22 = vpop.f32.mrb[12].mxu1  ;;  %v4518_v58 = vpop.f32.mrb[29].mxu0 }
 0x43e   : > { %v2182_v60 = vpop.f32.mrb[13].mxu1  ;;  %v4519_v34 = vadd.f32 %v4518_v58, %v4517_v4  ;;  %v4520_v61 = vpop.f32.mrb[30].mxu0 }
 0x43f   : > { %v6474_v24 = vadd.f32 %v2182_v60, %v2118_v7  ;;  %v4762_v38 = vpop.f32.mrb[14].mxu1  ;;  %v4521_v47 = vpop.f32.mrb[31].mxu0  ;;  %v6508_v7 = vsel %vm918_vm1, %v6322_v16, %v2611_v31 }
 0x440   : > { %v2185_v44 = vpop.f32.mrb[15].mxu1  ;;  %v2126_v14 = vadd.f32 %v4519_v34, %v4281_v26  ;;  %v4522_v43 = vadd.f32 %v4521_v47, %v4520_v61  ;;  %v2617_v4 = vpop.permute.xlu1 %2616  ;;  %vm2640_vm12 = vcmp.gt.f32.partialorder %v6508_v7, 0.0 }
 0x441   : > { %v6476_v23 = vadd.f32 %v2185_v44, %v2121_v28  ;;  %v6514_v61 = vsel %vm918_vm1, %v6334_v9, %v2617_v4  ;;  %v2615_v28 = vpop.permute.xlu0 %2614 }
 0x442   : > { %v6478_v59 = vadd.f32 %v4761_v22, %v2126_v14  ;;  %v2129_v0 = vadd.f32 %v4522_v43, %v4281_v26  ;;  %v6495_v26 = vld [vmem:[%s7246_s27] ss:$0 sm:$0xff]  ;;  %v2651_v46 = vmin.f32 %v6514_v61, 0.0  ;;  %v6520_v35 = vsel %vm918_vm1, %v6332_v8, %v2615_v28 }
 0x443   : > { %vm2643_vm14 = vcmp.gt.f32.partialorder %v6514_v61, 0.0  ;;  %vm2642_vm15 = vcmp.gt.f32.partialorder %v6520_v35, 0.0 }
 0x444   : > { %v6480_v62 = vadd.f32 %v4762_v38, %v2129_v0  ;;  %v4551_v63 = vpop.f32.mrb[32].mxu0 }
 0x445   : > { %v4552_v39 = vpop.f32.mrb[33].mxu0 }
 0x446   : > { %v4553_v20 = vadd.f32 %v4552_v39, %v4551_v63  ;;  %v4554_v29 = vpop.f32.mrb[34].mxu0  ;;  %v2648_v63 = vmin.f32 %v6508_v7, 0.0 }
 0x447   : > { %v4555_v41 = vpop.f32.mrb[35].mxu0 }
 0x448   : > { %v4556_v30 = vadd.f32 %v4555_v41, %v4554_v29  ;;  %v2431_v49 = vadd.f32 %v4553_v20, %v6495_v26 }
 0x44a   : > { %v2434_v54 = vadd.f32 %v4556_v30, %v6495_v26 }
 0x44c   : > { %v4557_v48 = vpop.f32.mrb[36].mxu0 }
 0x44d   : > { %v4781_v3 = vpop.f32.mrb[16].mxu1  ;;  %v4558_v40 = vpop.f32.mrb[37].mxu0 }
 0x44e   : > { %v2495_v52 = vpop.f32.mrb[17].mxu1  ;;  %v4559_v53 = vadd.f32 %v4558_v40, %v4557_v48  ;;  %v4560_v36 = vpop.f32.mrb[38].mxu0 }
 0x44f   : > { %v2496_v56 = vadd.f32 %v2495_v52, %v2431_v49  ;;  %v4782_v27 = vpop.f32.mrb[18].mxu1  ;;  %v4561_v50 = vpop.f32.mrb[39].mxu0  ;;  %v2658_v52 = vmul.f32 1.442695, %v2648_v63 }
 0x450   : > { %v2498_v2 = vpop.f32.mrb[19].mxu1  ;;  %v2439_v15 = vadd.f32 %v4559_v53, %v6495_v26  ;;  %v4562_v22 = vadd.f32 %v4561_v50, %v4560_v36  ;;  %v2621_v49 = vpop.permute.xlu1 %2620  ;;  %v2650_v36 = vmin.f32 %v6520_v35, 0.0 }
 0x451   : > { %v2526_v21 = vsub.f32 0.0, %v2496_v56  ;;  %v2499_v55 = vadd.f32 %v2498_v2, %v2434_v54  ;;  %v2619_v56 = vpop.permute.xlu0 %2618  ;;  %v5213_v53 = vpop.eup %5212  ;;  %v6527_v8 = vsel %vm918_vm1, %v6342_v11, %v2621_v49 }
 0x452   : > { %v2504_v58 = vadd.f32 %v4781_v3, %v2439_v15  ;;  %v2442_v38 = vadd.f32 %v4562_v22, %v6495_v26  ;;  %v5215_v10 = vpop.eup %5214  ;;  %v6533_v15 = vsel %vm918_vm1, %v6340_v45, %v2619_v56  ;;  %v2662_v28 = vmul.f32 1.442695, %v2650_v36  ;;  %v5138_v36 = vld [vmem:[%s5688_s14 + $0x68] sm:$0xff]  }
 0x453   : > { %v2534_v60 = vmul.f32 1.442695, %v2526_v21  ;;  %v2527_v34 = vsub.f32 0.0, %v2499_v55  ;;  %vm2645_vm0 = vcmp.gt.f32.partialorder %v6527_v8, 0.0  ;;  %vm2644_vm3 = vcmp.gt.f32.partialorder %v6533_v15, 0.0 }
 0x454   : > { %v2528_v44 = vsub.f32 0.0, %v2504_v58  ;;  %v2507_v14 = vadd.f32 %v4782_v27, %v2442_v38  ;;  %v4563_v16 = vpop.f32.mrb[40].mxu0  ;;  %v2664_v27 = vmul.f32 1.442695, %v2651_v46  ;;  %v2653_v58 = vmin.f32 %v6527_v8, 0.0 }
 0x455   : > { %5216 = vpow2.f32 %v2534_v60  ;;  %v2536_v47 = vmul.f32 1.442695, %v2527_v34  ;;  %v4785_v43 = vpop.f32.mrb[20].mxu1  ;;  %v4564_v13 = vpop.f32.mrb[41].mxu0  ;;  %v4332_v38 = vadd.f32 -1.0, %v5213_v53 }
 0x456   : > { %v2511_v0 = vpop.f32.mrb[21].mxu1  ;;  %v2538_v39 = vmul.f32 1.442695, %v2528_v44  ;;  %v2529_v18 = vsub.f32 0.0, %v2507_v14  ;;  %v4565_v20 = vadd.f32 %v4564_v13, %v4563_v16  ;;  %v4566_v41 = vpop.f32.mrb[42].mxu0  ;;  %v2652_v13 = vmin.f32 %v6533_v15, 0.0 }
 0x457   : > { %5218 = vpow2.f32 %v2536_v47  ;;  %v4786_v29 = vpop.f32.mrb[22].mxu1  ;;  %v4567_v9 = vpop.f32.mrb[43].mxu0 }
 0x458   : > { %v2514_v30 = vpop.f32.mrb[23].mxu1  ;;  %5220 = vpow2.f32 %v2538_v39  ;;  %v2540_v31 = vmul.f32 1.442695, %v2529_v18  ;;  %v2447_v3 = vadd.f32 %v4565_v20, %v6495_v26  ;;  %v4568_v48 = vadd.f32 %v4567_v9, %v4566_v41 }
 0x459   : > { %v2668_v20 = vmul.f32 1.442695, %v2653_v58  ;;  %v2679_v9 = vsel %vm2639_vm9, %v6484_v6, %v4332_v38 }
 0x45a   : > { %5222 = vpow2.f32 %v2540_v31  ;;  %v2512_v40 = vadd.f32 %v2511_v0, %v2447_v3  ;;  %v2450_v57 = vadd.f32 %v4568_v48, %v6495_v26  ;;  %v4331_v0 = vadd.f32 -1.0, %v5215_v10 }
 0x45b   : > { %5224 = vpow2.f32 %v2660_v32  ;;  %v2666_v3 = vmul.f32 1.442695, %v2652_v13  ;;  %v5141_v13 = vld [vmem:[%s5688_s14 + $0x30] sm:$0xff]  }
 0x45c   : > { %v2530_v54 = vsub.f32 0.0, %v2512_v40  ;;  %v2515_v2 = vadd.f32 %v2514_v30, %v2450_v57  ;;  %v4569_v50 = vpop.f32.mrb[44].mxu0  ;;  %5226 = vpow2.f32 %v2658_v52  ;;  %v2695_v40 = vrot.slane %v2679_v9, 7  ;;  %v5137_v57 = vld [vmem:[%s5688_s14 + $0x20] sm:$0xff]  }
 0x45d   : > { %v4570_v21 = vpop.f32.mrb[45].mxu0  ;;  %5228 = vpow2.f32 %v2664_v27  ;;  %4596 = vmatpush3.bf16.msra.mxu0 %v5137_v57 }
 0x45e   : > { %v2542_v22 = vmul.f32 1.442695, %v2530_v54  ;;  %v2531_v4 = vsub.f32 0.0, %v2515_v2  ;;  %v4571_v11 = vadd.f32 %v4570_v21, %v4569_v50  ;;  %v4572_v60 = vpop.f32.mrb[46].mxu0  ;;  %v6550_v2 = vsel %vm1002_vm2, 0.0, %v2695_v40  ;;  %v5139_v21 = vld [vmem:[%s5688_s14 + $0x28] sm:$0xff]   ;;  %4597 = vmatprep.subr.bf16.mxu0 %v5138_v36 }
 0x45f   : > { %v5217_v55 = vpop.eup %5216  ;;  %v4573_v42 = vpop.f32.mrb[47].mxu0 }
 0x460   : > { %v2550_v34 = vadd.f32 1.0, %v5217_v55  ;;  %5230 = vpow2.f32 %v2542_v22  ;;  %v2544_v47 = vmul.f32 1.442695, %v2531_v4  ;;  %v2455_v14 = vadd.f32 %v4571_v11, %v6495_v26 }
 0x461   : > { %v5219_v44 = vpop.eup %5218  ;;  %v4574_v16 = vadd.f32 %v4573_v42, %v4572_v60  ;;  %v2731_v11 = vrot.slane %v2695_v40, 1  ;;  %v5324_v60 = vld [vmem:[#allocation2] sm:$0xff]  ;;  %4598 = vmatpush3.bf16.msra.mxu0 %v5139_v21  ;;  %v2730_v42 = vrot.slane %v6550_v2, 1 }
 0x462   : > { %5232 = vrcp.f32 %v2550_v34  ;;  %v2551_v45 = vadd.f32 1.0, %v5219_v44  ;;  %v5221_v63 = vpop.eup %5220  ;;  %v2520_v39 = vadd.f32 %v4785_v43, %v2455_v14  ;;  %v2678_v43 = vsel %vm2638_vm10, %v6488_v33, %v4331_v0  ;;  %v5140_v44 = vld [vmem:[%s5688_s14 + $0x70] sm:$0xff]   ;;  %v5143_v40 = vld [vmem:[%s5702_s30] sm:$0xff]  }
 0x463   : > { %5234 = vpow2.f32 %v2544_v47  ;;  %v2458_v18 = vadd.f32 %v4574_v16, %v6495_v26  ;;  %v2552_v41 = vadd.f32 1.0, %v5221_v63  ;;  %v2694_v6 = vrot.slane %v2678_v43, 7  ;;  %4599 = vmatprep.subr.bf16.mxu0 %v5140_v44  ;;  %v5142_v43 = vld [vmem:[%s5688_s14 + $0x78] sm:$0xff]   ;;  %4787 = vmatprep.subr.bf16.mxu1 %v5143_v40 }
 0x464   : > { %5236 = vrcp.f32 %v2551_v45  ;;  %v5223_v30 = vpop.eup %5222  ;;  %v2532_v32 = vsub.f32 0.0, %v2520_v39  ;;  %4788 = vmatpush3.bf16.msra.mxu1 %v5143_v40 }
 0x465   : > { %v2523_v46 = vadd.f32 %v4786_v29, %v2458_v18  ;;  %5238 = vpow2.f32 %v2662_v28  ;;  %v2553_v31 = vadd.f32 1.0, %v5223_v30  ;;  %v5225_v26 = vpop.eup %5224  ;;  %v6553_v50 = vsel %vm1002_vm2, 0.0, %v2694_v6  ;;  %4600 = vmatpush3.bf16.msra.mxu0 %v5141_v13 }
 0x466   : > { %5240 = vrcp.f32 %v2552_v41  ;;  %v2546_v48 = vmul.f32 1.442695, %v2532_v32  ;;  %v5227_v52 = vpop.eup %5226  ;;  %v2728_v28 = vrot.slane %v2694_v6, 1  ;;  %v4334_v14 = vadd.f32 -1.0, %v5225_v26  ;;  %v5144_v6 = vld [vmem:[%s5688_s14 + $0x38] sm:$0xff]   ;;  %4601 = vmatprep.subr.bf16.mxu0 %v5142_v43 }
 0x467   : > { %v2533_v49 = vsub.f32 0.0, %v2523_v46  ;;  %5242 = vpow2.f32 %v2668_v20  ;;  %v6546_v56 = vpop.eup %5228  ;;  %v4333_v18 = vadd.f32 -1.0, %v5227_v52  ;;  %v2725_v52 = vrot.slane %v5843_v17, 1 }
 0x468   : > { %5244 = vrcp.f32 %v2553_v31  ;;  %v2732_v31 = vsel %vm1037_vm6, %v2730_v42, %v2731_v11  ;;  %v6591_v26 = vsel %vm2641_vm11, %v6503_v12, %v4334_v14 }
 0x469   : > { %5246 = vpow2.f32 %v2546_v48  ;;  %v2548_v29 = vmul.f32 1.442695, %v2533_v49  ;;  %v5327_v48 = vld [vmem:[#allocation2 + $0x18] sm:$0xff]  ;;  %4602 = vmatpush3.bf16.msra.mxu0 %v5144_v6  ;;  %v2697_v36 = vrot.slane %v6591_v26, 7  ;;  %v2726_v11 = vsel %vm1037_vm6, %v1038_v37, %v2725_v52 }
 0x46a   : > { %5248 = vpow2.f32 %v2666_v3  ;;  %v5231_v53 = vpop.eup %5230  ;;  %v5331_v52 = vld [vmem:[#allocation2 + $0x38] sm:$0xff] }
 0x46b   : > { %5250 = vpow2.f32 %v2548_v29  ;;  %v2554_v27 = vadd.f32 1.0, %v5231_v53  ;;  %v4336_v29 = vadd.f32 -1.0, %v6546_v56  ;;  %v2680_v53 = vsel %vm2640_vm12, %v6508_v7, %v4333_v18 }
 0x46c   : > { %v5233_v33 = vpop.eup %5232 }
 0x46d   : > { %v5235_v54 = vpop.eup %5234  ;;  %v2566_v10 = vmul.f32 %v5233_v33, %v6466_v51  ;;  %5252 = vrcp.f32 %v2554_v27  ;;  %v2727_v51 = vrot.slane %v6553_v50, 1 }
 0x46e   : > { %v5237_v55 = vpop.eup %5236  ;;  %v2555_v22 = vadd.f32 1.0, %v5235_v54 }
 0x46f   : > { %v5239_v4 = vpop.eup %5238  ;;  %v6557_v58 = vadd.f32 %v5324_v60, %v2566_v10  ;;  %v2567_v34 = vmul.f32 %v5237_v55, %v6468_v1  ;;  %v5325_v1 = vld [vmem:[#allocation2 + $0x8] sm:$0xff]  ;;  %v2729_v46 = vsel %vm1037_vm6, %v2727_v51, %v2728_v28  ;;  %v2696_v55 = vrot.slane %v2680_v53, 7 }
 0x470   : > { %v5241_v38 = vpop.eup %5240  ;;  %5254 = vrcp.f32 %v2555_v22  ;;  %v4335_v57 = vadd.f32 -1.0, %v5239_v4  ;;  %v5016_v27 = vpack.i.bf16 %v2732_v31, %v2729_v46  ;;  %v5145_v10 = vld [vmem:[%s5702_s30 + $0x8] sm:$0xff]   ;;  %v2683_v22 = vsel %vm2643_vm14, %v6514_v61, %v4336_v29  ;;  %v5330_v46 = vld [vmem:[#allocation2 + $0x30] sm:$0xff] }
 0x471   : > { %v5243_v47 = vpop.eup %5242  ;;  %v2996_v16 = vsub.f32 0.0, %v6557_v58  ;;  %3876 = vst.msk [vmem:[#allocation2] sm:$0xff] %vm918_vm1, %v6557_v58  ;;  %3892 = vst.msk [vmem:[%s5722_s7] sm:$0xff] %vm918_vm1, %v6557_v58  ;;  %v6569_v45 = vadd.f32 %v5325_v1, %v2567_v34  ;;  %v2568_v0 = vmul.f32 %v5241_v38, %v6470_v5  ;;  %v5326_v5 = vld [vmem:[#allocation2 + $0x10] sm:$0xff]  ;;  %4789 = vmatprep.subr.bf16.mxu1 %v5145_v10  ;;  %v2699_v42 = vrot.slane %v2683_v22, 7 }
 0x472   : > { %v5245_v63 = vpop.eup %5244  ;;  %v4338_v33 = vadd.f32 -1.0, %v5243_v47  ;;  %v2682_v4 = vsel %vm2642_vm15, %v6520_v35, %v4335_v57  ;;  %4790 = vmatpush3.bf16.msra.mxu1 %v5145_v10  ;;  %v6640_v35 = vsel %vm1002_vm2, 0.0, %v2697_v36  ;;  %v2734_v13 = vrot.slane %v2696_v55, 1 }
 0x473   : > { %v5247_v39 = vpop.eup %5246  ;;  %3012 = vrot.lane.b32.xlu0 %v2996_v16, %s5468_s5  ;;  %v2997_v20 = vsub.f32 0.0, %v6569_v45  ;;  %3877 = vst.msk [vmem:[#allocation2 + $0x8] sm:$0xff] %vm918_vm1, %v6569_v45  ;;  %3893 = vst.msk [vmem:[%s5722_s7 + $0x8] sm:$0xff] %vm918_vm1, %v6569_v45  ;;  %v6581_v41 = vadd.f32 %v5326_v5, %v2568_v0  ;;  %v2569_v30 = vmul.f32 %v5245_v63, %v6472_v19  ;;  %v2698_v37 = vrot.slane %v2682_v4, 7  ;;  %v5147_v5 = vld [vmem:[%s5702_s30 + $0x18] sm:$0xff]  }
 0x474   : > { %v5249_v9 = vpop.eup %5248  ;;  %v2556_v32 = vadd.f32 1.0, %v5247_v39  ;;  %v2685_v61 = vsel %vm2645_vm0, %v6527_v8, %v4338_v33  ;;  %v5146_v8 = vld [vmem:[%s5702_s30 + $0x10] sm:$0xff]   ;;  %v2736_v1 = vrot.slane %v6640_v35, 1  ;;  %v2737_v0 = vrot.slane %v2697_v36, 1  ;;  %s5340_s30 = scalar_lea.vmem %s6985_s28, 1024 }
 0x475   : > { %v5251_v3 = vpop.eup %5250  ;;  %3014 = vrot.lane.b32.xlu1 %v2997_v20, %s5468_s5  ;;  %v2998_v19 = vsub.f32 0.0, %v6581_v41  ;;  %3878 = vst.msk [vmem:[#allocation2 + $0x10] sm:$0xff] %vm918_vm1, %v6581_v41  ;;  %3894 = vst.msk [vmem:[%s5722_s7 + $0x10] sm:$0xff] %vm918_vm1, %v6581_v41  ;;  %v6600_v49 = vadd.f32 %v5327_v48, %v2569_v30  ;;  %v4337_v7 = vadd.f32 -1.0, %v5249_v9  ;;  %v2701_v28 = vrot.slane %v2685_v61, 7  ;;  %4791 = vmatprep.subr.bf16.mxu1 %v5146_v8  ;;  %p5341_p1 = scmp.ne.s32.totalorder %s6985_s28, %s5340_s30 }
 0x476   : > { %5256 = vrcp.f32 %v2556_v32  ;;  %v2557_v12 = vadd.f32 1.0, %v5251_v3  ;;  %4792 = vmatpush3.bf16.msra.mxu1 %v5146_v8  ;;  %v6664_v39 = vsel %vm1002_vm2, 0.0, %v2699_v42  ;;  %v6667_v18 = vsel %vm1002_vm2, 0.0, %v2698_v37 }
 0x477   : > { %3016 = vrot.lane.b32.xlu0 %v2998_v19, %s5468_s5  ;;  %v2999_v17 = vsub.f32 0.0, %v6600_v49  ;;  %3879 = vst.msk [vmem:[#allocation2 + $0x18] sm:$0xff] %vm918_vm1, %v6600_v49  ;;  %3895 = vst.msk [vmem:[%s5722_s7 + $0x18] sm:$0xff] %vm918_vm1, %v6600_v49  ;;  %v5253_v56 = vpop.eup %5252  ;;  %v2684_v38 = vsel %vm2644_vm3, %v6533_v15, %v4337_v7  ;;  %v6652_v15 = vsel %vm1002_vm2, 0.0, %v2696_v55  ;;  %v6674_v9 = vsel %vm1002_vm2, 0.0, %v2701_v28  ;;  %4793 = vmatprep.subr.bf16.mxu1 %v5147_v5  ;;  %p5342_p2 = pnand %p5341_p1, %p5616_p3 }
 0x478   : > { %5258 = vrcp.f32 %v2557_v12  ;;  %v2570_v54 = vmul.f32 %v5253_v56, %v6474_v24  ;;  %v5328_v24 = vld [vmem:[#allocation2 + $0x20] sm:$0xff]  ;;  %v2700_v44 = vrot.slane %v2684_v38, 7  ;;  %v2733_v63 = vrot.slane %v6652_v15, 1 }
 0x479   : > { %3018 = vrot.lane.b32.xlu1 %v2999_v17, %s5468_s5  ;;  %v2742_v3 = vrot.slane %v6664_v39, 1  ;;  %v2743_v26 = vrot.slane %v2699_v42, 1  ;;  %v2740_v19 = vrot.slane %v2698_v37, 1  ;;  %v2738_v6 = vsel %vm1037_vm6, %v2736_v1, %v2737_v0  ;;  %p5343_p4 = pneg %p5342_p2 }
 0x47a   : > { %v5255_v21 = vpop.eup %5254  ;;  %v6634_v60 = vadd.f32 %v5328_v24, %v2570_v54  ;;  %v6677_v32 = vsel %vm1002_vm2, 0.0, %v2700_v44  ;;  %4794 = vmatpush3.bf16.msra.mxu1 %v5147_v5  ;;  %v2749_v12 = vrot.slane %v6674_v9, 1  ;;  %v2750_v29 = vrot.slane %v2701_v28, 1 }
 0x47b   : > { %5017 = vrot.lane.b32.xlu0 %v5016_v27, %s5470_s8  ;;  %v2571_v34 = vmul.f32 %v5255_v21, %v6476_v23  ;;  %v5329_v23 = vld [vmem:[#allocation2 + $0x28] sm:$0xff]  ;;  %v2745_v57 = vrot.slane %v6677_v32, 1  ;;  %v2746_v53 = vrot.slane %v2700_v44, 1  ;;  %v2744_v33 = vsel %vm1037_vm6, %v2742_v3, %v2743_v26 }
 0x47c   : > { %3880 = vst.msk [vmem:[#allocation2 + $0x20] sm:$0xff] %vm918_vm1, %v6634_v60  ;;  %3896 = vst.msk [vmem:[%s5722_s7 + $0x20] sm:$0xff] %vm918_vm1, %v6634_v60  ;;  %v3000_v47 = vsub.f32 0.0, %v6634_v60  ;;  %v2751_v36 = vsel %vm1037_vm6, %v2749_v12, %v2750_v29 }
 0x47d   : > { %2752 = vrot.lane.b32.xlu1 %v2726_v11, %s5470_s8  ;;  %v6648_v51 = vadd.f32 %v5329_v23, %v2571_v34  ;;  %v2747_v27 = vsel %vm1037_vm6, %v2745_v57, %v2746_v53 }
 0x47e   : > { %v5031_v10 = vpack.i.bf16 %v2751_v36, %v2747_v27 }
 0x47f   : > { %v3001_v14 = vsub.f32 0.0, %v6648_v51  ;;  %3881 = vst.msk [vmem:[#allocation2 + $0x28] sm:$0xff] %vm918_vm1, %v6648_v51  ;;  %3897 = vst.msk [vmem:[%s5722_s7 + $0x28] sm:$0xff] %vm918_vm1, %v6648_v51 }
 0x480   : > { %v5257_v16 = vpop.eup %5256 }
 0x481   : > { %3020 = vrot.lane.b32.xlu1 %v3000_v47, %s5468_s5  ;;  %3022 = vrot.lane.b32.xlu0 %v3001_v14, %s5468_s5  ;;  %v2572_v20 = vmul.f32 %v5257_v16, %v6478_v59  ;;  %v2739_v59 = vrot.slane %v6667_v18, 1 }
 0x482   : > { %v5259_v30 = vpop.eup %5258 }
 0x483   : > { %v6679_v31 = vadd.f32 %v5330_v46, %v2572_v20  ;;  %v2573_v43 = vmul.f32 %v5259_v30, %v6480_v62  ;;  %v2735_v62 = vsel %vm1037_vm6, %v2733_v63, %v2734_v13  ;;  %v2741_v56 = vsel %vm1037_vm6, %v2739_v59, %v2740_v19 }
 0x484   : > { %v5021_v7 = vpack.i.bf16 %v2738_v6, %v2735_v62  ;;  %v5026_v54 = vpack.i.bf16 %v2744_v33, %v2741_v56 }
 0x485   : > { %v3002_v48 = vsub.f32 0.0, %v6679_v31  ;;  %3882 = vst.msk [vmem:[#allocation2 + $0x30] sm:$0xff] %vm918_vm1, %v6679_v31  ;;  %3898 = vst.msk [vmem:[%s5722_s7 + $0x30] sm:$0xff] %vm918_vm1, %v6679_v31  ;;  %v6690_v40 = vadd.f32 %v5331_v52, %v2573_v43 }
 0x487   : > { %3024 = vrot.lane.b32.xlu0 %v3002_v48, %s5468_s5  ;;  %v3003_v17 = vsub.f32 0.0, %v6690_v40  ;;  %3883 = vst.msk [vmem:[#allocation2 + $0x38] sm:$0xff] %vm918_vm1, %v6690_v40  ;;  %3899 = vst.msk [vmem:[%s5722_s7 + $0x38] sm:$0xff] %vm918_vm1, %v6690_v40  ;;  %s5471_s7 = smov [#allocation4]  }
 0x489   : > { %3026 = vrot.lane.b32.xlu1 %v3003_v17, %s5468_s5 }
 0x48b   : > { %5022 = vrot.lane.b32.xlu0 %v5021_v7, %s5470_s8 }
 0x48d   : > { %5027 = vrot.lane.b32.xlu1 %v5026_v54, %s5470_s8 }
 0x48f   : > { %5032 = vrot.lane.b32.xlu0 %v5031_v10, %s5470_s8 }
 0x4e5   : > { %v3013_v21 = vpop.permute.xlu0 %3012 }
 0x4e6   : > { %v3036_v55 = vsel %vm918_vm1, %v6557_v58, %v3013_v21 }
 0x4e7   : > { %v3052_v22 = vmin.f32 %v3036_v55, 0.0  ;;  %v3015_v4 = vpop.permute.xlu1 %3014  ;;  %vm3044_vm4 = vcmp.gt.f32.partialorder %v3036_v55, 0.0 }
 0x4e8   : > { %v3037_v11 = vsel %vm918_vm1, %v6569_v45, %v3015_v4 }
 0x4e9   : > { %v3060_v24 = vmul.f32 1.442695, %v3052_v22  ;;  %v3053_v34 = vmin.f32 %v3037_v11, 0.0  ;;  %v3017_v61 = vpop.permute.xlu0 %3016  ;;  %vm3045_vm5 = vcmp.gt.f32.partialorder %v3037_v11, 0.0 }
 0x4ea   : > { %v3038_v38 = vsel %vm918_vm1, %v6581_v41, %v3017_v61 }
 0x4eb   : > { %5260 = vpow2.f32 %v3060_v24  ;;  %v3062_v42 = vmul.f32 1.442695, %v3053_v34  ;;  %v3054_v37 = vmin.f32 %v3038_v38, 0.0  ;;  %v3019_v23 = vpop.permute.xlu1 %3018  ;;  %vm3046_vm7 = vcmp.gt.f32.partialorder %v3038_v38, 0.0 }
 0x4ec   : > { %v3039_v8 = vsel %vm918_vm1, %v6600_v49, %v3019_v23 }
 0x4ed   : > { %5262 = vpow2.f32 %v3062_v42  ;;  %v3064_v58 = vmul.f32 1.442695, %v3054_v37  ;;  %v3055_v28 = vmin.f32 %v3039_v8, 0.0  ;;  %v5018_v44 = vpop.permute.xlu0 %5017  ;;  %vm3047_vm8 = vcmp.gt.f32.partialorder %v3039_v8, 0.0 }
 0x4ee   : > { %v5020_v47 = vunpack.i.h.bf16 %v5018_v44  ;;  %v5019_v14 = vunpack.i.l.bf16 %v5018_v44 }
 0x4ef   : > { %5264 = vpow2.f32 %v3064_v58  ;;  %v3066_v45 = vmul.f32 1.442695, %v3055_v28  ;;  %v2753_v16 = vpop.permute.xlu1 %2752 }
 0x4f0   : > { %v6721_v1 = vsel %vm1183_vm13, %v5848_v25, %v2753_v16  ;;  %v2780_v41 = vsel %vm1183_vm13, %v6553_v50, %v5019_v14  ;;  %v6727_v0 = vsel %vm1183_vm13, %v6550_v2, %v5020_v47 }
 0x4f1   : > { %5266 = vpow2.f32 %v3066_v45  ;;  %v2788_v49 = vpack.c.bf16 %v2780_v41, %v6721_v1  ;;  %v2789_v13 = vpack.c.bf16 %v6727_v0, %v2780_v41 }
 0x4f3   : > { %v3021_v63 = vpop.permute.xlu1 %3020  ;;  %v3023_v20 = vpop.permute.xlu0 %3022  ;;  %2963 = vmatprep.mubr.bf16.mxu0 %v2789_v13 }
 0x4f4   : > { %v6733_v5 = vsel %vm918_vm1, %v6634_v60, %v3021_v63  ;;  %v6737_v25 = vsel %vm918_vm1, %v6648_v51, %v3023_v20  ;;  %2964 = vmatmul.mubr.bf16.vlgmr.msra.gmra.mrb[48].mxu0 %v2788_v49 }
 0x4f5   : > { %v5261_v50 = vpop.eup %5260  ;;  %v3056_v2 = vmin.f32 %v6733_v5, 0.0  ;;  %v3057_v30 = vmin.f32 %v6737_v25, 0.0  ;;  %vm3048_vm9 = vcmp.gt.f32.partialorder %v6733_v5, 0.0  ;;  %vm3049_vm10 = vcmp.gt.f32.partialorder %v6737_v25, 0.0 }
 0x4f6   : > { %v4356_v46 = vadd.f32 -1.0, %v5261_v50 }
 0x4f7   : > { %v5263_v43 = vpop.eup %5262  ;;  %v3068_v3 = vmul.f32 1.442695, %v3056_v2  ;;  %v3070_v26 = vmul.f32 1.442695, %v3057_v30 }
 0x4f8   : > { %v4357_v59 = vadd.f32 -1.0, %v5263_v43  ;;  %v3084_v48 = vsel %vm3044_vm4, %v3036_v55, %v4356_v46  ;;  %v4339_v43 = vld [vmem:[%s7247_s0] ss:$0 sm:$0xff]  ;;  %s5344_s0 = sshll.u32 %s5471_s7, 4  ;;  %s5345_s0 = int_to_ptr.vmem [resolvable:$false] %s5344_s0 }
 0x4f9   : > { %v5265_v19 = vpop.eup %5264  ;;  %5268 = vpow2.f32 %v3068_v3  ;;  %v3025_v60 = vpop.permute.xlu0 %3024  ;;  %v4364_v3 = vld [vmem:[%s7249_s11] ss:$0 sm:$0xff]  ;;  %s5346_s26 = scalar_lea.vmem %s5345_s0, 2048  ;;  %p5347_p5 = scmp.lt.s32.totalorder %s6985_s28, %s5345_s0 }
 0x4fa   : > { %v3085_v52 = vsel %vm3045_vm5, %v3037_v11, %v4357_v59  ;;  %v4358_v51 = vadd.f32 -1.0, %v5265_v19  ;;  %5270 = vpow2.f32 %v3070_v26  ;;  %v3042_v62 = vsel %vm918_vm1, %v6679_v31, %v3025_v60  ;;  %p5348_p6 = scmp.lt.s32.totalorder %s5346_s26, %s5340_s30 }
 0x4fb   : > { %v5267_v6 = vpop.eup %5266  ;;  %v3092_v12 = vpack.c.bf16 %v3085_v52, %v3084_v48  ;;  %v3058_v29 = vmin.f32 %v3042_v62, 0.0  ;;  %v3027_v57 = vpop.permute.xlu1 %3026  ;;  %vm3050_vm11 = vcmp.gt.f32.partialorder %v3042_v62, 0.0 }
 0x4fc   : > { %v4359_v53 = vadd.f32 -1.0, %v5267_v6  ;;  %v3043_v17 = vsel %vm918_vm1, %v6690_v40, %v3027_v57  ;;  %v3086_v27 = vsel %vm3046_vm7, %v3038_v38, %v4358_v51  ;;  %p5349_p7 = por %p5348_p6, %p5347_p5 }
 0x4fd   : > { %v3072_v56 = vmul.f32 1.442695, %v3058_v29  ;;  %v3059_v33 = vmin.f32 %v3043_v17, 0.0  ;;  %4795 = vmatprep.mubr.msk.bf16.mxu1 %vm1183_vm13, %v3092_v12  ;;  %v5023_v7 = vpop.permute.xlu0 %5022  ;;  %vm3051_vm12 = vcmp.gt.f32.partialorder %v3043_v17, 0.0 }
 0x4fe   : > { %v3087_v36 = vsel %vm3047_vm8, %v3039_v8, %v4359_v53  ;;  %v5025_v54 = vunpack.i.h.bf16 %v5023_v7  ;;  %v5024_v10 = vunpack.i.l.bf16 %v5023_v7  ;;  %p5350_p9 = pnand %p5349_p7, %p5343_p4 }
 0x4ff   : > { %v3093_v31 = vpack.c.bf16 %v3087_v36, %v3086_v27  ;;  %5272 = vpow2.f32 %v3072_v56  ;;  %v3074_v21 = vmul.f32 1.442695, %v3059_v33  ;;  %v5028_v55 = vpop.permute.xlu1 %5027 }
 0x500   : > { %v5030_v22 = vunpack.i.h.bf16 %v5028_v55  ;;  %v5029_v4 = vunpack.i.l.bf16 %v5028_v55  ;;  %v2782_v40 = vsel %vm1183_vm13, %v6652_v15, %v5024_v10  ;;  %v2783_v11 = vsel %vm1183_vm13, %v6640_v35, %v5025_v54 }
 0x501   : > { %5274 = vpow2.f32 %v3074_v21  ;;  %4796 = vmatmul.mubr.msk.bf16.vlgmr.msra.gmra.mrb[24].mxu1 %vm1183_vm13, %v3093_v31  ;;  %v5033_v24 = vpop.permute.xlu0 %5032  ;;  %v2791_v34 = vpack.c.bf16 %v2783_v11, %v2782_v40  ;;  %v2790_v61 = vpack.c.bf16 %v2782_v40, %v6727_v0 }
 0x502   : > { %v2784_v38 = vsel %vm1183_vm13, %v6667_v18, %v5029_v4  ;;  %v2785_v42 = vsel %vm1183_vm13, %v6664_v39, %v5030_v22  ;;  %v5035_v58 = vunpack.i.h.bf16 %v5033_v24  ;;  %v5034_v35 = vunpack.i.l.bf16 %v5033_v24 }
 0x503   : > { %v5269_v37 = vpop.eup %5268  ;;  %2971 = vmatprep.mubr.bf16.mxu0 %v2791_v34  ;;  %v2793_v23 = vpack.c.bf16 %v2785_v42, %v2784_v38  ;;  %v2792_v41 = vpack.c.bf16 %v2784_v38, %v2783_v11 }
 0x504   : > { %v5271_v15 = vpop.eup %5270  ;;  %v4360_v8 = vadd.f32 -1.0, %v5269_v37  ;;  %2972 = vmatmul.mubr.bf16.gmra.mrb[52].mxu0 %v2790_v61  ;;  %v2786_v39 = vsel %vm1183_vm13, %v6677_v32, %v5034_v35  ;;  %v2787_v14 = vsel %vm1183_vm13, %v6674_v9, %v5035_v58 }
 0x505   : > { %v4361_v28 = vadd.f32 -1.0, %v5271_v15  ;;  %2979 = vmatprep.mubr.bf16.mxu0 %v2793_v23  ;;  %v2795_v49 = vpack.c.bf16 %v2787_v14, %v2786_v39  ;;  %v2794_v9 = vpack.c.bf16 %v2786_v39, %v2785_v42 }
 0x506   : > { %v3088_v44 = vsel %vm3048_vm9, %v6733_v5, %v4360_v8 }
 0x507   : > { %v3089_v18 = vsel %vm3049_vm10, %v6737_v25, %v4361_v28 }
 0x508   : > { %v3094_v47 = vpack.c.bf16 %v3089_v18, %v3088_v44 }
 0x509   : > { %v5273_v45 = vpop.eup %5272 }
 0x50a   : > { %v4362_v16 = vadd.f32 -1.0, %v5273_v45  ;;  %4799 = vmatprep.mubr.msk.bf16.mxu1 %vm1183_vm13, %v3094_v47 }
 0x50b   : > { %v5275_v0 = vpop.eup %5274 }
 0x50c   : > { %v4363_v13 = vadd.f32 -1.0, %v5275_v0  ;;  %2980 = vmatmul.mubr.bf16.gmra.mrb[56].mxu0 %v2792_v41  ;;  %v3090_v63 = vsel %vm3050_vm11, %v3042_v62, %v4362_v16 }
 0x50d   : > { %2987 = vmatprep.mubr.bf16.mxu0 %v2795_v49 }
 0x50e   : > { %v3091_v20 = vsel %vm3051_vm12, %v3043_v17, %v4363_v13 }
 0x50f   : > { %v3095_v32 = vpack.c.bf16 %v3091_v20, %v3090_v63 }
 0x511   : > { %4800 = vmatmul.mubr.msk.bf16.gmra.mrb[28].mxu1 %vm1183_vm13, %v3095_v32 }
 0x514   : > { %2988 = vmatmul.mubr.bf16.gmra.mrb[60].mxu0 %v2794_v9 }
 0x5c7   : > { %v4603_v5 = vpop.f32.mrb[48].mxu0 }
 0x5c8   : > { %v4604_v25 = vpop.f32.mrb[49].mxu0 }
 0x5c9   : > { %v4605_v50 = vadd.f32 %v4604_v25, %v4603_v5  ;;  %v4606_v2 = vpop.f32.mrb[50].mxu0 }
 0x5ca   : > { %v4607_v30 = vpop.f32.mrb[51].mxu0 }
 0x5cb   : > { %v4608_v46 = vadd.f32 %v4607_v30, %v4606_v2  ;;  %v2966_v19 = vadd.f32 %v4605_v50, %v4339_v43  ;;  %v5148_v2 = vld [vmem:[%s5707_s23 + $0x40] sm:$0xff]  }
 0x5cc   : > { %v5149_v30 = vld [vmem:[%s5707_s23] sm:$0xff]   ;;  %4635 = vmatprep.subr.bf16.mxu1 %v5148_v2 }
 0x5cd   : > { %v2969_v62 = vadd.f32 %v4608_v46, %v4339_v43  ;;  %v6811_v46 = vld [vmem:[%s5712_s17 + $0x40] sm:$0xff]   ;;  %4636 = vmatpush3.bf16.msra.mxu1 %v5149_v30 }
 0x5ce   : > { %4675 = vmatprep.subr.bf16.mxu0 %v6811_v46 }
 0x5d4   : > { %v4797_v26 = vpop.f32.mrb[24].mxu1 }
 0x5d5   : > { %v3181_v59 = vpop.f32.mrb[25].mxu1  ;;  %v3190_v7 = vadd.f32 %v4797_v26, %v4364_v3  ;;  %v6819_v26 = vld [vmem:[%s5712_s17 + $0x48] sm:$0xff]  }
 0x5d6   : > { %v3182_v48 = vadd.f32 %v4364_v3, %v3181_v59  ;;  %v4798_v60 = vpop.f32.mrb[26].mxu1  ;;  %v5153_v59 = vld [vmem:[%s5707_s23 + $0x8] sm:$0xff]  }
 0x5d7   : > { %v4609_v52 = vpop.f32.mrb[52].mxu0  ;;  %v3184_v51 = vpop.f32.mrb[27].mxu1  ;;  %v3193_v10 = vadd.f32 %v4798_v60, %v4364_v3  ;;  %v6829_v60 = vld [vmem:[%s5712_s17 + $0x50] sm:$0xff]  }
 0x5d8   : > { %v6776_v6 = vadd.f32 %v3182_v48, %v2966_v19  ;;  %v3185_v12 = vadd.f32 %v4364_v3, %v3184_v51  ;;  %v4610_v29 = vpop.f32.mrb[53].mxu0  ;;  %v6824_v19 = vld [vmem:[%s5712_s17 + $0x8] sm:$0xff]   ;;  %v5156_v48 = vld [vmem:[%s5707_s23 + $0x50] sm:$0xff]  }
 0x5d9   : > { %v4611_v57 = vadd.f32 %v4610_v29, %v4609_v52  ;;  %v4612_v53 = vpop.f32.mrb[54].mxu0  ;;  %v5157_v52 = vld [vmem:[%s5707_s23 + $0x10] sm:$0xff]   ;;  %v5161_v29 = vld [vmem:[%s5707_s23 + $0x18] sm:$0xff]  }
 0x5da   : > { %v6778_v17 = vadd.f32 %v3185_v12, %v2969_v62  ;;  %v4613_v56 = vpop.f32.mrb[55].mxu0  ;;  %v3220_v33 = vsub.f32 0.0, %v6776_v6  ;;  %v6834_v51 = vld [vmem:[%s5712_s17 + $0x10] sm:$0xff]   ;;  %v5160_v62 = vld [vmem:[%s5707_s23 + $0x58] sm:$0xff]  }
 0x5db   : > { %v2974_v27 = vadd.f32 %v4611_v57, %v4339_v43  ;;  %v4614_v36 = vadd.f32 %v4613_v56, %v4612_v53  ;;  %v6839_v12 = vld [vmem:[%s5712_s17 + $0x58] sm:$0xff]   ;;  %v5164_v53 = vld [vmem:[%s5707_s23 + $0x60] sm:$0xff]  }
 0x5dc   : > { %3236 = vrot.lane.b32.xlu1 %v3220_v33, %s5468_s5  ;;  %v3221_v54 = vsub.f32 0.0, %v6778_v17  ;;  %v6844_v57 = vld [vmem:[%s5712_s17 + $0x18] sm:$0xff]   ;;  %v6849_v56 = vld [vmem:[%s5712_s17 + $0x60] sm:$0xff]  }
 0x5dd   : > { %v6783_v31 = vadd.f32 %v3190_v7, %v2974_v27  ;;  %v2977_v21 = vadd.f32 %v4614_v36, %v4339_v43  ;;  %v5165_v33 = vld [vmem:[%s5707_s23 + $0x20] sm:$0xff]   ;;  %v5168_v27 = vld [vmem:[%s5707_s23 + $0x68] sm:$0xff]  }
 0x5de   : > { %3238 = vrot.lane.b32.xlu0 %v3221_v54, %s5468_s5  ;;  %v6854_v7 = vld [vmem:[%s5712_s17 + $0x20] sm:$0xff]   ;;  %v6859_v36 = vld [vmem:[%s5712_s17 + $0x68] sm:$0xff]  }
 0x5df   : > { %v6786_v55 = vadd.f32 %v3193_v10, %v2977_v21  ;;  %v4615_v22 = vpop.f32.mrb[56].mxu0  ;;  %v3222_v4 = vsub.f32 0.0, %v6783_v31  ;;  %v5169_v54 = vld [vmem:[%s5707_s23 + $0x28] sm:$0xff]   ;;  %v5172_v21 = vld [vmem:[%s5707_s23 + $0x70] sm:$0xff]  }
 0x5e0   : > { %v4616_v40 = vpop.f32.mrb[57].mxu0  ;;  %v6864_v10 = vld [vmem:[%s5712_s17 + $0x28] sm:$0xff]  }
 0x5e1   : > { %v4617_v11 = vadd.f32 %v4616_v40, %v4615_v22  ;;  %v4618_v24 = vpop.f32.mrb[58].mxu0  ;;  %3240 = vrot.lane.b32.xlu1 %v3222_v4, %s5468_s5  ;;  %v3223_v34 = vsub.f32 0.0, %v6786_v55  ;;  %v6869_v22 = vld [vmem:[%s5712_s17 + $0x70] sm:$0xff]  }
 0x5e2   : > { %v4619_v61 = vpop.f32.mrb[59].mxu0  ;;  %v5173_v4 = vld [vmem:[%s5707_s23 + $0x30] sm:$0xff]  }
 0x5e3   : > { %v4620_v38 = vadd.f32 %v4619_v61, %v4618_v24  ;;  %3242 = vrot.lane.b32.xlu0 %v3223_v34, %s5468_s5  ;;  %v2982_v23 = vadd.f32 %v4617_v11, %v4339_v43  ;;  %v6874_v40 = vld [vmem:[%s5712_s17 + $0x30] sm:$0xff]  }
 0x5e4   : > { %v4801_v42 = vpop.f32.mrb[28].mxu1 }
 0x5e5   : > { %v3197_v37 = vpop.f32.mrb[29].mxu1  ;;  %v2985_v28 = vadd.f32 %v4620_v38, %v4339_v43  ;;  %v3206_v0 = vadd.f32 %v4801_v42, %v4364_v3 }
 0x5e6   : > { %v3198_v15 = vadd.f32 %v4364_v3, %v3197_v37  ;;  %v4802_v8 = vpop.f32.mrb[30].mxu1 }
 0x5e7   : > { %v4621_v58 = vpop.f32.mrb[60].mxu0  ;;  %v3200_v35 = vpop.f32.mrb[31].mxu1  ;;  %v3209_v20 = vadd.f32 %v4802_v8, %v4364_v3 }
 0x5e8   : > { %v6792_v44 = vadd.f32 %v3198_v15, %v2982_v23  ;;  %v3201_v18 = vadd.f32 %v4364_v3, %v3200_v35  ;;  %v4622_v47 = vpop.f32.mrb[61].mxu0  ;;  %v5152_v3 = vld [vmem:[%s5707_s23 + $0x48] sm:$0xff]  }
 0x5e9   : > { %v4623_v39 = vadd.f32 %v4622_v47, %v4621_v58  ;;  %v4624_v14 = vpop.f32.mrb[62].mxu0  ;;  %4637 = vmatprep.subr.bf16.mxu1 %v5152_v3 }
 0x5ea   : > { %v6794_v45 = vadd.f32 %v3201_v18, %v2985_v28  ;;  %v4625_v16 = vpop.f32.mrb[63].mxu0  ;;  %v3224_v41 = vsub.f32 0.0, %v6792_v44  ;;  %4638 = vmatpush3.bf16.msra.mxu1 %v5153_v59 }
 0x5eb   : > { %v2990_v49 = vadd.f32 %v4623_v39, %v4339_v43  ;;  %v4626_v13 = vadd.f32 %v4625_v16, %v4624_v14  ;;  %4639 = vmatprep.subr.bf16.mxu1 %v5156_v48 }
 0x5ec   : > { %3244 = vrot.lane.b32.xlu1 %v3224_v41, %s5468_s5  ;;  %v3225_v63 = vsub.f32 0.0, %v6794_v45 }
 0x5ed   : > { %v6799_v32 = vadd.f32 %v3206_v0, %v2990_v49  ;;  %v2993_v9 = vadd.f32 %v4626_v13, %v4339_v43  ;;  %v6814_v43 = vld [vmem:[%s5712_s17] sm:$0xff]   ;;  %v5177_v49 = vld [vmem:[%s5707_s23 + $0x38] sm:$0xff]  }
 0x5ee   : > { %3246 = vrot.lane.b32.xlu0 %v3225_v63, %s5468_s5  ;;  %4676 = vmatpush3.bf16.msra.mxu0 %v6814_v43  ;;  %v6894_v13 = vld [vmem:[%s5712_s17 + $0x78] sm:$0xff]  }
 0x5ef   : > { %v6802_v5 = vadd.f32 %v3209_v20, %v2993_v9  ;;  %v3226_v25 = vsub.f32 0.0, %v6799_v32  ;;  %4677 = vmatprep.subr.bf16.mxu0 %v6819_v26  ;;  %4640 = vmatpush3.bf16.msra.mxu1 %v5157_v52 }
 0x5f0   : > { %4641 = vmatprep.subr.bf16.mxu1 %v5160_v62 }
 0x5f1   : > { %3248 = vrot.lane.b32.xlu1 %v3226_v25, %s5468_s5  ;;  %v3227_v50 = vsub.f32 0.0, %v6802_v5  ;;  %v6901_v25 = vld [vmem:[%s5712_s17 + $0x38] sm:$0xff]   ;;  %s7251_s17 = sld [smem:[#allocation13_spill]] }
 0x5f2   : > { %4678 = vmatpush3.bf16.msra.mxu0 %v6824_v19 }
 0x5f3   : > { %3250 = vrot.lane.b32.xlu0 %v3227_v50, %s5468_s5  ;;  %4679 = vmatprep.subr.bf16.mxu0 %v6829_v60  ;;  %s7252_s5 = sld [smem:[#allocation23_spill]] }
 0x5f4   : > { %4642 = vmatpush3.bf16.msra.mxu1 %v5161_v29 }
 0x5f5   : > { %4643 = vmatprep.subr.bf16.mxu1 %v5164_v53 }
 0x5f6   : > { %4680 = vmatpush3.bf16.msra.mxu0 %v6834_v51 }
 0x5f7   : > { %4681 = vmatprep.subr.bf16.mxu0 %v6839_v12  ;;  %s4418_s29 = sshll.u32 %s7251_s17, 4 }
 0x5f8   : > { %4644 = vmatpush3.bf16.msra.mxu1 %v5165_v33 }
 0x5f9   : > { %4645 = vmatprep.subr.bf16.mxu1 %v5168_v27  ;;  %s3909_s14 = scalar_lea.sflag [#allocation5], %s7252_s5 }
 0x5fa   : > { %4682 = vmatpush3.bf16.msra.mxu0 %v6844_v57 }
 0x5fb   : > { %4683 = vmatprep.subr.bf16.mxu0 %v6849_v56 }
 0x5fc   : > { %4646 = vmatpush3.bf16.msra.mxu1 %v5169_v54 }
 0x5fd   : > { %4647 = vmatprep.subr.bf16.mxu1 %v5172_v21 }
 0x5fe   : > { %4684 = vmatpush3.bf16.msra.mxu0 %v6854_v7 }
 0x5ff   : > { %4685 = vmatprep.subr.bf16.mxu0 %v6859_v36 }
 0x600   : > { %4648 = vmatpush3.bf16.msra.mxu1 %v5173_v4 }
 0x602   : > { %4686 = vmatpush3.bf16.msra.mxu0 %v6864_v10 }
 0x603   : > { %4687 = vmatprep.subr.bf16.mxu0 %v6869_v22 }
 0x606   : > { %4688 = vmatpush3.bf16.msra.mxu0 %v6874_v40 }
 0x607   : > { %4689 = vmatprep.subr.bf16.mxu0 %v6894_v13 }
 0x60a   : > { %4690 = vmatpush3.bf16.msra.mxu0 %v6901_v25 }
 0x64e   : > { %v3237_v11 = vpop.permute.xlu1 %3236 }
 0x64f   : > { %v3260_v24 = vsel %vm918_vm1, %v6776_v6, %v3237_v11 }
 0x650   : > { %v3276_v34 = vmin.f32 %v3260_v24, 0.0  ;;  %v3239_v61 = vpop.permute.xlu0 %3238  ;;  %vm3268_vm14 = vcmp.gt.f32.partialorder %v3260_v24, 0.0 }
 0x651   : > { %v3261_v38 = vsel %vm918_vm1, %v6778_v17, %v3239_v61 }
 0x652   : > { %v3284_v42 = vmul.f32 1.442695, %v3276_v34  ;;  %v3277_v37 = vmin.f32 %v3261_v38, 0.0  ;;  %vm3269_vm15 = vcmp.gt.f32.partialorder %v3261_v38, 0.0 }
 0x653   : > { %v3241_v23 = vpop.permute.xlu1 %3240 }
 0x654   : > { %5276 = vpow2.f32 %v3284_v42  ;;  %v3286_v15 = vmul.f32 1.442695, %v3277_v37  ;;  %v3262_v8 = vsel %vm918_vm1, %v6783_v31, %v3241_v23 }
 0x655   : > { %v3278_v58 = vmin.f32 %v3262_v8, 0.0  ;;  %v3243_v35 = vpop.permute.xlu0 %3242  ;;  %vm3270_vm0 = vcmp.gt.f32.partialorder %v3262_v8, 0.0 }
 0x656   : > { %5278 = vpow2.f32 %v3286_v15  ;;  %v3263_v6 = vsel %vm918_vm1, %v6786_v55, %v3243_v35  ;;  %v5176_v55 = vld [vmem:[%s5707_s23 + $0x78] sm:$0xff]   ;;  %s7250_s23 = sld [smem:[#allocation14_spill]] }
 0x657   : > { %v3288_v28 = vmul.f32 1.442695, %v3278_v58  ;;  %v3279_v18 = vmin.f32 %v3263_v6, 0.0  ;;  %4649 = vmatprep.subr.bf16.mxu1 %v5176_v55  ;;  %vm3271_vm3 = vcmp.gt.f32.partialorder %v3263_v6, 0.0 }
 0x658   : > { %4650 = vmatpush3.bf16.msra.mxu1 %v5177_v49 }
 0x659   : > { %5280 = vpow2.f32 %v3288_v28  ;;  %v3290_v17 = vmul.f32 1.442695, %v3279_v18  ;;  %4803 = vmatprep.subr.bf16.mxu1 %v6811_v46 }
 0x65b   : > { %5282 = vpow2.f32 %v3290_v17 }
 0x65c   : > { %s4417_s24 = sshll.u32 %s7250_s23, 3 }
 0x65d   : > { %s6983_s25 = sadd.s32 %s4418_s29, %s4417_s24 }
 0x65e   : > { %v5277_v47 = vpop.eup %5276  ;;  %v3245_v39 = vpop.permute.xlu1 %3244  ;;  %s4419_s16 = sshll.u32 %s6983_s25, 7 }
 0x65f   : > { %v4373_v14 = vadd.f32 -1.0, %v5277_v47  ;;  %v6888_v31 = vsel %vm918_vm1, %v6792_v44, %v3245_v39  ;;  %s6993_s27 = scalar_lea.hbm %s7254_s1, %s4419_s16 }
 0x660   : > { %v5279_v16 = vpop.eup %5278  ;;  %v3280_v41 = vmin.f32 %v6888_v31, 0.0  ;;  %v3247_v0 = vpop.permute.xlu0 %3246  ;;  %vm3272_vm4 = vcmp.gt.f32.partialorder %v6888_v31, 0.0 }
 0x661   : > { %v3308_v63 = vsel %vm3268_vm14, %v3260_v24, %v4373_v14  ;;  %v4374_v20 = vadd.f32 -1.0, %v5279_v16  ;;  %v6898_v9 = vsel %vm918_vm1, %v6794_v45, %v3247_v0 }
 0x662   : > { %v3324_v50 = vrot.slane %v3308_v63, 7  ;;  %v3292_v44 = vmul.f32 1.442695, %v3280_v41  ;;  %v3281_v2 = vmin.f32 %v6898_v9, 0.0  ;;  %vm3273_vm5 = vcmp.gt.f32.partialorder %v6898_v9, 0.0 }
 0x663   : > { %v5281_v30 = vpop.eup %5280  ;;  %v3309_v3 = vsel %vm3269_vm15, %v3261_v38, %v4374_v20  ;;  %v3249_v59 = vpop.permute.xlu1 %3248 }
 0x664   : > { %v6907_v45 = vsel %vm1002_vm2, 0.0, %v3324_v50  ;;  %v3356_v48 = vrot.slane %v3324_v50, 1  ;;  %v3325_v52 = vrot.slane %v3309_v3, 7  ;;  %v4375_v62 = vadd.f32 -1.0, %v5281_v30 }
 0x665   : > { %v5283_v29 = vpop.eup %5282  ;;  %v3355_v53 = vrot.slane %v6907_v45, 1  ;;  %5284 = vpow2.f32 %v3292_v44  ;;  %v3294_v33 = vmul.f32 1.442695, %v3281_v2  ;;  %v3266_v27 = vsel %vm918_vm1, %v6799_v32, %v3249_v59  ;;  %v3251_v54 = vpop.permute.xlu0 %3250 }
 0x666   : > { %v6914_v21 = vsel %vm1002_vm2, 0.0, %v3325_v52  ;;  %v3359_v4 = vrot.slane %v3325_v52, 1  ;;  %v3310_v11 = vsel %vm3270_vm0, %v3262_v8, %v4375_v62  ;;  %v4376_v24 = vadd.f32 -1.0, %v5283_v29 }
 0x667   : > { %v3358_v34 = vrot.slane %v6914_v21, 1  ;;  %v3326_v61 = vrot.slane %v3310_v11, 7  ;;  %5286 = vpow2.f32 %v3294_v33  ;;  %v3282_v38 = vmin.f32 %v3266_v27, 0.0 }
 0x668   : > { %v3311_v46 = vsel %vm3271_vm3, %v3263_v6, %v4376_v24  ;;  %v3267_v42 = vsel %vm918_vm1, %v6802_v5, %v3251_v54  ;;  %v3357_v15 = vsel %vm1037_vm6, %v3355_v53, %v3356_v48  ;;  %vm3274_vm7 = vcmp.gt.f32.partialorder %v3266_v27, 0.0 }
 0x669   : > { %v6921_v32 = vsel %vm1002_vm2, 0.0, %v3326_v61  ;;  %v3362_v37 = vrot.slane %v3326_v61, 1  ;;  %v3327_v23 = vrot.slane %v3311_v46, 7  ;;  %v3296_v58 = vmul.f32 1.442695, %v3282_v38 }
 0x66a   : > { %v3361_v8 = vrot.slane %v6921_v32, 1  ;;  %v3283_v35 = vmin.f32 %v3267_v42, 0.0  ;;  %v3360_v28 = vsel %vm1037_vm6, %v3358_v34, %v3359_v4  ;;  %vm3275_vm8 = vcmp.gt.f32.partialorder %v3267_v42, 0.0 }
 0x66b   : > { %v6927_v18 = vsel %vm1002_vm2, 0.0, %v3327_v23  ;;  %v3365_v6 = vrot.slane %v3327_v23, 1  ;;  %v5036_v17 = vpack.i.bf16 %v3360_v28, %v3357_v15  ;;  %5288 = vpow2.f32 %v3296_v58 }
 0x66c   : > { %v3364_v5 = vrot.slane %v6927_v18, 1  ;;  %v3298_v47 = vmul.f32 1.442695, %v3283_v35  ;;  %v3363_v39 = vsel %vm1037_vm6, %v3361_v8, %v3362_v37 }
 0x66d   : > { %5037 = vrot.lane.b32.xlu1 %v5036_v17, %s5470_s8 }
 0x66e   : > { %5290 = vpow2.f32 %v3298_v47  ;;  %v3366_v14 = vsel %vm1037_vm6, %v3364_v5, %v3365_v6 }
 0x66f   : > { %v5285_v16 = vpop.eup %5284  ;;  %v5041_v41 = vpack.i.bf16 %v3366_v14, %v3363_v39 }
 0x670   : > { %v4377_v0 = vadd.f32 -1.0, %v5285_v16 }
 0x671   : > { %v5287_v55 = vpop.eup %5286  ;;  %5042 = vrot.lane.b32.xlu0 %v5041_v41, %s5470_s8 }
 0x672   : > { %v3312_v49 = vsel %vm3272_vm4, %v6888_v31, %v4377_v0  ;;  %v4378_v63 = vadd.f32 -1.0, %v5287_v55 }
 0x673   : > { %v3328_v20 = vrot.slane %v3312_v49, 7 }
 0x674   : > { %v3313_v50 = vsel %vm3273_vm5, %v6898_v9, %v4378_v63 }
 0x675   : > { %v6939_v44 = vsel %vm1002_vm2, 0.0, %v3328_v20  ;;  %v3329_v2 = vrot.slane %v3313_v50, 7  ;;  %v5289_v30 = vpop.eup %5288  ;;  %v3368_v59 = vrot.slane %v3328_v20, 1 }
 0x676   : > { %v3367_v3 = vrot.slane %v6939_v44, 1  ;;  %v4379_v62 = vadd.f32 -1.0, %v5289_v30 }
 0x677   : > { %v3345_v48 = vsel %vm1002_vm2, 0.0, %v3329_v2  ;;  %v3371_v52 = vrot.slane %v3329_v2, 1 }
 0x678   : > { %v5291_v29 = vpop.eup %5290  ;;  %v3370_v31 = vrot.slane %v3345_v48, 1  ;;  %v3314_v53 = vsel %vm3274_vm7, %v3266_v27, %v4379_v62  ;;  %v3369_v9 = vsel %vm1037_vm6, %v3367_v3, %v3368_v59 }
 0x679   : > { %v4380_v33 = vadd.f32 -1.0, %v5291_v29  ;;  %v3330_v54 = vrot.slane %v3314_v53, 7 }
 0x67a   : > { %v3372_v4 = vsel %vm1037_vm6, %v3370_v31, %v3371_v52 }
 0x67b   : > { %v3315_v11 = vsel %vm3275_vm8, %v3267_v42, %v4380_v33  ;;  %v5046_v24 = vpack.i.bf16 %v3372_v4, %v3369_v9  ;;  %v3346_v34 = vsel %vm1002_vm2, 0.0, %v3330_v54  ;;  %v3374_v38 = vrot.slane %v3330_v54, 1 }
 0x67c   : > { %v3331_v61 = vrot.slane %v3315_v11, 7  ;;  %v3373_v46 = vrot.slane %v3346_v34, 1 }
 0x67d   : > { %5047 = vrot.lane.b32.xlu1 %v5046_v24, %s5470_s8 }
 0x67e   : > { %v3347_v37 = vsel %vm1002_vm2, 0.0, %v3331_v61  ;;  %v3378_v23 = vrot.slane %v3331_v61, 1  ;;  %v3375_v15 = vsel %vm1037_vm6, %v3373_v46, %v3374_v38 }
 0x67f   : > { %v3377_v27 = vrot.slane %v3347_v37, 1 }
 0x681   : > { %v3379_v8 = vsel %vm1037_vm6, %v3377_v27, %v3378_v23 }
 0x682   : > { %v5051_v58 = vpack.i.bf16 %v3379_v8, %v3375_v15 }
 0x684   : > { %5052 = vrot.lane.b32.xlu0 %v5051_v58, %s5470_s8 }
 0x6df   : > { %v5038_v42 = vpop.permute.xlu1 %5037 }
 0x6e0   : > { %v5040_v35 = vunpack.i.h.bf16 %v5038_v42  ;;  %v5039_v28 = vunpack.i.l.bf16 %v5038_v42 }
 0x6e2   : > { %v3404_v6 = vsel %vm1183_vm13, %v6907_v45, %v5039_v28  ;;  %v3405_v17 = vsel %vm1183_vm13, %v6914_v21, %v5040_v35 }
 0x6e3   : > { %v5043_v5 = vpop.permute.xlu0 %5042  ;;  %v3412_v47 = vpack.c.bf16 %v3404_v6, %v6721_v1  ;;  %v3413_v39 = vpack.c.bf16 %v3405_v17, %v3404_v6 }
 0x6e4   : > { %v5045_v14 = vunpack.i.h.bf16 %v5043_v5  ;;  %v5044_v16 = vunpack.i.l.bf16 %v5043_v5 }
 0x6e5   : > { %3587 = vmatprep.mubr.bf16.mxu1 %v3413_v39  ;;  %3787 = vmatprep.mubr.bf16.mxu0 %v3413_v39 }
 0x6e6   : > { %3588 = vmatmul.mubr.bf16.vlgmr.msra.gmra.mrb[32].mxu1 %v3412_v47  ;;  %3788 = vmatmul.mubr.bf16.vlgmr.msra.gmra.mrb[64].mxu0 %v3412_v47  ;;  %v3406_v41 = vsel %vm1183_vm13, %v6921_v32, %v5044_v16  ;;  %v3407_v0 = vsel %vm1183_vm13, %v6927_v18, %v5045_v14 }
 0x6e7   : > { %4811 = vmatpush3.bf16.msra.mxu1 %v6814_v43  ;;  %v3415_v45 = vpack.c.bf16 %v3407_v0, %v3406_v41  ;;  %v3414_v1 = vpack.c.bf16 %v3406_v41, %v3405_v17 }
 0x6e8   : > { %4804 = vmatprep.subr.bf16.mxu1 %v6819_v26 }
 0x6e9   : > { %3595 = vmatprep.mubr.bf16.mxu1 %v3415_v45  ;;  %3795 = vmatprep.mubr.bf16.mxu0 %v3415_v45 }
 0x6eb   : > { %4812 = vmatpush3.bf16.msra.mxu1 %v6824_v19 }
 0x6ec   : > { %4805 = vmatprep.subr.bf16.mxu1 %v6829_v60 }
 0x6ee   : > { %3596 = vmatmul.mubr.bf16.gmra.mrb[36].mxu1 %v3414_v1  ;;  %3796 = vmatmul.mubr.bf16.gmra.mrb[68].mxu0 %v3414_v1 }
 0x6ef   : > { %4813 = vmatpush3.bf16.msra.mxu1 %v6834_v51  ;;  %v5048_v21 = vpop.permute.xlu1 %5047 }
 0x6f0   : > { %v5050_v32 = vunpack.i.h.bf16 %v5048_v21  ;;  %v5049_v55 = vunpack.i.l.bf16 %v5048_v21  ;;  %4806 = vmatprep.subr.bf16.mxu1 %v6839_v12 }
 0x6f2   : > { %v3408_v43 = vsel %vm1183_vm13, %v6939_v44, %v5049_v55  ;;  %v3409_v26 = vsel %vm1183_vm13, %v3345_v48, %v5050_v32 }
 0x6f3   : > { %4814 = vmatpush3.bf16.msra.mxu1 %v6844_v57  ;;  %v3417_v19 = vpack.c.bf16 %v3409_v26, %v3408_v43  ;;  %v3416_v18 = vpack.c.bf16 %v3408_v43, %v3407_v0 }
 0x6f4   : > { %4807 = vmatprep.subr.bf16.mxu1 %v6849_v56 }
 0x6f5   : > { %3603 = vmatprep.mubr.bf16.mxu1 %v3417_v19  ;;  %3803 = vmatprep.mubr.bf16.mxu0 %v3417_v19 }
 0x6f6   : > { %v5053_v60 = vpop.permute.xlu0 %5052  ;;  %3604 = vmatmul.mubr.bf16.gmra.mrb[40].mxu1 %v3416_v18  ;;  %3804 = vmatmul.mubr.bf16.gmra.mrb[72].mxu0 %v3416_v18 }
 0x6f7   : > { %v5055_v51 = vunpack.i.h.bf16 %v5053_v60  ;;  %v5054_v49 = vunpack.i.l.bf16 %v5053_v60  ;;  %4815 = vmatpush3.bf16.msra.mxu1 %v6854_v7 }
 0x6f8   : > { %4808 = vmatprep.subr.bf16.mxu1 %v6859_v36 }
 0x6f9   : > { %v3410_v12 = vsel %vm1183_vm13, %v3346_v34, %v5054_v49  ;;  %v3411_v57 = vsel %vm1183_vm13, %v3347_v37, %v5055_v51 }
 0x6fa   : > { %v3419_v63 = vpack.c.bf16 %v3411_v57, %v3410_v12  ;;  %v3418_v56 = vpack.c.bf16 %v3410_v12, %v3409_v26 }
 0x6fb   : > { %4816 = vmatpush3.bf16.msra.mxu1 %v6864_v10 }
 0x6fc   : > { %3611 = vmatprep.mubr.bf16.mxu1 %v3419_v63  ;;  %4809 = vmatprep.subr.bf16.mxu1 %v6869_v22 }
 0x6fe   : > { %3612 = vmatmul.mubr.bf16.gmra.mrb[44].mxu1 %v3418_v56 }
 0x6ff   : > { %4817 = vmatpush3.bf16.msra.mxu1 %v6874_v40  ;;  %3811 = vmatprep.mubr.bf16.mxu1 %v3419_v63 }
 0x700   : > { %4810 = vmatprep.subr.bf16.mxu1 %v6894_v13 }
 0x703   : > { %4818 = vmatpush3.bf16.msra.mxu1 %v6901_v25 }
 0x706   : > { %3812 = vmatmul.mubr.bf16.vlgmr.msra.gmra.mrb[48].mxu1 %v3418_v56 }
 0x707   : > { %5353 = shalt.err (!%p5350_p9)
}
 0x708   : > { %s5354_s22 = scalar_lea.hbm %s6993_s27, 1024  ;;  %s5358_s23 = scalar_lea.hbm %s7254_s1, 4096 }
 0x709   : > { %p5355_p10 = scmp.ne.s32.totalorder %s6993_s27, %s5354_s22  ;;  %p5359_p13 = scmp.lt.u32.totalorder %s6993_s27, %s7254_s1 }
 0x70a   : > { %p5360_p0 = scmp.lt.u32.totalorder %s5358_s23, %s5354_s22  ;;  %p5362_p2 = scmp.lt.u32.totalorder %s5354_s22, %s6993_s27 }
 0x70b   : > { %p5356_p11 = pnand %p5355_p10, %p5616_p3 }
 0x70c   : > { %p5361_p1 = por %p5360_p0, %p5359_p13 }
 0x70d   : > { %p5357_p12 = pneg %p5356_p11 }
 0x70e   : > { %p5363_p4 = por %p5362_p2, %p5361_p1 }
 0x710   : > { %p5364_p5 = pnand %p5363_p4, %p5357_p12 }
 0x712   : > { %5367 = shalt.err (!%p5364_p5)
}
 0x713   : > { %s5472_s29 = smov 128   ;;  %s5473_s15 = smov 8   ;;  %v7027_v22 = vld [vmem:[%s831_s4] ss:$0 sm:$0xff] }
 0x714   : > { %4820 = dma.vmem_to_hbm [thread:$0]  (%p5616_p3), %s6985_s28, 1024, %s6993_s27, %s3909_s14, %s5472_s29, %s5472_s29, %s5473_s15  }
 0x715   : > { %s3947_s20 = sshll.u32 %s5724_s21, 4  ;;  %s7257_s0 = sld [smem:[#allocation36_spill]]  ;;  %s7105_s20 = int_to_ptr.vmem [resolvable:$true] %s3947_s20 }
 0x716   : > { %s3914_s19 = scalar_lea.sflag [#allocation7], %s7252_s5  ;;  %s5368_s11 = scalar_lea.vmem %s7105_s20, 1024 }
 0x717   : > { %p5369_p6 = scmp.ne.s32.totalorder %s7105_s20, %s5368_s11  ;;  %s5474_s25 = smov [#allocation6]  }
 0x718   : > { %s5372_s23 = sshll.u32 %s5474_s25, 4  ;;  %s5373_s23 = int_to_ptr.vmem [resolvable:$false] %s5372_s23 }
 0x719   : > { %p5370_p7 = pnand %p5369_p6, %p5616_p3  ;;  %p5375_p10 = scmp.lt.s32.totalorder %s7105_s20, %s5373_s23 }
 0x71b   : > { %s7258_s22 = smov %s7257_s0  ;;  %s7103_s26 = scalar_lea.hbm %s7257_s0, %s4419_s16 }
 0x71c   : > { %p5371_p9 = pneg %p5370_p7  ;;  %s5374_s16 = scalar_lea.vmem %s5373_s23, 2048 }
 0x71d   : > { %p5376_p11 = scmp.lt.s32.totalorder %s5374_s16, %s5368_s11 }
 0x71f   : > { %p5377_p12 = por %p5376_p11, %p5375_p10 }
 0x721   : > { %p5378_p13 = pnand %p5377_p12, %p5371_p9 }
 0x7b9   : > { %v4651_v7 = vpop.f32.mrb[32].mxu1  ;;  %v4691_v36 = vpop.f32.mrb[64].mxu0 }
 0x7ba   : > { %v4652_v10 = vpop.f32.mrb[33].mxu1  ;;  %v4692_v40 = vpop.f32.mrb[65].mxu0 }
 0x7bb   : > { %v7029_v13 = vadd.f32 %v4652_v10, %v4651_v7  ;;  %v4693_v25 = vadd.f32 %v4692_v40, %v4691_v36  ;;  %v4654_v20 = vpop.f32.mrb[34].mxu1  ;;  %v4694_v50 = vpop.f32.mrb[66].mxu0  ;;  %v7056_v10 = vld [vmem:[%s828_s2] ss:$0 sm:$0xff] }
 0x7bc   : > { %v4655_v44 = vpop.f32.mrb[35].mxu1  ;;  %v4695_v2 = vpop.f32.mrb[67].mxu0 }
 0x7bd   : > { %v3790_v30 = vadd.f32 %v4693_v25, %v7027_v22  ;;  %v7032_v3 = vadd.f32 %v4655_v44, %v4654_v20  ;;  %v4696_v59 = vadd.f32 %v4695_v2, %v4694_v50  ;;  %v3590_v20 = vadd.f32 %v7029_v13, %v7056_v10 }
 0x7bf   : > { %v3820_v48 = vsub.f32 0.0, %v3790_v30  ;;  %v3793_v52 = vadd.f32 %v4696_v59, %v7027_v22 }
 0x7c1   : > { %v3828_v62 = vmul.f32 1.442695, %v3820_v48  ;;  %v3821_v29 = vsub.f32 0.0, %v3793_v52  ;;  %v4657_v31 = vpop.f32.mrb[36].mxu1  ;;  %v4697_v53 = vpop.f32.mrb[68].mxu0  ;;  %v3593_v48 = vadd.f32 %v7032_v3, %v7056_v10  ;;  %v5333_v3 = vld [vmem:[#allocation3 + $0x8] sm:$0xff] }
 0x7c2   : > { %v4658_v33 = vpop.f32.mrb[37].mxu1  ;;  %v4698_v54 = vpop.f32.mrb[69].mxu0 }
 0x7c3   : > { %5292 = vpow2.f32 %v3828_v62  ;;  %v3830_v9 = vmul.f32 1.442695, %v3821_v29  ;;  %v7035_v4 = vadd.f32 %v4658_v33, %v4657_v31  ;;  %v4699_v11 = vadd.f32 %v4698_v54, %v4697_v53  ;;  %v4660_v24 = vpop.f32.mrb[38].mxu1  ;;  %v4700_v34 = vpop.f32.mrb[70].mxu0  ;;  %v5332_v33 = vld [vmem:[#allocation3] sm:$0xff] }
 0x7c4   : > { %v4661_v61 = vpop.f32.mrb[39].mxu1  ;;  %v4701_v46 = vpop.f32.mrb[71].mxu0 }
 0x7c5   : > { %5294 = vpow2.f32 %v3830_v9  ;;  %v3798_v38 = vadd.f32 %v4699_v11, %v7027_v22  ;;  %v7038_v37 = vadd.f32 %v4661_v61, %v4660_v24  ;;  %v4702_v23 = vadd.f32 %v4701_v46, %v4700_v34 }
 0x7c7   : > { %v3822_v27 = vsub.f32 0.0, %v3798_v38  ;;  %v3801_v15 = vadd.f32 %v4702_v23, %v7027_v22 }
 0x7c9   : > { %v3832_v8 = vmul.f32 1.442695, %v3822_v27  ;;  %v4663_v58 = vpop.f32.mrb[40].mxu1  ;;  %v4703_v42 = vpop.f32.mrb[72].mxu0  ;;  %v3823_v35 = vsub.f32 0.0, %v3801_v15  ;;  %v3598_v27 = vadd.f32 %v7035_v4, %v7056_v10  ;;  %v5335_v4 = vld [vmem:[#allocation3 + $0x18] sm:$0xff] }
 0x7ca   : > { %v4664_v28 = vpop.f32.mrb[41].mxu1  ;;  %v4704_v6 = vpop.f32.mrb[73].mxu0 }
 0x7cb   : > { %5296 = vpow2.f32 %v3832_v8  ;;  %v7041_v17 = vadd.f32 %v4664_v28, %v4663_v58  ;;  %v4705_v5 = vadd.f32 %v4704_v6, %v4703_v42  ;;  %v4666_v47 = vpop.f32.mrb[42].mxu1  ;;  %v4706_v39 = vpop.f32.mrb[74].mxu0  ;;  %v3834_v14 = vmul.f32 1.442695, %v3823_v35  ;;  %v5334_v6 = vld [vmem:[#allocation3 + $0x10] sm:$0xff] }
 0x7cc   : > { %v4667_v16 = vpop.f32.mrb[43].mxu1  ;;  %v4707_v41 = vpop.f32.mrb[75].mxu0 }
 0x7cd   : > { %v5293_v0 = vpop.eup %5292  ;;  %v3806_v45 = vadd.f32 %v4705_v5, %v7027_v22  ;;  %v7044_v1 = vadd.f32 %v4667_v16, %v4666_v47  ;;  %v4708_v21 = vadd.f32 %v4707_v41, %v4706_v39  ;;  %5298 = vpow2.f32 %v3834_v14 }
 0x7ce   : > { %v3844_v32 = vadd.f32 1.0, %v5293_v0  ;;  %v3606_v14 = vadd.f32 %v7041_v17, %v7056_v10  ;;  %v5337_v17 = vld [vmem:[#allocation3 + $0x28] sm:$0xff] }
 0x7cf   : > { %v5295_v55 = vpop.eup %5294  ;;  %v3824_v43 = vsub.f32 0.0, %v3806_v45  ;;  %v3809_v26 = vadd.f32 %v4708_v21, %v7027_v22  ;;  %v3609_v41 = vadd.f32 %v7044_v1, %v7056_v10  ;;  %v5336_v21 = vld [vmem:[#allocation3 + $0x20] sm:$0xff] }
 0x7d0   : > { %5300 = vrcp.f32 %v3844_v32  ;;  %v3845_v19 = vadd.f32 1.0, %v5295_v55 }
 0x7d1   : > { %v3836_v18 = vmul.f32 1.442695, %v3824_v43  ;;  %v3825_v60 = vsub.f32 0.0, %v3809_v26  ;;  %v4669_v51 = vpop.f32.mrb[44].mxu1 }
 0x7d2   : > { %5302 = vrcp.f32 %v3845_v19  ;;  %v4670_v49 = vpop.f32.mrb[45].mxu1 }
 0x7d3   : > { %5304 = vpow2.f32 %v3836_v18  ;;  %v3838_v12 = vmul.f32 1.442695, %v3825_v60  ;;  %v7047_v57 = vadd.f32 %v4670_v49, %v4669_v51  ;;  %v4672_v63 = vpop.f32.mrb[46].mxu1 }
 0x7d4   : > { %v4673_v56 = vpop.f32.mrb[47].mxu1 }
 0x7d5   : > { %v5297_v7 = vpop.eup %5296  ;;  %5306 = vpow2.f32 %v3838_v12  ;;  %v7049_v36 = vadd.f32 %v4673_v56, %v4672_v63  ;;  %v3614_v1 = vadd.f32 %v7047_v57, %v7056_v10  ;;  %v5338_v63 = vld [vmem:[#allocation3 + $0x30] sm:$0xff] }
 0x7d6   : > { %v3846_v40 = vadd.f32 1.0, %v5297_v7 }
 0x7d7   : > { %v5299_v25 = vpop.eup %5298  ;;  %v3617_v51 = vadd.f32 %v7049_v36, %v7056_v10 }
 0x7d8   : > { %5308 = vrcp.f32 %v3846_v40  ;;  %v3847_v50 = vadd.f32 1.0, %v5299_v25  ;;  %v5339_v40 = vld [vmem:[#allocation3 + $0x38] sm:$0xff] }
 0x7d9   : > { %v4709_v44 = vpop.f32.mrb[48].mxu1 }
 0x7da   : > { %v5301_v2 = vpop.eup %5300  ;;  %v4710_v30 = vpop.f32.mrb[49].mxu1  ;;  %5310 = vrcp.f32 %v3847_v50 }
 0x7db   : > { %v3860_v59 = vmul.f32 %v5301_v2, %v3590_v20  ;;  %v4711_v52 = vadd.f32 %v4710_v30, %v4709_v44  ;;  %v4712_v62 = vpop.f32.mrb[50].mxu1 }
 0x7dc   : > { %v5303_v29 = vpop.eup %5302  ;;  %v4713_v31 = vpop.f32.mrb[51].mxu1 }
 0x7dd   : > { %v5305_v53 = vpop.eup %5304  ;;  %v3868_v54 = vadd.f32 %v5332_v33, %v3860_v59  ;;  %v3861_v9 = vmul.f32 %v5303_v29, %v3593_v48  ;;  %v3814_v13 = vadd.f32 %v4711_v52, %v7027_v22  ;;  %v4714_v11 = vadd.f32 %v4713_v31, %v4712_v62 }
 0x7de   : > { %v3848_v24 = vadd.f32 1.0, %v5305_v53 }
 0x7df   : > { %v5307_v34 = vpop.eup %5306  ;;  %3884 = vst.msk [vmem:[#allocation3] sm:$0xff] %vm918_vm1, %v3868_v54  ;;  %3900 = vst.msk [vmem:[%s5724_s21] sm:$0xff] %vm918_vm1, %v3868_v54  ;;  %v3869_v61 = vadd.f32 %v5333_v3, %v3861_v9  ;;  %v3826_v46 = vsub.f32 0.0, %v3814_v13  ;;  %v3817_v38 = vadd.f32 %v4714_v11, %v7027_v22  ;;  %v3601_v22 = vadd.f32 %v7038_v37, %v7056_v10 }
 0x7e0   : > { %5312 = vrcp.f32 %v3848_v24  ;;  %v3849_v23 = vadd.f32 1.0, %v5307_v34 }
 0x7e1   : > { %3885 = vst.msk [vmem:[#allocation3 + $0x8] sm:$0xff] %vm918_vm1, %v3869_v61  ;;  %3901 = vst.msk [vmem:[%s5724_s21 + $0x8] sm:$0xff] %vm918_vm1, %v3869_v61  ;;  %v3840_v15 = vmul.f32 1.442695, %v3826_v46  ;;  %v3827_v8 = vsub.f32 0.0, %v3817_v38 }
 0x7e2   : > { %v5309_v58 = vpop.eup %5308  ;;  %5314 = vrcp.f32 %v3849_v23 }
 0x7e3   : > { %v3862_v42 = vmul.f32 %v5309_v58, %v3598_v27  ;;  %5316 = vpow2.f32 %v3840_v15  ;;  %v3842_v35 = vmul.f32 1.442695, %v3827_v8 }
 0x7e4   : > { %v5311_v28 = vpop.eup %5310 }
 0x7e5   : > { %v3870_v5 = vadd.f32 %v5334_v6, %v3862_v42  ;;  %5318 = vpow2.f32 %v3842_v35  ;;  %v3863_v47 = vmul.f32 %v5311_v28, %v3601_v22 }
 0x7e7   : > { %3886 = vst.msk [vmem:[#allocation3 + $0x10] sm:$0xff] %vm918_vm1, %v3870_v5  ;;  %3902 = vst.msk [vmem:[%s5724_s21 + $0x10] sm:$0xff] %vm918_vm1, %v3870_v5  ;;  %v3871_v39 = vadd.f32 %v5335_v4, %v3863_v47 }
 0x7e9   : > { %3887 = vst.msk [vmem:[#allocation3 + $0x18] sm:$0xff] %vm918_vm1, %v3871_v39  ;;  %3903 = vst.msk [vmem:[%s5724_s21 + $0x18] sm:$0xff] %vm918_vm1, %v3871_v39 }
 0x7ea   : > { %v5313_v16 = vpop.eup %5312 }
 0x7eb   : > { %v3864_v37 = vmul.f32 %v5313_v16, %v3606_v14 }
 0x7ec   : > { %v5315_v0 = vpop.eup %5314 }
 0x7ed   : > { %v5317_v45 = vpop.eup %5316  ;;  %v3872_v32 = vadd.f32 %v5336_v21, %v3864_v37  ;;  %v3865_v55 = vmul.f32 %v5315_v0, %v3609_v41 }
 0x7ee   : > { %v3850_v43 = vadd.f32 1.0, %v5317_v45 }
 0x7ef   : > { %v5319_v26 = vpop.eup %5318  ;;  %3888 = vst.msk [vmem:[#allocation3 + $0x20] sm:$0xff] %vm918_vm1, %v3872_v32  ;;  %3904 = vst.msk [vmem:[%s5724_s21 + $0x20] sm:$0xff] %vm918_vm1, %v3872_v32  ;;  %v3873_v19 = vadd.f32 %v5337_v17, %v3865_v55 }
 0x7f0   : > { %5320 = vrcp.f32 %v3850_v43  ;;  %v3851_v18 = vadd.f32 1.0, %v5319_v26 }
 0x7f1   : > { %3889 = vst.msk [vmem:[#allocation3 + $0x28] sm:$0xff] %vm918_vm1, %v3873_v19  ;;  %3905 = vst.msk [vmem:[%s5724_s21 + $0x28] sm:$0xff] %vm918_vm1, %v3873_v19 }
 0x7f2   : > { %5322 = vrcp.f32 %v3851_v18 }
 0x7fa   : > { %v5321_v60 = vpop.eup %5320 }
 0x7fb   : > { %v3866_v49 = vmul.f32 %v5321_v60, %v3614_v1 }
 0x7fc   : > { %v5323_v12 = vpop.eup %5322 }
 0x7fd   : > { %v3874_v56 = vadd.f32 %v5338_v63, %v3866_v49  ;;  %v3867_v7 = vmul.f32 %v5323_v12, %v3617_v51 }
 0x7ff   : > { %3890 = vst.msk [vmem:[#allocation3 + $0x30] sm:$0xff] %vm918_vm1, %v3874_v56  ;;  %3906 = vst.msk [vmem:[%s5724_s21 + $0x30] sm:$0xff] %vm918_vm1, %v3874_v56  ;;  %v3875_v25 = vadd.f32 %v5339_v40, %v3867_v7 }
 0x801   : > { %3891 = vst.msk [vmem:[#allocation3 + $0x38] sm:$0xff] %vm918_vm1, %v3875_v25  ;;  %3907 = vst.msk [vmem:[%s5724_s21 + $0x38] sm:$0xff] %vm918_vm1, %v3875_v25 }
 0x802   : > { %5381 = shalt.err (!%p5378_p13)
}
 0x803   : > { %s5382_s21 = scalar_lea.hbm %s7103_s26, 1024  ;;  %s5386_s18 = scalar_lea.hbm %s7258_s22, 4096 }
 0x804   : > { %p5383_p0 = scmp.ne.s32.totalorder %s7103_s26, %s5382_s21  ;;  %p5387_p4 = scmp.lt.u32.totalorder %s7103_s26, %s7258_s22 }
 0x805   : > { %p5388_p5 = scmp.lt.u32.totalorder %s5386_s18, %s5382_s21  ;;  %p5390_p7 = scmp.lt.u32.totalorder %s5382_s21, %s7103_s26 }
 0x806   : > { %p5384_p1 = pnand %p5383_p0, %p5616_p3 }
 0x807   : > { %p5389_p6 = por %p5388_p5, %p5387_p4 }
 0x808   : > { %p5385_p2 = pneg %p5384_p1 }
 0x809   : > { %p5391_p9 = por %p5390_p7, %p5389_p6 }
 0x80b   : > { %p5392_p10 = pnand %p5391_p9, %p5385_p2 }
 0x80d   : > { %5395 = shalt.err (!%p5392_p10)
}
 0x80e   : > { %4821 = dma.vmem_to_hbm [thread:$0]  (%p5616_p3), %s7105_s20, 1024, %s7103_s26, %s3914_s19, %s5472_s29, %s5472_s29, %s5473_s15  }
 0x80f PF: > { %s7259_s4 = sld [smem:[#allocation17_spill]]  ;;  %s7260_s28 = sld [smem:[#allocation10_spill]] }
 0x815   : > { %p4831_p11 = scmp.ge.s32.totalorder %s7259_s4, 2  ;;  %s3962_s2 = sand.u32 1, %s7260_s28  }
 0x816   : > { %s3963_s14 = scalar_lea.sflag [#allocation5], %s3962_s2 }
 0x817   : > { %p4825_p12 = pnand %p4831_p11, %p5625_p8 }
 0x819   : > { %5429 = dma.done.wait (!%p4825_p12), %s3963_s14, 1024  }
 0x81a   : > { %5431 = vsyncadd (!%p4825_p12), %s3963_s14, 4294966272  ;;  %s3972_s8 = scalar_lea.sflag [#allocation7], %s3962_s2 }
 0x81b   : > { %5433 = dma.done.wait (!%p4825_p12), %s3972_s8, 1024  }
 0x81c   : > { %5435 = vsyncadd (!%p4825_p12), %s3972_s8, 4294966272  ;;  %s34_s30 = sadd.s32 1, %s7259_s4   ;;  %s7262_s24 = sld [smem:[#allocation11_spill]] }
 0x81d   : > { %p31_p13 = scmp.ge.s32.totalorder %s34_s30, 6   ;;  %s7263_s25 = sld [smem:[#allocation12_spill]] }
 0x81e   : > { %s7264_s26 = sld [smem:[#allocation22_spill]]  ;;  %s7265_s27 = sld [smem:[#allocation15_spill]] }
 0x81f   : > { %s7266_s28 = sld [smem:[#allocation16_spill]]  ;;  %s7267_s29 = sld [smem:[#allocation18_spill]] }
 0x820   : > { %s7268_s0 = sld [smem:[#allocation20_spill]]  ;;  %33 = sbr.rel (!%p31_p13) target bundleno = 20 (0x14), region = 185 }
 0x827   :  { %3977 = vsyncpa [#allocation5], 1 }
 0x828   :  { %3979 = vsyncpa [#allocation5 + $0x1], 1 }
 0x829   :  { %3980 = vsyncpa [#allocation7], 1 }
 0x82a   :  { %3982 = vsyncpa [#allocation7 + $0x1], 1 }

</bundles_post_ra>
